<compile_context>
chip_gen: v5e
topology: v5e:2x2
jax: 0.10.0
libtpu: 0.0.40
codegen_flags: <defaults>
</compile_context>

<pallas_src>
import math
from functools import partial

import jax
import jax.numpy as jnp
from jax.experimental import pallas as pl
from jax.experimental.pallas import tpu as pltpu

BN_EPS = 1e-5


# ------------------------------ fused kernel --------------------------------

def _make_seblock_kernel(s, B_blk, Ho, Wo, Cin, C, Wp2, has_down):
    """Fused SEBasicBlock kernel; one grid step processes B_blk batch samples.

    Ref order: [phase_0 .. phase_{s*s-1}, w1, b1, w2, b2, sw1, sb1, sw2, sb2,
                (wd, bd)?, out, pad_scratch]
    """
    n_ph = s * s
    M = B_blk * Ho * Wo          # matmul rows per step (fills MXU rows)
    f32 = jnp.float32

    def kernel(*refs):
        ph_refs = refs[:n_ph]
        (w1_ref, b1_ref, w2_ref, b2_ref,
         sw1_ref, sb1_ref, sw2_ref, sb2_ref) = refs[n_ph:n_ph + 8]
        idx = n_ph + 8
        if has_down:
            wd_ref, bd_ref = refs[idx], refs[idx + 1]
            idx += 2
        o_ref, pad_ref = refs[idx], refs[idx + 1]

        # conv1 tap (dy,dx) at stride s reads phase (dy%s, dx%s) at offset
        # (dy//s, dx//s): every tap patch is already decimated to the output
        # resolution (no wasted MACs, no selection matmul).
        def c1_patch(dy, dx):
            ref = ph_refs[(dy % s) * s + (dx % s)]
            a, b = dy // s, dx // s
            return ref[:, a:a + Ho, b:b + Wo, :].reshape(M, Cin)

        # --- conv1 (3x3, stride s) + folded BN1 + ReLU -----------------------
        # Clean dot-accumulate chain; the accumulator is M x C f32 = 16 vregs,
        # so it stays resident across all 9 taps.
        acc1 = jnp.dot(c1_patch(0, 0), w1_ref[:Cin, :], preferred_element_type=f32)
        for t in range(1, 9):
            dy, dx = divmod(t, 3)
            acc1 = acc1 + jnp.dot(c1_patch(dy, dx),
                                  w1_ref[t * Cin:(t + 1) * Cin, :],
                                  preferred_element_type=f32)
        out1 = jnp.maximum(acc1 + b1_ref[...], 0.0).astype(jnp.bfloat16)

        # --- zero-pad conv1 output in VMEM scratch for conv2 ------------------
        # Border (and the sublane-padding columns) are zeroed once; later steps
        # only rewrite the interior.  Safe because the grid axis is sequential
        # ("arbitrary"), so program_id 0 always runs first on this core.
        @pl.when(pl.program_id(0) == 0)
        def _init_pad():
            pad_ref[...] = jnp.zeros((B_blk, Ho + 2, Wp2, C), jnp.bfloat16)

        pad_ref[:, 1:1 + Ho, 1:1 + Wo, :] = out1.reshape(B_blk, Ho, Wo, C)

        def c2_patch(t):
            dy, dx = divmod(t, 3)
            return pad_ref[:, dy:dy + Ho, dx:dx + Wo, :].reshape(M, C)

        # --- conv2 (3x3, stride 1) + folded BN2 (no ReLU yet) -----------------
        # Consecutive taps are paired along K (K = 2*C = 256) to fill the
        # 256-deep MXU on v6e/v7x; paired weight rows are contiguous in w2.
        acc2 = jnp.dot(jnp.concatenate([c2_patch(0), c2_patch(1)], axis=-1),
                       w2_ref[:2 * C, :], preferred_element_type=f32)
        for t0 in (2, 4, 6):
            acc2 = acc2 + jnp.dot(
                jnp.concatenate([c2_patch(t0), c2_patch(t0 + 1)], axis=-1),
                w2_ref[t0 * C:(t0 + 2) * C, :], preferred_element_type=f32)
        acc2 = acc2 + jnp.dot(c2_patch(8), w2_ref[8 * C:9 * C, :],
                              preferred_element_type=f32)
        out2 = (acc2 + b2_ref[...]).reshape(B_blk, Ho * Wo, C)   # f32

        # --- SE: avgpool -> FC -> ReLU -> FC -> sigmoid (all in VMEM) ---------
        pooled = jnp.mean(out2, axis=1)                          # (B_blk, C)
        h = jnp.dot(pooled.astype(jnp.bfloat16), sw1_ref[...],
                    preferred_element_type=f32) + sb1_ref[...]
        h = jnp.maximum(h, 0.0)
        g = jnp.dot(h.astype(jnp.bfloat16), sw2_ref[...],
                    preferred_element_type=f32) + sb2_ref[...]
        gate = jax.nn.sigmoid(g)                                 # (B_blk, C)

        # --- residual branch ---------------------------------------------------
        # Input pixel (s*i, s*j) lives in phase (1%s, 1%s) at offset 1//s.
        pr, ar = 1 % s, 1 // s
        xin = ph_refs[pr * s + pr][:, ar:ar + Ho, ar:ar + Wo, :].reshape(M, Cin)
        if has_down:                                             # 1x1 conv + folded BN
            res = jnp.dot(xin, wd_ref[...], preferred_element_type=f32) + bd_ref[...]
        else:                                                    # identity (Cin == C)
            res = xin.astype(f32)
        res = res.reshape(B_blk, Ho * Wo, C)

        # --- excitation scale + residual add + final ReLU ----------------------
        y = jnp.maximum(out2 * gate[:, None, :] + res, 0.0)
        o_ref[...] = y.reshape(B_blk, Ho, Wo, C).astype(o_ref.dtype)

    return kernel


def _const_spec(shape):
    zeros = (0,) * len(shape)
    return pl.BlockSpec(shape, lambda n, _z=zeros: _z)


# ----------------------------- host-side prep -------------------------------

def fold_bn(gamma, beta, mean, var):
    scale = gamma / jnp.sqrt(var + BN_EPS)
    return scale, beta - mean * scale


def prepare_block_params(p):
    """Fold BN into the convs (eval mode), reorder weights for NHWC matmuls,
    zero-pad the SE hidden width to 128 lanes, cast MXU operands to bf16."""
    f32, bf16 = jnp.float32, jnp.bfloat16
    C, Cin = p["conv1_w"].shape[:2]

    s1, b1 = fold_bn(*p["bn1"])
    w1 = jnp.transpose(p["conv1_w"], (2, 3, 1, 0)).reshape(9 * Cin, C) * s1[None, :]
    s2, b2 = fold_bn(*p["bn2"])
    w2 = jnp.transpose(p["conv2_w"], (2, 3, 1, 0)).reshape(9 * C, C) * s2[None, :]

    Cr = p["se_w1"].shape[0]
    Crp = ((Cr + 127) // 128) * 128
    sw1 = jnp.zeros((C, Crp), f32).at[:, :Cr].set(p["se_w1"].T)
    sb1 = jnp.zeros((1, Crp), f32).at[0, :Cr].set(p["se_b1"])
    sw2 = jnp.zeros((Crp, C), f32).at[:Cr, :].set(p["se_w2"].T)
    sb2 = p["se_b2"].reshape(1, C).astype(f32)

    prep = {
        "w1": w1.astype(bf16), "b1": b1.reshape(1, C).astype(f32),
        "w2": w2.astype(bf16), "b2": b2.reshape(1, C).astype(f32),
        "sw1": sw1.astype(bf16), "sb1": sb1,
        "sw2": sw2.astype(bf16), "sb2": sb2,
    }
    if "down_w" in p:                                   # inplanes != planes
        sd, bd = fold_bn(*p["down_bn"])
        wd = p["down_w"].reshape(C, Cin).T * sd[None, :]
        prep["wd"] = wd.astype(bf16)
        prep["bd"] = bd.reshape(1, C).astype(f32)
    return prep


# ------------------------------ block forward -------------------------------

@partial(jax.jit, static_argnames=("stride", "block_batch"))
def se_basic_block(x_nhwc, prep, *, stride, block_batch=2):
    """Fused SEBasicBlock forward (eval).  NHWC input -> NHWC f32 output."""
    N, H, W, Cin = x_nhwc.shape
    C = prep["b1"].shape[-1]
    has_down = "wd" in prep
    if not has_down and (Cin != C or stride != 1):
        raise ValueError("identity residual requires inplanes == planes and stride == 1")
    if N % block_batch:
        raise ValueError(f"batch {N} must be a multiple of block_batch {block_batch}")
    s, B_blk = stride, block_batch
    Ho, Wo = (H - 1) // s + 1, (W - 1) // s + 1
    Wp2 = -(-(Wo + 2) // 8) * 8                          # conv2 pad scratch sublanes
    Hq, Wq = -(-(H + 2) // s), -(-(W + 2) // s)          # phase-tensor spatial dims

    # bf16 activations, 1px zero pad, then decimate into the s*s stride phases
    # so every conv1 tap patch is already at the output resolution.  Between
    # blocks the NHWC bf16 layout is kept: no NCHW transpose and no full-res
    # padded tensor inside the fused region.
    xp = jnp.pad(x_nhwc.astype(jnp.bfloat16), ((0, 0), (1, 1), (1, 1), (0, 0)))
    xp = jnp.pad(xp, ((0, 0), (0, Hq * s - (H + 2)), (0, Wq * s - (W + 2)), (0, 0)))
    phases = [xp[:, p::s, q::s, :] for p in range(s) for q in range(s)]

    inputs = [*phases, prep["w1"], prep["b1"], prep["w2"], prep["b2"],
              prep["sw1"], prep["sb1"], prep["sw2"], prep["sb2"]]
    in_specs = ([pl.BlockSpec((B_blk, Hq, Wq, Cin), lambda n: (n, 0, 0, 0))] * (s * s)
                + [_const_spec(prep[k].shape) for k in
                   ("w1", "b1", "w2", "b2", "sw1", "sb1", "sw2", "sb2")])
    if has_down:
        inputs += [prep["wd"], prep["bd"]]
        in_specs += [_const_spec(prep["wd"].shape), _const_spec(prep["bd"].shape)]

    kernel = _make_seblock_kernel(s, B_blk, Ho, Wo, Cin, C, Wp2, has_down)
    # TODO(synk): when scaling B_blk / spatial tiles (e.g. 56x56 stages) set
    #             pltpu.CompilerParams(vmem_limit_bytes=...) and re-derive the
    #             tile sizes for v7x's 64 MiB VMEM; at this size usage is tiny.
    return pl.pallas_call(
        kernel,
        out_shape=jax.ShapeDtypeStruct((N, Ho, Wo, C), jnp.float32),
        grid=(N // B_blk,),
        in_specs=in_specs,
        out_specs=pl.BlockSpec((B_blk, Ho, Wo, C), lambda n: (n, 0, 0, 0)),
        scratch_shapes=[pltpu.VMEM((B_blk, Ho + 2, Wp2, C), jnp.bfloat16)],
        # "arbitrary" (sequential grid) so the zero-once pad-scratch init at
        # program_id==0 is valid even where a "parallel" axis is core-sharded.
        compiler_params=pltpu.CompilerParams(dimension_semantics=("arbitrary",)),
    )(*inputs)


# ------------------- pure-JAX reference (mirrors bf16 casts) -----------------

def ref_forward(x_nhwc, prep, *, stride):
    f32, hi = jnp.float32, jax.lax.Precision.HIGHEST
    q = lambda a: a.astype(jnp.bfloat16).astype(f32)

    N, H, W, Cin = x_nhwc.shape
    C = prep["b1"].shape[-1]
    Ho, Wo = (H - 1) // stride + 1, (W - 1) // stride + 1

    xb = q(x_nhwc)
    xp = jnp.pad(xb, ((0, 0), (1, 1), (1, 1), (0, 0)))
    w1, w2 = prep["w1"].astype(f32), prep["w2"].astype(f32)
    sw1, sw2 = prep["sw1"].astype(f32), prep["sw2"].astype(f32)

    def conv3x3(xpad, wmat, Ci, s):
        acc = jnp.zeros((N, Ho, Wo, C), f32)
        for dy in range(3):
            for dx in range(3):
                t = dy * 3 + dx
                patch = xpad[:, dy:dy + (Ho - 1) * s + 1:s,
                             dx:dx + (Wo - 1) * s + 1:s, :]
                acc = acc + jnp.einsum("nhwc,cd->nhwd", patch,
                                       wmat[t * Ci:(t + 1) * Ci], precision=hi)
        return acc

    out1 = q(jnp.maximum(conv3x3(xp, w1, Cin, stride)
                         + prep["b1"].reshape(1, 1, 1, C), 0.0))
    o1p = jnp.pad(out1, ((0, 0), (1, 1), (1, 1), (0, 0)))
    out2 = conv3x3(o1p, w2, C, 1) + prep["b2"].reshape(1, 1, 1, C)

    pooled = q(jnp.mean(out2, axis=(1, 2)))                       # (N, C)
    h = jnp.maximum(jnp.dot(pooled, sw1, precision=hi) + prep["sb1"], 0.0)
    gate = jax.nn.sigmoid(jnp.dot(q(h), sw2, precision=hi) + prep["sb2"])

    if "wd" in prep:
        xin = xb[:, ::stride, ::stride, :]
        res = jnp.einsum("nhwc,cd->nhwd", xin, prep["wd"].astype(f32),
                         precision=hi) + prep["bd"].reshape(1, 1, 1, C)
    else:
        res = xb
    return jnp.maximum(out2 * gate[:, None, None, :] + res, 0.0)


# ----------------------------------- main ------------------------------------

def _make_params(key, inplanes, planes, reduction, with_down):
    ks = jax.random.split(key, 8)

    def kaiming(k, cout, cin, ksz):
        return jax.random.normal(k, (cout, cin, ksz, ksz), jnp.float32) * \
            math.sqrt(2.0 / (cin * ksz * ksz))

    def bn_params(k, c):
        kg, kb, km, kv = jax.random.split(k, 4)
        return (1.0 + 0.1 * jax.random.normal(kg, (c,), jnp.float32),
                0.1 * jax.random.normal(kb, (c,), jnp.float32),
                0.1 * jax.random.normal(km, (c,), jnp.float32),
                1.0 + 0.1 * jax.random.uniform(kv, (c,), jnp.float32))

    Cr = planes // reduction
    p = {
        "conv1_w": kaiming(ks[0], planes, inplanes, 3),
        "bn1": bn_params(ks[1], planes),
        "conv2_w": kaiming(ks[2], planes, planes, 3),
        "bn2": bn_params(ks[3], planes),
        "se_w1": jax.random.normal(ks[4], (Cr, planes), jnp.float32) / math.sqrt(planes),
        "se_b1": jnp.zeros((Cr,), jnp.float32),
        "se_w2": jax.random.normal(ks[5], (planes, Cr), jnp.float32) / math.sqrt(Cr),
        "se_b2": jnp.zeros((planes,), jnp.float32),
    }
    if with_down:
        p["down_w"] = kaiming(ks[6], planes, inplanes, 1)
        p["down_bn"] = bn_params(ks[7], planes)
    return p


if __name__ == "__main__":
    root = jax.random.PRNGKey(0)
    k_a, k_b, kx_a, kx_b = jax.random.split(root, 4)

    # Config A: stride-2 block with 1x1-conv+BN downsample (inplanes != planes)
    N, H, W, inplanes, planes, stride = 4, 16, 16, 64, 128, 2
    prep_a = prepare_block_params(_make_params(k_a, inplanes, planes, 16, True))
    x_a = jax.random.normal(kx_a, (N, inplanes, H, W), jnp.float32)   # NCHW like PyTorch
    x_a_nhwc = jnp.transpose(x_a, (0, 2, 3, 1))                       # one-time layout conv

    y_a = jax.block_until_ready(se_basic_block(x_a_nhwc, prep_a, stride=stride))
    assert y_a.shape == (N, H // stride, W // stride, planes), y_a.shape
    assert bool(jnp.all(jnp.isfinite(y_a)))
    err_a = float(jnp.max(jnp.abs(y_a - ref_forward(x_a_nhwc, prep_a, stride=stride))))
    assert err_a < 1e-2, f"config A max abs err vs reference: {err_a}"

    # Config B: stride-1 block with identity residual (inplanes == planes)
    N2, H2, W2, planes2 = 4, 8, 8, 128
    prep_b = prepare_block_params(_make_params(k_b, planes2, planes2, 16, False))
    x_b = jax.random.normal(kx_b, (N2, planes2, H2, W2), jnp.float32)
    x_b_nhwc = jnp.transpose(x_b, (0, 2, 3, 1))

    y_b = jax.block_until_ready(se_basic_block(x_b_nhwc, prep_b, stride=1))
    assert y_b.shape == (N2, H2, W2, planes2), y_b.shape
    assert bool(jnp.all(jnp.isfinite(y_b)))
    err_b = float(jnp.max(jnp.abs(y_b - ref_forward(x_b_nhwc, prep_b, stride=1))))
    assert err_b < 1e-2, f"config B max abs err vs reference: {err_b}"

    print("KERNEL_OK")
</pallas_src>

<mosaic_0001>
module attributes {stable_mosaic.version = 11 : i64} {
  func.func @kernel(%arg0: i32, %arg1: memref<2x9x9x64xbf16, #tpu.memory_space<vmem>>, %arg2: memref<2x9x9x64xbf16, #tpu.memory_space<vmem>>, %arg3: memref<2x9x9x64xbf16, #tpu.memory_space<vmem>>, %arg4: memref<2x9x9x64xbf16, #tpu.memory_space<vmem>>, %arg5: memref<576x128xbf16, #tpu.memory_space<vmem>>, %arg6: memref<1x128xf32, #tpu.memory_space<vmem>>, %arg7: memref<1152x128xbf16, #tpu.memory_space<vmem>>, %arg8: memref<1x128xf32, #tpu.memory_space<vmem>>, %arg9: memref<128x128xbf16, #tpu.memory_space<vmem>>, %arg10: memref<1x128xf32, #tpu.memory_space<vmem>>, %arg11: memref<128x128xbf16, #tpu.memory_space<vmem>>, %arg12: memref<1x128xf32, #tpu.memory_space<vmem>>, %arg13: memref<64x128xbf16, #tpu.memory_space<vmem>>, %arg14: memref<1x128xf32, #tpu.memory_space<vmem>>, %arg15: memref<2x8x8x128xf32, #tpu.memory_space<vmem>>, %arg16: memref<2x10x16x128xbf16, #tpu.memory_space<vmem>>) attributes {dimension_semantics = [#tpu.dimension_semantics<arbitrary>], iteration_bounds = array<i64: 2>, scalar_prefetch = 0 : i64, scratch_operands = 1 : i64, tpu.core_type = #tpu.core_type<tc>, window_params = [{transform_indices = @transform_0, window_bounds = array<i64: 2, 9, 9, 64>}, {transform_indices = @transform_1, window_bounds = array<i64: 2, 9, 9, 64>}, {transform_indices = @transform_2, window_bounds = array<i64: 2, 9, 9, 64>}, {transform_indices = @transform_3, window_bounds = array<i64: 2, 9, 9, 64>}, {pipeline_mode = #tpu.pipeline_mode<synchronous>, transform_indices = @transform_4, window_bounds = array<i64: 576, 128>}, {pipeline_mode = #tpu.pipeline_mode<synchronous>, transform_indices = @transform_5, window_bounds = array<i64: 1, 128>}, {pipeline_mode = #tpu.pipeline_mode<synchronous>, transform_indices = @transform_6, window_bounds = array<i64: 1152, 128>}, {pipeline_mode = #tpu.pipeline_mode<synchronous>, transform_indices = @transform_7, window_bounds = array<i64: 1, 128>}, {pipeline_mode = #tpu.pipeline_mode<synchronous>, transform_indices = @transform_8, window_bounds = array<i64: 128, 128>}, {pipeline_mode = #tpu.pipeline_mode<synchronous>, transform_indices = @transform_9, window_bounds = array<i64: 1, 128>}, {pipeline_mode = #tpu.pipeline_mode<synchronous>, transform_indices = @transform_10, window_bounds = array<i64: 128, 128>}, {pipeline_mode = #tpu.pipeline_mode<synchronous>, transform_indices = @transform_11, window_bounds = array<i64: 1, 128>}, {pipeline_mode = #tpu.pipeline_mode<synchronous>, transform_indices = @transform_12, window_bounds = array<i64: 64, 128>}, {pipeline_mode = #tpu.pipeline_mode<synchronous>, transform_indices = @transform_13, window_bounds = array<i64: 1, 128>}, {transform_indices = @transform_14, window_bounds = array<i64: 2, 8, 8, 128>}]} {
    %c0 = arith.constant 0 : index
    %c0_0 = arith.constant 0 : index
    %c0_1 = arith.constant 0 : index
    %c0_2 = arith.constant 0 : index
    %0 = vector.load %arg1[%c0, %c0_0, %c0_1, %c0_2] : memref<2x9x9x64xbf16, #tpu.memory_space<vmem>>, vector<2x8x8x64xbf16>
    %1 = vector.shape_cast %0 : vector<2x8x8x64xbf16> to vector<128x64xbf16>
    %c0_3 = arith.constant 0 : index
    %c0_4 = arith.constant 0 : index
    %2 = vector.load %arg5[%c0_3, %c0_4] : memref<576x128xbf16, #tpu.memory_space<vmem>>, vector<64x128xbf16>
    %cst = arith.constant dense<0.000000e+00> : vector<128x128xf32>
    %3 = tpu.matmul %1, %2, %cst {dimension_numbers = #tpu.dot_dimension_numbers<[1], [0], [0], [1], [0, 0, 1, 1], [], []>} : vector<128x64xbf16>, vector<64x128xbf16>, vector<128x128xf32> -> vector<128x128xf32>
    %c0_5 = arith.constant 0 : index
    %c0_6 = arith.constant 0 : index
    %c0_7 = arith.constant 0 : index
    %c0_8 = arith.constant 0 : index
    %4 = vector.load %arg2[%c0_5, %c0_6, %c0_7, %c0_8] : memref<2x9x9x64xbf16, #tpu.memory_space<vmem>>, vector<2x8x8x64xbf16>
    %5 = vector.shape_cast %4 : vector<2x8x8x64xbf16> to vector<128x64xbf16>
    %c64 = arith.constant 64 : index
    %c0_9 = arith.constant 0 : index
    %6 = vector.load %arg5[%c64, %c0_9] : memref<576x128xbf16, #tpu.memory_space<vmem>>, vector<64x128xbf16>
    %cst_10 = arith.constant dense<0.000000e+00> : vector<128x128xf32>
    %7 = tpu.matmul %5, %6, %cst_10 {dimension_numbers = #tpu.dot_dimension_numbers<[1], [0], [0], [1], [0, 0, 1, 1], [], []>} : vector<128x64xbf16>, vector<64x128xbf16>, vector<128x128xf32> -> vector<128x128xf32>
    %8 = arith.addf %3, %7 : vector<128x128xf32>
    %c0_11 = arith.constant 0 : index
    %c0_12 = arith.constant 0 : index
    %c1 = arith.constant 1 : index
    %c0_13 = arith.constant 0 : index
    %9 = vector.load %arg1[%c0_11, %c0_12, %c1, %c0_13] : memref<2x9x9x64xbf16, #tpu.memory_space<vmem>>, vector<2x8x8x64xbf16>
    %10 = vector.shape_cast %9 : vector<2x8x8x64xbf16> to vector<128x64xbf16>
    %c128 = arith.constant 128 : index
    %c0_14 = arith.constant 0 : index
    %11 = vector.load %arg5[%c128, %c0_14] : memref<576x128xbf16, #tpu.memory_space<vmem>>, vector<64x128xbf16>
    %cst_15 = arith.constant dense<0.000000e+00> : vector<128x128xf32>
    %12 = tpu.matmul %10, %11, %cst_15 {dimension_numbers = #tpu.dot_dimension_numbers<[1], [0], [0], [1], [0, 0, 1, 1], [], []>} : vector<128x64xbf16>, vector<64x128xbf16>, vector<128x128xf32> -> vector<128x128xf32>
    %13 = arith.addf %8, %12 : vector<128x128xf32>
    %c0_16 = arith.constant 0 : index
    %c0_17 = arith.constant 0 : index
    %c0_18 = arith.constant 0 : index
    %c0_19 = arith.constant 0 : index
    %14 = vector.load %arg3[%c0_16, %c0_17, %c0_18, %c0_19] : memref<2x9x9x64xbf16, #tpu.memory_space<vmem>>, vector<2x8x8x64xbf16>
    %15 = vector.shape_cast %14 : vector<2x8x8x64xbf16> to vector<128x64xbf16>
    %c192 = arith.constant 192 : index
    %c0_20 = arith.constant 0 : index
    %16 = vector.load %arg5[%c192, %c0_20] : memref<576x128xbf16, #tpu.memory_space<vmem>>, vector<64x128xbf16>
    %cst_21 = arith.constant dense<0.000000e+00> : vector<128x128xf32>
    %17 = tpu.matmul %15, %16, %cst_21 {dimension_numbers = #tpu.dot_dimension_numbers<[1], [0], [0], [1], [0, 0, 1, 1], [], []>} : vector<128x64xbf16>, vector<64x128xbf16>, vector<128x128xf32> -> vector<128x128xf32>
    %18 = arith.addf %13, %17 : vector<128x128xf32>
    %c0_22 = arith.constant 0 : index
    %c0_23 = arith.constant 0 : index
    %c0_24 = arith.constant 0 : index
    %c0_25 = arith.constant 0 : index
    %19 = vector.load %arg4[%c0_22, %c0_23, %c0_24, %c0_25] : memref<2x9x9x64xbf16, #tpu.memory_space<vmem>>, vector<2x8x8x64xbf16>
    %20 = vector.shape_cast %19 : vector<2x8x8x64xbf16> to vector<128x64xbf16>
    %c256 = arith.constant 256 : index
    %c0_26 = arith.constant 0 : index
    %21 = vector.load %arg5[%c256, %c0_26] : memref<576x128xbf16, #tpu.memory_space<vmem>>, vector<64x128xbf16>
    %cst_27 = arith.constant dense<0.000000e+00> : vector<128x128xf32>
    %22 = tpu.matmul %20, %21, %cst_27 {dimension_numbers = #tpu.dot_dimension_numbers<[1], [0], [0], [1], [0, 0, 1, 1], [], []>} : vector<128x64xbf16>, vector<64x128xbf16>, vector<128x128xf32> -> vector<128x128xf32>
    %23 = arith.addf %18, %22 : vector<128x128xf32>
    %c0_28 = arith.constant 0 : index
    %c0_29 = arith.constant 0 : index
    %c1_30 = arith.constant 1 : index
    %c0_31 = arith.constant 0 : index
    %24 = vector.load %arg3[%c0_28, %c0_29, %c1_30, %c0_31] : memref<2x9x9x64xbf16, #tpu.memory_space<vmem>>, vector<2x8x8x64xbf16>
    %25 = vector.shape_cast %24 : vector<2x8x8x64xbf16> to vector<128x64xbf16>
    %c320 = arith.constant 320 : index
    %c0_32 = arith.constant 0 : index
    %26 = vector.load %arg5[%c320, %c0_32] : memref<576x128xbf16, #tpu.memory_space<vmem>>, vector<64x128xbf16>
    %cst_33 = arith.constant dense<0.000000e+00> : vector<128x128xf32>
    %27 = tpu.matmul %25, %26, %cst_33 {dimension_numbers = #tpu.dot_dimension_numbers<[1], [0], [0], [1], [0, 0, 1, 1], [], []>} : vector<128x64xbf16>, vector<64x128xbf16>, vector<128x128xf32> -> vector<128x128xf32>
    %28 = arith.addf %23, %27 : vector<128x128xf32>
    %c0_34 = arith.constant 0 : index
    %c1_35 = arith.constant 1 : index
    %c0_36 = arith.constant 0 : index
    %c0_37 = arith.constant 0 : index
    %29 = vector.load %arg1[%c0_34, %c1_35, %c0_36, %c0_37] : memref<2x9x9x64xbf16, #tpu.memory_space<vmem>>, vector<2x8x8x64xbf16>
    %30 = vector.shape_cast %29 : vector<2x8x8x64xbf16> to vector<128x64xbf16>
    %c384 = arith.constant 384 : index
    %c0_38 = arith.constant 0 : index
    %31 = vector.load %arg5[%c384, %c0_38] : memref<576x128xbf16, #tpu.memory_space<vmem>>, vector<64x128xbf16>
    %cst_39 = arith.constant dense<0.000000e+00> : vector<128x128xf32>
    %32 = tpu.matmul %30, %31, %cst_39 {dimension_numbers = #tpu.dot_dimension_numbers<[1], [0], [0], [1], [0, 0, 1, 1], [], []>} : vector<128x64xbf16>, vector<64x128xbf16>, vector<128x128xf32> -> vector<128x128xf32>
    %33 = arith.addf %28, %32 : vector<128x128xf32>
    %c0_40 = arith.constant 0 : index
    %c1_41 = arith.constant 1 : index
    %c0_42 = arith.constant 0 : index
    %c0_43 = arith.constant 0 : index
    %34 = vector.load %arg2[%c0_40, %c1_41, %c0_42, %c0_43] : memref<2x9x9x64xbf16, #tpu.memory_space<vmem>>, vector<2x8x8x64xbf16>
    %35 = vector.shape_cast %34 : vector<2x8x8x64xbf16> to vector<128x64xbf16>
    %c448 = arith.constant 448 : index
    %c0_44 = arith.constant 0 : index
    %36 = vector.load %arg5[%c448, %c0_44] : memref<576x128xbf16, #tpu.memory_space<vmem>>, vector<64x128xbf16>
    %cst_45 = arith.constant dense<0.000000e+00> : vector<128x128xf32>
    %37 = tpu.matmul %35, %36, %cst_45 {dimension_numbers = #tpu.dot_dimension_numbers<[1], [0], [0], [1], [0, 0, 1, 1], [], []>} : vector<128x64xbf16>, vector<64x128xbf16>, vector<128x128xf32> -> vector<128x128xf32>
    %38 = arith.addf %33, %37 : vector<128x128xf32>
    %c0_46 = arith.constant 0 : index
    %c1_47 = arith.constant 1 : index
    %c1_48 = arith.constant 1 : index
    %c0_49 = arith.constant 0 : index
    %39 = vector.load %arg1[%c0_46, %c1_47, %c1_48, %c0_49] : memref<2x9x9x64xbf16, #tpu.memory_space<vmem>>, vector<2x8x8x64xbf16>
    %40 = vector.shape_cast %39 : vector<2x8x8x64xbf16> to vector<128x64xbf16>
    %c512 = arith.constant 512 : index
    %c0_50 = arith.constant 0 : index
    %41 = vector.load %arg5[%c512, %c0_50] : memref<576x128xbf16, #tpu.memory_space<vmem>>, vector<64x128xbf16>
    %cst_51 = arith.constant dense<0.000000e+00> : vector<128x128xf32>
    %42 = tpu.matmul %40, %41, %cst_51 {dimension_numbers = #tpu.dot_dimension_numbers<[1], [0], [0], [1], [0, 0, 1, 1], [], []>} : vector<128x64xbf16>, vector<64x128xbf16>, vector<128x128xf32> -> vector<128x128xf32>
    %43 = arith.addf %38, %42 : vector<128x128xf32>
    %c0_52 = arith.constant 0 : index
    %c0_53 = arith.constant 0 : index
    %44 = vector.load %arg6[%c0_52, %c0_53] : memref<1x128xf32, #tpu.memory_space<vmem>>, vector<1x128xf32>
    %45 = vector.broadcast %44 : vector<1x128xf32> to vector<128x128xf32>
    %46 = arith.addf %43, %45 : vector<128x128xf32>
    %cst_54 = arith.constant 0.000000e+00 : f32
    %47 = vector.broadcast %cst_54 : f32 to vector<128x128xf32>
    %48 = arith.maximumf %46, %47 : vector<128x128xf32>
    %49 = arith.truncf %48 : vector<128x128xf32> to vector<128x128xbf16>
    %c0_i32 = arith.constant 0 : i32
    %50 = arith.cmpi eq, %arg0, %c0_i32 : i32
    %51 = arith.extui %50 : i1 to i32
    %c0_i32_55 = arith.constant 0 : i32
    %52 = arith.cmpi ne, %51, %c0_i32_55 : i32
    scf.if %52 {
      %cst_138 = arith.constant 0.000000e+00 : bf16
      %133 = vector.broadcast %cst_138 : bf16 to vector<2x10x16x128xbf16>
      %c0_139 = arith.constant 0 : index
      %c0_140 = arith.constant 0 : index
      %c0_141 = arith.constant 0 : index
      %c0_142 = arith.constant 0 : index
      %134 = vector.load %arg16[%c0_139, %c0_140, %c0_141, %c0_142] : memref<2x10x16x128xbf16, #tpu.memory_space<vmem>>, vector<2x10x16x128xbf16>
      tpu.vector_store %arg16[%c0_139, %c0_140, %c0_141, %c0_142], %133 {strides = array<i32>} : memref<2x10x16x128xbf16, #tpu.memory_space<vmem>>, vector<2x10x16x128xbf16>,
    } else {
    }
    %53 = vector.shape_cast %49 : vector<128x128xbf16> to vector<2x8x8x128xbf16>
    %c0_56 = arith.constant 0 : index
    %c1_57 = arith.constant 1 : index
    %c1_58 = arith.constant 1 : index
    %c0_59 = arith.constant 0 : index
    %54 = vector.load %arg16[%c0_56, %c1_57, %c1_58, %c0_59] : memref<2x10x16x128xbf16, #tpu.memory_space<vmem>>, vector<2x8x8x128xbf16>
    tpu.vector_store %arg16[%c0_56, %c1_57, %c1_58, %c0_59], %53 {strides = array<i32>} : memref<2x10x16x128xbf16, #tpu.memory_space<vmem>>, vector<2x8x8x128xbf16>,
    %c0_60 = arith.constant 0 : index
    %c0_61 = arith.constant 0 : index
    %c0_62 = arith.constant 0 : index
    %c0_63 = arith.constant 0 : index
    %55 = vector.load %arg16[%c0_60, %c0_61, %c0_62, %c0_63] : memref<2x10x16x128xbf16, #tpu.memory_space<vmem>>, vector<2x8x8x128xbf16>
    %56 = vector.shape_cast %55 : vector<2x8x8x128xbf16> to vector<128x128xbf16>
    %c0_64 = arith.constant 0 : index
    %c0_65 = arith.constant 0 : index
    %c1_66 = arith.constant 1 : index
    %c0_67 = arith.constant 0 : index
    %57 = vector.load %arg16[%c0_64, %c0_65, %c1_66, %c0_67] : memref<2x10x16x128xbf16, #tpu.memory_space<vmem>>, vector<2x8x8x128xbf16>
    %58 = vector.shape_cast %57 : vector<2x8x8x128xbf16> to vector<128x128xbf16>
    %59 = tpu.concatenate %56, %58 in 1 : vector<128x128xbf16>, vector<128x128xbf16> -> vector<128x256xbf16>
    %c0_68 = arith.constant 0 : index
    %c0_69 = arith.constant 0 : index
    %60 = vector.load %arg7[%c0_68, %c0_69] : memref<1152x128xbf16, #tpu.memory_space<vmem>>, vector<256x128xbf16>
    %cst_70 = arith.constant dense<0.000000e+00> : vector<128x128xf32>
    %61 = tpu.matmul %59, %60, %cst_70 {dimension_numbers = #tpu.dot_dimension_numbers<[1], [0], [0], [1], [0, 0, 1, 1], [], []>} : vector<128x256xbf16>, vector<256x128xbf16>, vector<128x128xf32> -> vector<128x128xf32>
    %c0_71 = arith.constant 0 : index
    %c0_72 = arith.constant 0 : index
    %c2 = arith.constant 2 : index
    %c0_73 = arith.constant 0 : index
    %62 = vector.load %arg16[%c0_71, %c0_72, %c2, %c0_73] : memref<2x10x16x128xbf16, #tpu.memory_space<vmem>>, vector<2x8x8x128xbf16>
    %63 = vector.shape_cast %62 : vector<2x8x8x128xbf16> to vector<128x128xbf16>
    %c0_74 = arith.constant 0 : index
    %c1_75 = arith.constant 1 : index
    %c0_76 = arith.constant 0 : index
    %c0_77 = arith.constant 0 : index
    %64 = vector.load %arg16[%c0_74, %c1_75, %c0_76, %c0_77] : memref<2x10x16x128xbf16, #tpu.memory_space<vmem>>, vector<2x8x8x128xbf16>
    %65 = vector.shape_cast %64 : vector<2x8x8x128xbf16> to vector<128x128xbf16>
    %66 = tpu.concatenate %63, %65 in 1 : vector<128x128xbf16>, vector<128x128xbf16> -> vector<128x256xbf16>
    %c256_78 = arith.constant 256 : index
    %c0_79 = arith.constant 0 : index
    %67 = vector.load %arg7[%c256_78, %c0_79] : memref<1152x128xbf16, #tpu.memory_space<vmem>>, vector<256x128xbf16>
    %cst_80 = arith.constant dense<0.000000e+00> : vector<128x128xf32>
    %68 = tpu.matmul %66, %67, %cst_80 {dimension_numbers = #tpu.dot_dimension_numbers<[1], [0], [0], [1], [0, 0, 1, 1], [], []>} : vector<128x256xbf16>, vector<256x128xbf16>, vector<128x128xf32> -> vector<128x128xf32>
    %69 = arith.addf %61, %68 : vector<128x128xf32>
    %c0_81 = arith.constant 0 : index
    %c1_82 = arith.constant 1 : index
    %c1_83 = arith.constant 1 : index
    %c0_84 = arith.constant 0 : index
    %70 = vector.load %arg16[%c0_81, %c1_82, %c1_83, %c0_84] : memref<2x10x16x128xbf16, #tpu.memory_space<vmem>>, vector<2x8x8x128xbf16>
    %71 = vector.shape_cast %70 : vector<2x8x8x128xbf16> to vector<128x128xbf16>
    %c0_85 = arith.constant 0 : index
    %c1_86 = arith.constant 1 : index
    %c2_87 = arith.constant 2 : index
    %c0_88 = arith.constant 0 : index
    %72 = vector.load %arg16[%c0_85, %c1_86, %c2_87, %c0_88] : memref<2x10x16x128xbf16, #tpu.memory_space<vmem>>, vector<2x8x8x128xbf16>
    %73 = vector.shape_cast %72 : vector<2x8x8x128xbf16> to vector<128x128xbf16>
    %74 = tpu.concatenate %71, %73 in 1 : vector<128x128xbf16>, vector<128x128xbf16> -> vector<128x256xbf16>
    %c512_89 = arith.constant 512 : index
    %c0_90 = arith.constant 0 : index
    %75 = vector.load %arg7[%c512_89, %c0_90] : memref<1152x128xbf16, #tpu.memory_space<vmem>>, vector<256x128xbf16>
    %cst_91 = arith.constant dense<0.000000e+00> : vector<128x128xf32>
    %76 = tpu.matmul %74, %75, %cst_91 {dimension_numbers = #tpu.dot_dimension_numbers<[1], [0], [0], [1], [0, 0, 1, 1], [], []>} : vector<128x256xbf16>, vector<256x128xbf16>, vector<128x128xf32> -> vector<128x128xf32>
    %77 = arith.addf %69, %76 : vector<128x128xf32>
    %c0_92 = arith.constant 0 : index
    %c2_93 = arith.constant 2 : index
    %c0_94 = arith.constant 0 : index
    %c0_95 = arith.constant 0 : index
    %78 = vector.load %arg16[%c0_92, %c2_93, %c0_94, %c0_95] : memref<2x10x16x128xbf16, #tpu.memory_space<vmem>>, vector<2x8x8x128xbf16>
    %79 = vector.shape_cast %78 : vector<2x8x8x128xbf16> to vector<128x128xbf16>
    %c0_96 = arith.constant 0 : index
    %c2_97 = arith.constant 2 : index
    %c1_98 = arith.constant 1 : index
    %c0_99 = arith.constant 0 : index
    %80 = vector.load %arg16[%c0_96, %c2_97, %c1_98, %c0_99] : memref<2x10x16x128xbf16, #tpu.memory_space<vmem>>, vector<2x8x8x128xbf16>
    %81 = vector.shape_cast %80 : vector<2x8x8x128xbf16> to vector<128x128xbf16>
    %82 = tpu.concatenate %79, %81 in 1 : vector<128x128xbf16>, vector<128x128xbf16> -> vector<128x256xbf16>
    %c768 = arith.constant 768 : index
    %c0_100 = arith.constant 0 : index
    %83 = vector.load %arg7[%c768, %c0_100] : memref<1152x128xbf16, #tpu.memory_space<vmem>>, vector<256x128xbf16>
    %cst_101 = arith.constant dense<0.000000e+00> : vector<128x128xf32>
    %84 = tpu.matmul %82, %83, %cst_101 {dimension_numbers = #tpu.dot_dimension_numbers<[1], [0], [0], [1], [0, 0, 1, 1], [], []>} : vector<128x256xbf16>, vector<256x128xbf16>, vector<128x128xf32> -> vector<128x128xf32>
    %85 = arith.addf %77, %84 : vector<128x128xf32>
    %c0_102 = arith.constant 0 : index
    %c2_103 = arith.constant 2 : index
    %c2_104 = arith.constant 2 : index
    %c0_105 = arith.constant 0 : index
    %86 = vector.load %arg16[%c0_102, %c2_103, %c2_104, %c0_105] : memref<2x10x16x128xbf16, #tpu.memory_space<vmem>>, vector<2x8x8x128xbf16>
    %87 = vector.shape_cast %86 : vector<2x8x8x128xbf16> to vector<128x128xbf16>
    %c1024 = arith.constant 1024 : index
    %c0_106 = arith.constant 0 : index
    %88 = vector.load %arg7[%c1024, %c0_106] : memref<1152x128xbf16, #tpu.memory_space<vmem>>, vector<128x128xbf16>
    %cst_107 = arith.constant dense<0.000000e+00> : vector<128x128xf32>
    %89 = tpu.matmul %87, %88, %cst_107 {dimension_numbers = #tpu.dot_dimension_numbers<[1], [0], [0], [1], [0, 0, 1, 1], [], []>} : vector<128x128xbf16>, vector<128x128xbf16>, vector<128x128xf32> -> vector<128x128xf32>
    %90 = arith.addf %85, %89 : vector<128x128xf32>
    %c0_108 = arith.constant 0 : index
    %c0_109 = arith.constant 0 : index
    %91 = vector.load %arg8[%c0_108, %c0_109] : memref<1x128xf32, #tpu.memory_space<vmem>>, vector<1x128xf32>
    %92 = vector.broadcast %91 : vector<1x128xf32> to vector<128x128xf32>
    %93 = arith.addf %90, %92 : vector<128x128xf32>
    %94 = vector.shape_cast %93 : vector<128x128xf32> to vector<2x64x128xf32>
    %cst_110 = arith.constant dense<0.000000e+00> : vector<2x128xf32>
    %95 = vector.multi_reduction <add>, %94, %cst_110 [1] : vector<2x64x128xf32> to vector<2x128xf32>
    %cst_111 = arith.constant 6.400000e+01 : f32
    %96 = vector.broadcast %cst_111 : f32 to vector<2x128xf32>
    %97 = arith.divf %95, %96 : vector<2x128xf32>
    %98 = arith.truncf %97 : vector<2x128xf32> to vector<2x128xbf16>
    %c0_112 = arith.constant 0 : index
    %c0_113 = arith.constant 0 : index
    %99 = vector.load %arg9[%c0_112, %c0_113] : memref<128x128xbf16, #tpu.memory_space<vmem>>, vector<128x128xbf16>
    %cst_114 = arith.constant dense<0.000000e+00> : vector<2x128xf32>
    %100 = tpu.matmul %98, %99, %cst_114 {dimension_numbers = #tpu.dot_dimension_numbers<[1], [0], [0], [1], [0, 0, 1, 1], [], []>} : vector<2x128xbf16>, vector<128x128xbf16>, vector<2x128xf32> -> vector<2x128xf32>
    %c0_115 = arith.constant 0 : index
    %c0_116 = arith.constant 0 : index
    %101 = vector.load %arg10[%c0_115, %c0_116] : memref<1x128xf32, #tpu.memory_space<vmem>>, vector<1x128xf32>
    %102 = vector.broadcast %101 : vector<1x128xf32> to vector<2x128xf32>
    %103 = arith.addf %100, %102 : vector<2x128xf32>
    %cst_117 = arith.constant 0.000000e+00 : f32
    %104 = vector.broadcast %cst_117 : f32 to vector<2x128xf32>
    %105 = arith.maximumf %103, %104 : vector<2x128xf32>
    %106 = arith.truncf %105 : vector<2x128xf32> to vector<2x128xbf16>
    %c0_118 = arith.constant 0 : index
    %c0_119 = arith.constant 0 : index
    %107 = vector.load %arg11[%c0_118, %c0_119] : memref<128x128xbf16, #tpu.memory_space<vmem>>, vector<128x128xbf16>
    %cst_120 = arith.constant dense<0.000000e+00> : vector<2x128xf32>
    %108 = tpu.matmul %106, %107, %cst_120 {dimension_numbers = #tpu.dot_dimension_numbers<[1], [0], [0], [1], [0, 0, 1, 1], [], []>} : vector<2x128xbf16>, vector<128x128xbf16>, vector<2x128xf32> -> vector<2x128xf32>
    %c0_121 = arith.constant 0 : index
    %c0_122 = arith.constant 0 : index
    %109 = vector.load %arg12[%c0_121, %c0_122] : memref<1x128xf32, #tpu.memory_space<vmem>>, vector<1x128xf32>
    %110 = vector.broadcast %109 : vector<1x128xf32> to vector<2x128xf32>
    %111 = arith.addf %108, %110 : vector<2x128xf32>
    %112 = arith.negf %111 : vector<2x128xf32>
    %113 = math.exp %112 : vector<2x128xf32>
    %cst_123 = arith.constant 1.000000e+00 : f32
    %114 = vector.broadcast %cst_123 : f32 to vector<2x128xf32>
    %115 = arith.addf %114, %113 : vector<2x128xf32>
    %116 = arith.divf %114, %115 : vector<2x128xf32>
    %c0_124 = arith.constant 0 : index
    %c0_125 = arith.constant 0 : index
    %c0_126 = arith.constant 0 : index
    %c0_127 = arith.constant 0 : index
    %117 = vector.load %arg4[%c0_124, %c0_125, %c0_126, %c0_127] : memref<2x9x9x64xbf16, #tpu.memory_space<vmem>>, vector<2x8x8x64xbf16>
    %118 = vector.shape_cast %117 : vector<2x8x8x64xbf16> to vector<128x64xbf16>
    %c0_128 = arith.constant 0 : index
    %c0_129 = arith.constant 0 : index
    %119 = vector.load %arg13[%c0_128, %c0_129] : memref<64x128xbf16, #tpu.memory_space<vmem>>, vector<64x128xbf16>
    %cst_130 = arith.constant dense<0.000000e+00> : vector<128x128xf32>
    %120 = tpu.matmul %118, %119, %cst_130 {dimension_numbers = #tpu.dot_dimension_numbers<[1], [0], [0], [1], [0, 0, 1, 1], [], []>} : vector<128x64xbf16>, vector<64x128xbf16>, vector<128x128xf32> -> vector<128x128xf32>
    %c0_131 = arith.constant 0 : index
    %c0_132 = arith.constant 0 : index
    %121 = vector.load %arg14[%c0_131, %c0_132] : memref<1x128xf32, #tpu.memory_space<vmem>>, vector<1x128xf32>
    %122 = vector.broadcast %121 : vector<1x128xf32> to vector<128x128xf32>
    %123 = arith.addf %120, %122 : vector<128x128xf32>
    %124 = vector.shape_cast %123 : vector<128x128xf32> to vector<2x64x128xf32>
    %125 = vector.shape_cast %116 : vector<2x128xf32> to vector<2x1x128xf32>
    %126 = vector.broadcast %125 : vector<2x1x128xf32> to vector<2x64x128xf32>
    %127 = arith.mulf %94, %126 : vector<2x64x128xf32>
    %128 = arith.addf %127, %124 : vector<2x64x128xf32>
    %cst_133 = arith.constant 0.000000e+00 : f32
    %129 = vector.broadcast %cst_133 : f32 to vector<2x64x128xf32>
    %130 = arith.maximumf %128, %129 : vector<2x64x128xf32>
    %131 = vector.shape_cast %130 : vector<2x64x128xf32> to vector<2x8x8x128xf32>
    %c0_134 = arith.constant 0 : index
    %c0_135 = arith.constant 0 : index
    %c0_136 = arith.constant 0 : index
    %c0_137 = arith.constant 0 : index
    %132 = vector.load %arg15[%c0_134, %c0_135, %c0_136, %c0_137] : memref<2x8x8x128xf32, #tpu.memory_space<vmem>>, vector<2x8x8x128xf32>
    tpu.vector_store %arg15[%c0_134, %c0_135, %c0_136, %c0_137], %131 {strides = array<i32>} : memref<2x8x8x128xf32, #tpu.memory_space<vmem>>, vector<2x8x8x128xf32>,
    return
  }
  func.func @transform_0(%arg0: i32) -> (i32, i32, i32, i32) {
    %c0_i32 = arith.constant 0 : i32
    %c0_i32_0 = arith.constant 0 : i32
    %c0_i32_1 = arith.constant 0 : i32
    %c0_i32_2 = arith.constant 0 : i32
    return %arg0, %c0_i32, %c0_i32_0, %c0_i32_1 : i32, i32, i32, i32
  }
  func.func @transform_1(%arg0: i32) -> (i32, i32, i32, i32) {
    %c0_i32 = arith.constant 0 : i32
    %c0_i32_0 = arith.constant 0 : i32
    %c0_i32_1 = arith.constant 0 : i32
    %c0_i32_2 = arith.constant 0 : i32
    return %arg0, %c0_i32, %c0_i32_0, %c0_i32_1 : i32, i32, i32, i32
  }
  func.func @transform_2(%arg0: i32) -> (i32, i32, i32, i32) {
    %c0_i32 = arith.constant 0 : i32
    %c0_i32_0 = arith.constant 0 : i32
    %c0_i32_1 = arith.constant 0 : i32
    %c0_i32_2 = arith.constant 0 : i32
    return %arg0, %c0_i32, %c0_i32_0, %c0_i32_1 : i32, i32, i32, i32
  }
  func.func @transform_3(%arg0: i32) -> (i32, i32, i32, i32) {
    %c0_i32 = arith.constant 0 : i32
    %c0_i32_0 = arith.constant 0 : i32
    %c0_i32_1 = arith.constant 0 : i32
    %c0_i32_2 = arith.constant 0 : i32
    return %arg0, %c0_i32, %c0_i32_0, %c0_i32_1 : i32, i32, i32, i32
  }
  func.func @transform_4(%arg0: i32) -> (i32, i32) {
    %c0_i32 = arith.constant 0 : i32
    %c0_i32_0 = arith.constant 0 : i32
    %c0_i32_1 = arith.constant 0 : i32
    return %c0_i32, %c0_i32_0 : i32, i32
  }
  func.func @transform_5(%arg0: i32) -> (i32, i32) {
    %c0_i32 = arith.constant 0 : i32
    %c0_i32_0 = arith.constant 0 : i32
    %c0_i32_1 = arith.constant 0 : i32
    return %c0_i32, %c0_i32_0 : i32, i32
  }
  func.func @transform_6(%arg0: i32) -> (i32, i32) {
    %c0_i32 = arith.constant 0 : i32
    %c0_i32_0 = arith.constant 0 : i32
    %c0_i32_1 = arith.constant 0 : i32
    return %c0_i32, %c0_i32_0 : i32, i32
  }
  func.func @transform_7(%arg0: i32) -> (i32, i32) {
    %c0_i32 = arith.constant 0 : i32
    %c0_i32_0 = arith.constant 0 : i32
    %c0_i32_1 = arith.constant 0 : i32
    return %c0_i32, %c0_i32_0 : i32, i32
  }
  func.func @transform_8(%arg0: i32) -> (i32, i32) {
    %c0_i32 = arith.constant 0 : i32
    %c0_i32_0 = arith.constant 0 : i32
    %c0_i32_1 = arith.constant 0 : i32
    return %c0_i32, %c0_i32_0 : i32, i32
  }
  func.func @transform_9(%arg0: i32) -> (i32, i32) {
    %c0_i32 = arith.constant 0 : i32
    %c0_i32_0 = arith.constant 0 : i32
    %c0_i32_1 = arith.constant 0 : i32
    return %c0_i32, %c0_i32_0 : i32, i32
  }
  func.func @transform_10(%arg0: i32) -> (i32, i32) {
    %c0_i32 = arith.constant 0 : i32
    %c0_i32_0 = arith.constant 0 : i32
    %c0_i32_1 = arith.constant 0 : i32
    return %c0_i32, %c0_i32_0 : i32, i32
  }
  func.func @transform_11(%arg0: i32) -> (i32, i32) {
    %c0_i32 = arith.constant 0 : i32
    %c0_i32_0 = arith.constant 0 : i32
    %c0_i32_1 = arith.constant 0 : i32
    return %c0_i32, %c0_i32_0 : i32, i32
  }
  func.func @transform_12(%arg0: i32) -> (i32, i32) {
    %c0_i32 = arith.constant 0 : i32
    %c0_i32_0 = arith.constant 0 : i32
    %c0_i32_1 = arith.constant 0 : i32
    return %c0_i32, %c0_i32_0 : i32, i32
  }
  func.func @transform_13(%arg0: i32) -> (i32, i32) {
    %c0_i32 = arith.constant 0 : i32
    %c0_i32_0 = arith.constant 0 : i32
    %c0_i32_1 = arith.constant 0 : i32
    return %c0_i32, %c0_i32_0 : i32, i32
  }
  func.func @transform_14(%arg0: i32) -> (i32, i32, i32, i32) {
    %c0_i32 = arith.constant 0 : i32
    %c0_i32_0 = arith.constant 0 : i32
    %c0_i32_1 = arith.constant 0 : i32
    %c0_i32_2 = arith.constant 0 : i32
    return %arg0, %c0_i32, %c0_i32_0, %c0_i32_1 : i32, i32, i32, i32
  }
}

</mosaic_0001>

<bundles_post_ra>
// kernel: se_basic_block.1
= control target key start
LH: loop header
LB: loop body
LE: loop exit
PB: predicated region body
PF: predicated region fallthrough
CT: control target
= control target key end

     0   :  { %s9560_s0 = inlined_call_operand.vmem [shape: bf16[4,9,9,64], index: 0, kind: input, shape index: {}]   ;;  %s9561_s1 = inlined_call_operand.vmem [shape: bf16[4,9,9,64], index: 1, kind: input, shape index: {}]   ;;  %s9562_s2 = inlined_call_operand.vmem [shape: bf16[4,9,9,64], index: 2, kind: input, shape index: {}]   ;;  %s9563_s3 = inlined_call_operand.vmem [shape: bf16[4,9,9,64], index: 3, kind: input, shape index: {}]   ;;  %s9564_s4 = inlined_call_operand.vmem [shape: bf16[576,128], index: 4, kind: input, shape index: {}]   ;;  %s9565_s5 = inlined_call_operand.vmem [shape: f32[1,128], index: 5, kind: input, shape index: {}]   ;;  %s9566_s6 = inlined_call_operand.vmem [shape: bf16[1152,128], index: 6, kind: input, shape index: {}]   ;;  %s9567_s7 = inlined_call_operand.vmem [shape: f32[1,128], index: 7, kind: input, shape index: {}]   ;;  %s9568_s8 = inlined_call_operand.vmem [shape: bf16[128,128], index: 8, kind: input, shape index: {}]   ;;  %s9569_s9 = inlined_call_operand.vmem [shape: f32[1,128], index: 9, kind: input, shape index: {}]   ;;  %s9570_s10 = inlined_call_operand.vmem [shape: bf16[128,128], index: 10, kind: input, shape index: {}]   ;;  %s9571_s11 = inlined_call_operand.vmem [shape: f32[1,128], index: 11, kind: input, shape index: {}]   ;;  %s9572_s12 = inlined_call_operand.vmem [shape: bf16[64,128], index: 12, kind: input, shape index: {}]   ;;  %s9573_s13 = inlined_call_operand.vmem [shape: f32[1,128], index: 13, kind: input, shape index: {}]   ;;  %s9574_s14 = inlined_call_operand.hbm [shape: f32[4,8,8,128], index: 14, kind: output, shape index: {}]  }
   0x1   :  { %9580 = sst [smem:[#allocation10_spill]] %s9560_s0 }
   0x2   :  { %9581 = sst [smem:[#allocation11_spill]] %s9561_s1 }
   0x3   :  { %19 = vsyncpa [#allocation4], 0 }
   0x4   :  { %21 = vsyncpa [#allocation4 + $0x1], 0  ;;  %s7740_s29 = smov 0   ;;  %s7742_s30 = smov 0  }
   0x5   :  { %s7744_s15 = smov 0   ;;  %s7746_s16 = smov 0  }
   0x6 LB: > { %9582 = sst [smem:[#allocation6_spill]] %s7655_s15  ;;  %s7761_s17 = sadd.s32 4294967295, %s7659_s16   ;;  %s7659_s16 = sphi %s7746_s16, %s9600_s16   ;;  %s7655_s15 = sphi %s7744_s15, %s9602_s15   ;;  %s7651_s30 = sphi %s7742_s30, %s9604_s30   ;;  %s7647_s29 = sphi %s7740_s29, %s9603_s29  }
   0x7   : > { %s6269_s18 = sadd.s32 4294967294, %s7659_s16   ;;  %s7765_s19 = sadd.s32 1, %s7659_s16  }
   0x8   : > { %9583 = sst [smem:[#allocation7_spill]] %s7765_s19  ;;  %s348_s20 = sadd.s32 1, %s7655_s15 }
   0x9   : > { %s345_s21 = ssub.s32 %s7659_s16, %s7765_s19  ;;  %p358_p0 = scmp.ne.s32.totalorder %s7655_s15, %s7651_s30 }
   0xa   : > { %p346_p1 = scmp.eq.s32.totalorder %s345_s21, 0  ;;  %p359_p2 = scmp.eq.s32.totalorder %s7761_s17, 1 }
   0xb   : > { %p364_p3 = scmp.ne.s32.totalorder %s7651_s30, %s7647_s29  ;;  %p365_p4 = scmp.eq.s32.totalorder %s6269_s18, 1 }
   0xc   : > { %s7776_s22 = scalar_select %p346_p1, %s7655_s15, %s348_s20  }
   0xd   : > { %p7778_p5 = por %p359_p2, %p358_p0  ;;  %p7782_p6 = por %p365_p4, %p364_p3 }
   0xe   : > { %9584 = sst [smem:[#allocation8_spill]] %s7776_s22  ;;  %p6272_p7 = scmp.ge.s32.totalorder %s7659_s16, 1 }
   0xf   : > { %s9586_s24 = scalar_select %p7782_p6, 1, 0 }
  0x10   : > { %p453_p8 = scmp.lt.s32.totalorder %s7659_s16, 3 }
  0x11   : > { %9587 = sst [smem:[#allocation9_spill]] %s9586_s24 }
  0x12   : > { %p454_p9 = pnand %p6272_p7, %p453_p8 }
  0x13   : > { %s9578_s25 = sand.u32 (!%p454_p9), 1, %s7651_s30   ;;  %s6274_s20 = sshll.u32 (!%p454_p9), %s7761_s17, 1 }
  0x14   : > { %457 = sbr.rel (%p454_p9) target bundleno = 1464 (0x5b8), region = 76  ;;  %s7800_s21 = sshll.u32 (!%p454_p9), %s9578_s25, 7 }
  0x15   : > { %p519_p10 = scmp.lt.s32.totalorder (!%p454_p9), %s6274_s20, 3  ;;  %s9588_s0 = sld [smem:[#allocation10_spill]] (!%p454_p9) }
  0x16   : > { %s9589_s1 = sld [smem:[#allocation11_spill]] (!%p454_p9)  ;;  %p6754_p11 = scmp.ne.s32.totalorder (!%p454_p9), %s7761_s17, 0 }
  0x19   : > { %v7337_v0 = vld [vmem:[%s9564_s4 + $0x38] sm:$0xff]  ;;  %v7336_v3 = vld [vmem:[%s9564_s4 + $0x30] sm:$0xff]  ;;  %s9606_s20 = smov (!%p519_p10, %s6274_s20), 3  ;;  %v7335_v6 = vld [vmem:[%s9564_s4 + $0x28] sm:$0xff]  ;;  %vm903_vm0 = vsmask.f32 3328 }
  0x1a   : > { %v7795_v1 = vld [vmem:[%s9564_s4 + $0x18] sm:$0xff]  ;;  %689 = vmatpush.bf16.msra.mxu0 %v7337_v0  ;;  %7524 = vmatpush.bf16.msra.mxu3 %v7337_v0  ;;  %v7814_v4 = vld [vmem:[%s9564_s4 + $0x10] sm:$0xff]  ;;  %s7822_s22 = smul.u32 72, %s9606_s20  ;;  %v7831_v7 = vld [vmem:[%s9564_s4 + $0x8] sm:$0xff]  ;;  %vm904_vm1 = vsmask.f32 7440 }
  0x1b   : > { %v7805_v2 = vld [vmem:[%s9564_s4 + $0x58] sm:$0xff]  ;;  %826 = vmatpush.bf16.msra.mxu1 %v7795_v1  ;;  %v7820_v5 = vld [vmem:[%s9564_s4 + $0x50] sm:$0xff]  ;;  %v7837_v8 = vld [vmem:[%s9564_s4 + $0x48] sm:$0xff]  ;;  %vm660_vm2 = vcmask 523264  }
  0x1c   : > { %1214 = vmatpush.bf16.msra.mxu2 %v7805_v2  ;;  %s7843_s24 = scalar_lea.vmem %s9588_s0, %s7822_s22  ;;  %s7849_s27 = scalar_lea.vmem %s9589_s1, %s7822_s22  ;;  %v7334_v9 = vld [vmem:[%s9564_s4 + $0x20] sm:$0xff]  ;;  %v7365_v17 = vld [vmem:[%s9564_s4 + $0x98] sm:$0xff]  ;;  %vm7885_vm3 = vmor %vm903_vm0, %vm904_vm1 }
  0x1d   : > { %v6284_v10 = vld [vmem:[%s7849_s27] sm:$0xf]  ;;  %v7326_v11 = vld [vmem:[%s7849_s27 + $0x4] sm:$0xf0]  ;;  %v6312_v12 = vld [vmem:[%s7849_s27 + $0x78] sm:$0xf]  ;;  %s7994_s18 = scalar_lea.vmem %s9562_s2, %s7822_s22  ;;  %s8087_s0 = scalar_lea.vmem %s9563_s3, %s7822_s22 }
  0x1e   : > { %690 = vmatpush.bf16.msra.mxu0 %v7336_v3  ;;  %7525 = vmatpush.bf16.msra.mxu3 %v7336_v3  ;;  %v7860_v13 = vld [vmem:[%s9564_s4] sm:$0xff]  ;;  %v7314_v16 = vld [vmem:[%s7843_s24 + $0x4] sm:$0xf0]  ;;  %v874_v21 = vld [vmem:[%s7843_s24 + $0xc] sm:$0x1]  ;;  %v6285_v26 = vor.u32 %v7326_v11, %v6284_v10 }
  0x1f   : > { %827 = vmatpush.bf16.msra.mxu1 %v7814_v4  ;;  %v7333_v14 = vld [vmem:[%s7849_s27 + $0x7c] sm:$0xf0]  ;;  %v872_v19 = vld [vmem:[%s7843_s24 + $0x4] sm:$0x1]  ;;  %v873_v20 = vld [vmem:[%s7843_s24 + $0x8] sm:$0xf] }
  0x20   : > { %1215 = vmatpush.bf16.msra.mxu2 %v7820_v5  ;;  %v6340_v15 = vld [vmem:[%s7843_s24] sm:$0xf]  ;;  %v916_v24 = vshll.u32 %v872_v19, 16  ;;  %v921_v25 = vshrl.u32 %v873_v20, 16  ;;  %v924_v28 = vshll.u32 %v873_v20, 16  ;;  %v930_v29 = vshll.u32 %v874_v21, 16 }
  0x21   : > { %v871_v18 = vld [vmem:[%s7843_s24] sm:$0xf]  ;;  %v6313_v30 = vor.u32 %v7333_v14, %v6312_v12  ;;  %v6341_v34 = vor.u32 %v7314_v16, %v6340_v15  ;;  %v875_v39 = vld [vmem:[%s7843_s24 + $0x10] sm:$0xf]  ;;  %v876_v42 = vld [vmem:[%s7843_s24 + $0x14] sm:$0x1] }
  0x22   : > { %691 = vmatpush.bf16.msra.mxu0 %v7335_v6  ;;  %7526 = vmatpush.bf16.msra.mxu3 %v7335_v6  ;;  %v907_v22 = vshrl.u32 %v871_v18, 16  ;;  %v910_v23 = vshll.u32 %v871_v18, 16  ;;  %v7877_v27 = vld [vmem:[%s9564_s4 + $0x40] sm:$0xff]  ;;  %v923_v33 = vrot.slane %v921_v25, 4  ;;  %v926_v35 = vrot.slane %v924_v28, 5  ;;  %v7364_v50 = vld [vmem:[%s9564_s4 + $0x90] sm:$0xff] }
  0x23   : > { %828 = vmatpush.bf16.msra.mxu1 %v7831_v7  ;;  %v918_v37 = vrot.slane %v916_v24, 5  ;;  %v932_v38 = vrot.slane %v930_v29, 5  ;;  %v877_v43 = vld [vmem:[%s7843_s24 + $0x18] sm:$0xf]  ;;  %v935_v44 = vshrl.u32 %v875_v39, 16  ;;  %v938_v45 = vshll.u32 %v875_v39, 16 }
  0x24   : > { %1216 = vmatpush.bf16.msra.mxu2 %v7837_v8  ;;  %v909_v31 = vrot.slane %v907_v22, 4  ;;  %v912_v32 = vrot.slane %v910_v23, 5  ;;  %v927_v41 = vor.u32 %v926_v35, %v923_v33  ;;  %v878_v47 = vld [vmem:[%s7843_s24 + $0x1c] sm:$0x1]  ;;  %v949_v48 = vshrl.u32 %v877_v43, 16 }
  0x25   : > { %v952_v49 = vshll.u32 %v877_v43, 16  ;;  %v937_v52 = vrot.slane %v935_v44, 4  ;;  %v940_v53 = vrot.slane %v938_v45, 5  ;;  %v944_v55 = vshll.u32 %v876_v42, 16  ;;  %v895_v0 = vld [vmem:[%s7843_s24 + $0x68] sm:$0xf] }
  0x26   : > { %692 = vmatpush.bf16.msra.mxu0 %v7334_v9  ;;  %7527 = vmatpush.bf16.msra.mxu3 %v7334_v9  ;;  %v913_v36 = vor.u32 %v912_v32, %v909_v31  ;;  %v928_v51 = vrot.slane %v927_v41, 4  ;;  %v951_v56 = vrot.slane %v949_v48, 4  ;;  %v958_v61 = vshll.u32 %v878_v47, 16  ;;  %v6288_v3 = vld [vmem:[%s7849_s27 + $0x10] sm:$0xf] }
  0x27   : > { %829 = vmatpush.bf16.msra.mxu1 %v7860_v13  ;;  %v954_v57 = vrot.slane %v952_v49, 5  ;;  %v941_v60 = vor.u32 %v940_v53, %v937_v52  ;;  %v7327_v6 = vld [vmem:[%s7849_s27 + $0x14] sm:$0xf0]  ;;  %v1075_v9 = vshrl.u32 %v895_v0, 16  ;;  %v1078_v10 = vshll.u32 %v895_v0, 16 }
  0x28   : > { %1217 = vmatpush.bf16.msra.mxu2 %v7877_v27  ;;  %v914_v46 = vrot.slane %v913_v36, 4  ;;  %v933_v58 = vsel %vm7885_vm3, %v928_v51, %v932_v38  ;;  %v6368_v12 = vld [vmem:[%s7843_s24 + $0x78] sm:$0xf]  ;;  %v7321_v14 = vld [vmem:[%s7843_s24 + $0x7c] sm:$0xf0]  ;;  %v960_v19 = vrot.slane %v958_v61, 5  ;;  %v6289_v28 = vor.u32 %v7327_v6, %v6288_v3 }
  0x29   : > { %6330 = vmatmul.msk.bf16.vlgmr.msra.gmra.mxu0 %vm660_vm2, %v6285_v26  ;;  %6337 = vmatmul.msk.bf16.vlgmr.msra.gmra.mxu3 %vm660_vm2, %v6313_v30  ;;  %v1139_v62 = vunpack.c.l.b16 %v933_v58  ;;  %v955_v63 = vor.u32 %v954_v57, %v951_v56  ;;  %v896_v20 = vld [vmem:[%s7843_s24 + $0x6c] sm:$0x1]  ;;  %v1077_v21 = vrot.slane %v1075_v9, 4  ;;  %v1080_v22 = vrot.slane %v1078_v10, 5  ;;  %v879_v25 = vld [vmem:[%s7843_s24 + $0x20] sm:$0xf] }
  0x2a   : > { %1568 = vmatpush.bf16.msrb.mxu0 %v7365_v17  ;;  %7528 = vmatpush.bf16.msrb.mxu3 %v7795_v1  ;;  %v919_v54 = vsel %vm7885_vm3, %v914_v46, %v918_v37  ;;  %v897_v1 = vld [vmem:[%s7843_s24 + $0x70] sm:$0xf]  ;;  %v946_v17 = vrot.slane %v944_v55, 5  ;;  %v898_v26 = vld [vmem:[%s7843_s24 + $0x74] sm:$0x1]  ;;  %v6369_v31 = vor.u32 %v7321_v14, %v6368_v12  ;;  %v1084_v33 = vshll.u32 %v896_v20, 16 }
  0x2b   : > { %6386 = vmatmul.msk.bf16.vlgmr.msra.gmra.mxu1 %vm660_vm2, %v6341_v34  ;;  %v1138_v59 = vunpack.c.l.b16 %v919_v54  ;;  %v1089_v15 = vshrl.u32 %v897_v1, 16  ;;  %v1092_v16 = vshll.u32 %v897_v1, 16  ;;  %v956_v18 = vrot.slane %v955_v63, 4  ;;  %v6344_v29 = vld [vmem:[%s7843_s24 + $0x10] sm:$0xf]  ;;  %v7353_v10 = vld [vmem:[%s9564_s4 + $0x78] sm:$0xff] }
  0x2c   : > { %v7315_v30 = vld [vmem:[%s7843_s24 + $0x14] sm:$0xf0]  ;;  %v881_v32 = vld [vmem:[%s7843_s24 + $0x28] sm:$0xf]  ;;  %v963_v34 = vshrl.u32 %v879_v25, 16  ;;  %v966_v35 = vshll.u32 %v879_v25, 16  ;;  %v1081_v37 = vor.u32 %v1080_v22, %v1077_v21 }
  0x2d   : > { %v1154_v11 = vpack.c.b16 %v1139_v62, %v1138_v59  ;;  %v1091_v23 = vrot.slane %v1089_v15, 4  ;;  %v1094_v24 = vrot.slane %v1092_v16, 5  ;;  %v961_v36 = vsel %vm7885_vm3, %v956_v18, %v960_v19  ;;  %v899_v53 = vld [vmem:[%s7843_s24 + $0x78] sm:$0xf]  ;;  %v882_v54 = vld [vmem:[%s7843_s24 + $0x2c] sm:$0x1] }
  0x2e   : > { %1569 = vmatpush.bf16.msrb.mxu0 %v7364_v50  ;;  %7529 = vmatpush.bf16.msrb.mxu3 %v7814_v4  ;;  %v942_v4 = vrot.slane %v941_v60, 4  ;;  %v1098_v39 = vshll.u32 %v898_v26, 16  ;;  %v6345_v41 = vor.u32 %v7315_v30, %v6344_v29  ;;  %v977_v42 = vshrl.u32 %v881_v32, 16  ;;  %v880_v50 = vld [vmem:[%s7843_s24 + $0x24] sm:$0x1]  ;;  %v7363_v19 = vld [vmem:[%s9564_s4 + $0x88] sm:$0xff] }
  0x2f   : > { %6410 = vmatmul.msk.bf16.vlgmr.msra.gmra.mxu2 %vm660_vm2, %v1154_v11  ;;  %v1095_v38 = vor.u32 %v1094_v24, %v1091_v23  ;;  %v980_v43 = vshll.u32 %v881_v32, 16  ;;  %v1141_v44 = vunpack.c.l.b16 %v961_v36  ;;  %v965_v45 = vrot.slane %v963_v34, 4  ;;  %v901_v55 = vld [vmem:[%s7843_s24 + $0x80] sm:$0xf]  ;;  %v7328_v6 = vld [vmem:[%s7849_s27 + $0x24] sm:$0xf0] }
  0x30   : > { %v968_v46 = vrot.slane %v966_v35, 5  ;;  %v1086_v47 = vrot.slane %v1084_v33, 5  ;;  %v1100_v49 = vrot.slane %v1098_v39, 5  ;;  %v979_v51 = vrot.slane %v977_v42, 4  ;;  %v6292_v62 = vld [vmem:[%s7849_s27 + $0x20] sm:$0xf] }
  0x31   : > { %v1096_v48 = vrot.slane %v1095_v38, 4  ;;  %v982_v52 = vrot.slane %v980_v43, 5  ;;  %v972_v58 = vshll.u32 %v880_v50, 16  ;;  %v1103_v61 = vshrl.u32 %v899_v53, 16  ;;  %v6348_v9 = vld [vmem:[%s7843_s24 + $0x20] sm:$0xf] }
  0x32   : > { %7530 = vmatpush.bf16.msrb.mxu3 %v7831_v7  ;;  %v947_v7 = vsel %vm7885_vm3, %v942_v4, %v946_v17  ;;  %v969_v57 = vor.u32 %v968_v46, %v965_v45  ;;  %v986_v0 = vshll.u32 %v882_v54, 16  ;;  %v1117_v1 = vshrl.u32 %v901_v55, 16  ;;  %v7316_v11 = vld [vmem:[%s7843_s24 + $0x24] sm:$0xf0]  ;;  %v902_v4 = vld [vmem:[%s7843_s24 + $0x84] sm:$0x1]  ;;  %1570 = vmatpush.bf16.msrb.mxu0 %v7363_v19 }
  0x33   : > { %v1101_v60 = vsel %vm7885_vm3, %v1096_v48, %v1100_v49  ;;  %v983_v63 = vor.u32 %v982_v52, %v979_v51  ;;  %v1120_v3 = vshll.u32 %v901_v55, 16  ;;  %v974_v16 = vrot.slane %v972_v58, 5  ;;  %v883_v24 = vld [vmem:[%s7843_s24 + $0x30] sm:$0xf]  ;;  %v885_v26 = vld [vmem:[%s7843_s24 + $0x38] sm:$0xf] }
  0x34   : > { %v1151_v14 = vunpack.c.l.b16 %v1101_v60  ;;  %v970_v15 = vrot.slane %v969_v57, 4  ;;  %v1105_v17 = vrot.slane %v1103_v61, 4  ;;  %v988_v21 = vrot.slane %v986_v0, 5  ;;  %v7351_v39 = vld [vmem:[%s9564_s4 + $0x68] sm:$0xff]  ;;  %v886_v50 = vld [vmem:[%s7843_s24 + $0x3c] sm:$0x1] }
  0x35   : > { %v984_v20 = vrot.slane %v983_v63, 4  ;;  %v1119_v22 = vrot.slane %v1117_v1, 4  ;;  %v1122_v23 = vrot.slane %v1120_v3, 5  ;;  %v6293_v25 = vor.u32 %v7328_v6, %v6292_v62  ;;  %v7350_v51 = vld [vmem:[%s9564_s4 + $0x60] sm:$0xff]  ;;  %v7329_v60 = vld [vmem:[%s7849_s27 + $0x34] sm:$0xf0] }
  0x36   : > { %7531 = vmatpush.bf16.msrb.mxu3 %v7860_v13  ;;  %v1140_v13 = vunpack.c.l.b16 %v947_v7  ;;  %v6349_v29 = vor.u32 %v7316_v11, %v6348_v9  ;;  %v1126_v7 = vshll.u32 %v902_v4, 16  ;;  %v991_v33 = vshrl.u32 %v883_v24, 16  ;;  %v887_v0 = vld [vmem:[%s7843_s24 + $0x48] sm:$0xf]  ;;  %v889_v6 = vld [vmem:[%s7843_s24 + $0x50] sm:$0xf] }
  0x37   : > { %v994_v34 = vshll.u32 %v883_v24, 16  ;;  %v989_v35 = vsel %vm7885_vm3, %v984_v20, %v988_v21  ;;  %v1123_v36 = vor.u32 %v1122_v23, %v1119_v22  ;;  %v1008_v38 = vshll.u32 %v885_v26, 16  ;;  %v6352_v9 = vld [vmem:[%s7843_s24 + $0x30] sm:$0xf]  ;;  %v888_v22 = vld [vmem:[%s7843_s24 + $0x4c] sm:$0x1] }
  0x38   : > { %v1155_v56 = vpack.c.b16 %v1141_v44, %v1140_v13  ;;  %v1143_v43 = vunpack.c.l.b16 %v989_v35  ;;  %v993_v44 = vrot.slane %v991_v33, 4  ;;  %v1014_v58 = vshll.u32 %v886_v50, 16  ;;  %v6356_v33 = vld [vmem:[%s7843_s24 + $0x48] sm:$0xf] }
  0x39   : > { %6331 = vmatmul.msk.bf16.gmra.mxu0 %vm660_vm2, %v6289_v28  ;;  %6393 = vmatmul.msk.bf16.vlgmr.msrb.gmra.mxu3 %vm660_vm2, %v6369_v31  ;;  %v7352_v28 = vld [vmem:[%s9564_s4 + $0x70] sm:$0xff]  ;;  %v975_v31 = vsel %vm7885_vm3, %v970_v15, %v974_v16  ;;  %v996_v45 = vrot.slane %v994_v34, 5  ;;  %v1124_v46 = vrot.slane %v1123_v36, 4  ;;  %v1010_v49 = vrot.slane %v1008_v38, 5  ;;  %v7362_v38 = vld [vmem:[%s9564_s4 + $0x80] sm:$0xff] }
  0x3a   : > { %7532 = vmatpush.bf16.msra.mxu3 %v7805_v2  ;;  %v1082_v2 = vrot.slane %v1081_v37, 4  ;;  %v1005_v37 = vshrl.u32 %v885_v26, 16  ;;  %v1016_v3 = vrot.slane %v1014_v58, 5  ;;  %v1036_v4 = vshll.u32 %v889_v6, 16  ;;  %v890_v26 = vld [vmem:[%s7843_s24 + $0x54] sm:$0x1]  ;;  %1571 = vmatpush.bf16.msrb.mxu0 %v7362_v38 }
  0x3b   : > { %6387 = vmatmul.msk.bf16.gmra.mxu1 %vm660_vm2, %v6345_v41  ;;  %v1142_v41 = vunpack.c.l.b16 %v975_v31  ;;  %v7332_v38 = vld [vmem:[%s7849_s27 + $0x6c] sm:$0xf0] }
  0x3c   : > { %v1087_v59 = vsel %vm7885_vm3, %v1082_v2, %v1086_v47  ;;  %v1128_v2 = vrot.slane %v1126_v7, 5  ;;  %v884_v47 = vld [vmem:[%s7843_s24 + $0x34] sm:$0x1]  ;;  %v1007_v48 = vrot.slane %v1005_v37, 4  ;;  %v7330_v7 = vld [vmem:[%s7849_s27 + $0x4c] sm:$0xf0] }
  0x3d   : > { %v1150_v12 = vunpack.c.l.b16 %v1087_v59  ;;  %v1156_v52 = vpack.c.b16 %v1143_v43, %v1142_v41  ;;  %v1000_v54 = vshll.u32 %v884_v47, 16  ;;  %v6296_v59 = vld [vmem:[%s7849_s27 + $0x30] sm:$0xf]  ;;  %v7342_v43 = vld [vmem:[%s7994_s18 + $0x4] sm:$0xf0] }
  0x3e   : > { %7533 = vmatpush.bf16.msra.mxu3 %v7820_v5  ;;  %v1106_v5 = vshll.u32 %v899_v53, 16  ;;  %v997_v53 = vor.u32 %v996_v45, %v993_v44  ;;  %v1011_v57 = vor.u32 %v1010_v49, %v1007_v48  ;;  %v6297_v11 = vor.u32 %v7329_v60, %v6296_v59  ;;  %v7318_v41 = vld [vmem:[%s7843_s24 + $0x4c] sm:$0xf0]  ;;  %v893_v44 = vld [vmem:[%s7843_s24 + $0x60] sm:$0xf]  ;;  %v7369_v59 = vld [vmem:[%s9564_s4 + $0xb8] sm:$0xff] }
  0x3f   : > { %6411 = vmatmul.msk.bf16.gmra.mxu2 %vm660_vm2, %v1155_v56  ;;  %v1160_v30 = vpack.c.b16 %v1151_v14, %v1150_v12  ;;  %v1129_v56 = vsel %vm7885_vm3, %v1124_v46, %v1128_v2  ;;  %v1002_v63 = vrot.slane %v1000_v54, 5  ;;  %v1019_v12 = vshrl.u32 %v887_v0, 16  ;;  %v7380_v60 = vld [vmem:[%s9564_s4 + $0xd0] sm:$0xff]  ;;  %1969 = vmatpush.bf16.msrb.mxu1 %v7369_v59 }
  0x40   : > { %v1108_v18 = vrot.slane %v1106_v5, 5  ;;  %v1153_v5 = vunpack.c.l.b16 %v1129_v56  ;;  %v998_v62 = vrot.slane %v997_v53, 4  ;;  %v1012_v1 = vrot.slane %v1011_v57, 4 }
  0x41   : > { %v1022_v14 = vshll.u32 %v887_v0, 16  ;;  %v1021_v20 = vrot.slane %v1019_v12, 4  ;;  %v6357_v46 = vor.u32 %v7318_v41, %v6356_v33  ;;  %v7379_v0 = vld [vmem:[%s9564_s4 + $0xc8] sm:$0xff]  ;;  %v7378_v12 = vld [vmem:[%s9564_s4 + $0xc0] sm:$0xff]  ;;  %v7320_v41 = vld [vmem:[%s7843_s24 + $0x6c] sm:$0xf0] }
  0x42   : > { %7534 = vmatpush.bf16.msra.mxu3 %v7837_v8  ;;  %v900_v8 = vld [vmem:[%s7843_s24 + $0x7c] sm:$0x1]  ;;  %v1003_v16 = vsel %vm7885_vm3, %v998_v62, %v1002_v63  ;;  %v7368_v63 = vld [vmem:[%s9564_s4 + $0xb0] sm:$0xff] }
  0x43   : > { %v1112_v32 = vshll.u32 %v900_v8, 16  ;;  %v1033_v8 = vshrl.u32 %v889_v6, 16  ;;  %v1144_v19 = vunpack.c.l.b16 %v1003_v16  ;;  %v1024_v23 = vrot.slane %v1022_v14, 5  ;;  %v7393_v62 = vld [vmem:[%s9564_s4 + $0xf8] sm:$0xff]  ;;  %1970 = vmatpush.bf16.msrb.mxu1 %v7368_v63  ;;  %v6424_v16 = vld [vmem:[%s7994_s18 + $0x10] sm:$0xf] }
  0x44   : > { %v6304_v14 = vld [vmem:[%s7849_s27 + $0x58] sm:$0xf] }
  0x45   : > { %v1114_v42 = vrot.slane %v1112_v32, 5  ;;  %v1035_v24 = vrot.slane %v1033_v8, 4  ;;  %v1042_v32 = vshll.u32 %v890_v26, 16  ;;  %v7343_v8 = vld [vmem:[%s7994_s18 + $0x14] sm:$0xf0] }
  0x46   : > { %7535 = vmatpush.bf16.msra.mxu3 %v7877_v27  ;;  %v1109_v27 = vor.u32 %v1108_v18, %v1105_v17  ;;  %v1017_v18 = vsel %vm7885_vm3, %v1012_v1, %v1016_v3 }
  0x47   : > { %v1145_v21 = vunpack.c.l.b16 %v1017_v18  ;;  %v1044_v37 = vrot.slane %v1042_v32, 5  ;;  %v1629_v32 = vld [vmem:[%s7994_s18] sm:$0xf] }
  0x48   : > { %v1110_v13 = vrot.slane %v1109_v27, 4  ;;  %v6300_v27 = vld [vmem:[%s7849_s27 + $0x48] sm:$0xf]  ;;  %v1662_v33 = vshrl.u32 %v1629_v32, 16 }
  0x49   : > { %6332 = vmatmul.msk.bf16.gmra.mxu0 %vm660_vm2, %v6293_v25  ;;  %6416 = vmatmul.msk.bf16.vlgmr.msra.gmra.mxu3 %vm660_vm2, %v1160_v30  ;;  %v1038_v25 = vrot.slane %v1036_v4, 5  ;;  %v1025_v30 = vor.u32 %v1024_v23, %v1021_v20  ;;  %v6301_v45 = vor.u32 %v7330_v7, %v6300_v27  ;;  %v6360_v20 = vld [vmem:[%s7843_s24 + $0x58] sm:$0xf]  ;;  %v1631_v27 = vld [vmem:[%s7994_s18 + $0x8] sm:$0xf] }
  0x4a   : > { %1391 = vmatpush.bf16.msrb.mxu3 %v7353_v10  ;;  %v1115_v55 = vsel %vm7885_vm3, %v1110_v13, %v1114_v42  ;;  %v7317_v10 = vld [vmem:[%s7843_s24 + $0x34] sm:$0xf0]  ;;  %v6420_v42 = vld [vmem:[%s7994_s18] sm:$0xf] }
  0x4b   : > { %6388 = vmatmul.msk.bf16.gmra.mxu1 %vm660_vm2, %v6349_v29  ;;  %v1152_v61 = vunpack.c.l.b16 %v1115_v55  ;;  %v6353_v17 = vor.u32 %v7317_v10, %v6352_v9  ;;  %v1157_v29 = vpack.c.b16 %v1145_v21, %v1144_v19  ;;  %v1039_v31 = vor.u32 %v1038_v25, %v1035_v24  ;;  %v891_v13 = vld [vmem:[%s7843_s24 + $0x58] sm:$0xf]  ;;  %v7319_v21 = vld [vmem:[%s7843_s24 + $0x5c] sm:$0xf0] }
  0x4c   : > { %v1026_v34 = vrot.slane %v1025_v30, 4  ;;  %v6421_v2 = vor.u32 %v7342_v43, %v6420_v42  ;;  %v1047_v49 = vshrl.u32 %v891_v13, 16  ;;  %v1050_v50 = vshll.u32 %v891_v13, 16  ;;  %v6428_v42 = vld [vmem:[%s7994_s18 + $0x20] sm:$0xf] }
  0x4d   : > { %v1161_v15 = vpack.c.b16 %v1153_v5, %v1152_v61  ;;  %v1040_v36 = vrot.slane %v1039_v31, 4  ;;  %v892_v61 = vld [vmem:[%s7843_s24 + $0x5c] sm:$0x1]  ;;  %v894_v5 = vld [vmem:[%s7843_s24 + $0x64] sm:$0x1]  ;;  %v6425_v24 = vor.u32 %v7343_v8, %v6424_v16  ;;  %v6361_v25 = vor.u32 %v7319_v21, %v6360_v20 }
  0x4e   : > { %1392 = vmatpush.bf16.msrb.mxu3 %v7352_v28  ;;  %v1028_v28 = vshll.u32 %v888_v22, 16  ;;  %v1049_v55 = vrot.slane %v1047_v49, 4  ;;  %v1052_v56 = vrot.slane %v1050_v50, 5  ;;  %v1056_v6 = vshll.u32 %v892_v61, 16  ;;  %v7366_v22 = vld [vmem:[%s9564_s4 + $0xa0] sm:$0xff]  ;;  %v7397_v31 = vld [vmem:[%s9564_s4 + $0x118] sm:$0xff] }
  0x4f   : > { %6412 = vmatmul.msk.bf16.gmra.mxu2 %vm660_vm2, %v1156_v52  ;;  %v1045_v48 = vsel %vm7885_vm3, %v1040_v36, %v1044_v37  ;;  %v1064_v52 = vshll.u32 %v893_v44, 16  ;;  %v1070_v10 = vshll.u32 %v894_v5, 16  ;;  %2726 = vmatpush.bf16.msra.mxu0 %v7397_v31  ;;  %v1679_v36 = vshll.u32 %v1631_v27, 16  ;;  %v6308_v37 = vld [vmem:[%s7849_s27 + $0x68] sm:$0xf] }
  0x50   : > { %v1030_v35 = vrot.slane %v1028_v28, 5  ;;  %v1147_v54 = vunpack.c.l.b16 %v1045_v48  ;;  %v1053_v3 = vor.u32 %v1052_v56, %v1049_v55  ;;  %v7344_v43 = vld [vmem:[%s7994_s18 + $0x24] sm:$0xf0]  ;;  %v1664_v13 = vrot.slane %v1662_v33, 4  ;;  %v7370_v56 = vld [vmem:[%s7843_s24 + $0xc] sm:$0xf0] }
  0x51   : > { %v1066_v58 = vrot.slane %v1064_v52, 5  ;;  %v1072_v19 = vrot.slane %v1070_v10, 5  ;;  %v6309_v48 = vor.u32 %v7332_v38, %v6308_v37  ;;  %v6429_v50 = vor.u32 %v7344_v43, %v6428_v42  ;;  %v6572_v55 = vld [vmem:[%s7843_s24 + $0x8] sm:$0xf]  ;;  %v1633_v61 = vld [vmem:[%s7994_s18 + $0x10] sm:$0xf] }
  0x52   : > { %1393 = vmatpush.bf16.msrb.mxu3 %v7351_v39  ;;  %v7381_v39 = vld [vmem:[%s9564_s4 + $0xd8] sm:$0xff]  ;;  %v1031_v47 = vsel %vm7885_vm3, %v1026_v34, %v1030_v35  ;;  %v1054_v4 = vrot.slane %v1053_v3, 4  ;;  %v1665_v34 = vshll.u32 %v1629_v32, 16  ;;  %v1676_v35 = vshrl.u32 %v1631_v27, 16  ;;  %v6432_v10 = vld [vmem:[%s7994_s18 + $0x30] sm:$0xf] }
  0x53   : > { %2147 = vmatpush.bf16.msrb.mxu2 %v7381_v39  ;;  %v1146_v53 = vunpack.c.l.b16 %v1031_v47  ;;  %v6364_v39 = vld [vmem:[%s7843_s24 + $0x68] sm:$0xf]  ;;  %v1632_v47 = vld [vmem:[%s7994_s18 + $0xc] sm:$0x1]  ;;  %v1635_v5 = vld [vmem:[%s7994_s18 + $0x18] sm:$0xf] }
  0x54   : > { %v6365_v49 = vor.u32 %v7320_v41, %v6364_v39  ;;  %v1693_v3 = vshll.u32 %v1633_v61, 16  ;;  %v1636_v20 = vld [vmem:[%s7994_s18 + $0x1c] sm:$0x1]  ;;  %v7371_v31 = vld [vmem:[%s7843_s24 + $0x1c] sm:$0xf0]  ;;  %v7396_v37 = vld [vmem:[%s9564_s4 + $0x110] sm:$0xff] }
  0x55   : > { %v1158_v1 = vpack.c.b16 %v1147_v54, %v1146_v53  ;;  %v1685_v54 = vshll.u32 %v1632_v47, 16  ;;  %v1637_v32 = vld [vmem:[%s7994_s18 + $0x20] sm:$0xf]  ;;  %v1639_v27 = vld [vmem:[%s7994_s18 + $0x28] sm:$0xf]  ;;  %2727 = vmatpush.bf16.msra.mxu0 %v7396_v37 }
  0x56   : > { %1394 = vmatpush.bf16.msrb.mxu3 %v7350_v51  ;;  %v1061_v51 = vshrl.u32 %v893_v44, 16  ;;  %v1667_v44 = vrot.slane %v1665_v34, 5  ;;  %v1718_v38 = vshrl.u32 %v1637_v32, 16  ;;  %v1721_v39 = vshll.u32 %v1637_v32, 16 }
  0x57   : > { %2148 = vmatpush.bf16.msrb.mxu2 %v7380_v60  ;;  %v1687_v60 = vrot.slane %v1685_v54, 5  ;;  %v1732_v41 = vshrl.u32 %v1639_v27, 16  ;;  %v1735_v42 = vshll.u32 %v1639_v27, 16  ;;  %v1640_v54 = vld [vmem:[%s7994_s18 + $0x2c] sm:$0x1] }
  0x58   : > { %v1063_v57 = vrot.slane %v1061_v51, 4  ;;  %v1668_v51 = vor.u32 %v1667_v44, %v1664_v13  ;;  %v6436_v44 = vld [vmem:[%s7994_s18 + $0x48] sm:$0xf]  ;;  %v1720_v47 = vrot.slane %v1718_v38, 4 }
  0x59   : > { %6333 = vmatmul.msk.bf16.gmra.mxu0 %vm660_vm2, %v6297_v11  ;;  %6417 = vmatmul.msk.bf16.gmra.mxu3 %vm660_vm2, %v1161_v15  ;;  %v7367_v11 = vld [vmem:[%s9564_s4 + $0xa8] sm:$0xff]  ;;  %v7331_v15 = vld [vmem:[%s7849_s27 + $0x5c] sm:$0xf0] }
  0x5a   : > { %2325 = vmatpush.bf16.msra.mxu3 %v7393_v62  ;;  %v1067_v9 = vor.u32 %v1066_v58, %v1063_v57  ;;  %1971 = vmatpush.bf16.msrb.mxu1 %v7367_v11  ;;  %v6305_v23 = vor.u32 %v7331_v15, %v6304_v14  ;;  %v1669_v57 = vrot.slane %v1668_v51, 4  ;;  %v6573_v62 = vor.u32 %v7370_v56, %v6572_v55  ;;  %v7345_v11 = vld [vmem:[%s7994_s18 + $0x34] sm:$0xf0]  ;;  %v7354_v14 = vld [vmem:[%s8087_s0 + $0x4] sm:$0xf0] }
  0x5b   : > { %6389 = vmatmul.msk.bf16.gmra.mxu1 %vm660_vm2, %v6353_v17  ;;  %2149 = vmatpush.bf16.msrb.mxu2 %v7379_v0  ;;  %v1058_v17 = vrot.slane %v1056_v6, 5  ;;  %v1704_v6 = vshrl.u32 %v1635_v5, 16  ;;  %v6433_v21 = vor.u32 %v7345_v11, %v6432_v10  ;;  %v7372_v10 = vld [vmem:[%s7843_s24 + $0x2c] sm:$0xf0] }
  0x5c   : > { %v1068_v18 = vrot.slane %v1067_v9, 4  ;;  %v1707_v9 = vshll.u32 %v1635_v5, 16  ;;  %v1641_v11 = vld [vmem:[%s7994_s18 + $0x30] sm:$0xf] }
  0x5d   : > { %v1059_v26 = vsel %vm7885_vm3, %v1054_v4, %v1058_v17  ;;  %v1695_v4 = vrot.slane %v1693_v3, 5  ;;  %v1706_v17 = vrot.slane %v1704_v6, 4 }
  0x5e   : > { %v1073_v28 = vsel %vm7885_vm3, %v1068_v18, %v1072_v19  ;;  %1972 = vmatpush.bf16.msrb.mxu1 %v7366_v22  ;;  %v1709_v18 = vrot.slane %v1707_v9, 5  ;;  %v1634_v19 = vld [vmem:[%s7994_s18 + $0x14] sm:$0x1]  ;;  %v6580_v9 = vld [vmem:[%s7843_s24 + $0x28] sm:$0xf] }
  0x5f   : > { %6413 = vmatmul.msk.bf16.gmra.mxu2 %vm660_vm2, %v1157_v29  ;;  %v1148_v29 = vunpack.c.l.b16 %v1059_v26  ;;  %v1149_v30 = vunpack.c.l.b16 %v1073_v28  ;;  %v1699_v26 = vshll.u32 %v1634_v19, 16 }
  0x60   : > { %2150 = vmatpush.bf16.msrb.mxu2 %v7378_v12  ;;  %v6476_v12 = vld [vmem:[%s8087_s0] sm:$0xf]  ;;  %v1710_v28 = vor.u32 %v1709_v18, %v1706_v17  ;;  %v1746_v17 = vshrl.u32 %v1641_v11, 16  ;;  %v1749_v18 = vshll.u32 %v1641_v11, 16  ;;  %v7348_v11 = vld [vmem:[%s7994_s18 + $0x6c] sm:$0xf0] }
  0x61   : > { %v1159_v7 = vpack.c.b16 %v1149_v30, %v1148_v29  ;;  %v6477_v22 = vor.u32 %v7354_v14, %v6476_v12  ;;  %v1713_v29 = vshll.u32 %v1636_v20, 16  ;;  %v6576_v30 = vld [vmem:[%s7843_s24 + $0x18] sm:$0xf]  ;;  %v1701_v33 = vrot.slane %v1699_v26, 5 }
  0x62   : > { %v1711_v34 = vrot.slane %v1710_v28, 4  ;;  %v1643_v12 = vld [vmem:[%s7994_s18 + $0x38] sm:$0xf] }
  0x63   : > { %v1760_v19 = vshrl.u32 %v1643_v12, 16  ;;  %v1763_v20 = vshll.u32 %v1643_v12, 16  ;;  %v6488_v12 = vld [vmem:[%s8087_s0 + $0x30] sm:$0xf] }
  0x65   : > { %v1762_v32 = vrot.slane %v1760_v19, 4  ;;  %v1765_v27 = vrot.slane %v1763_v20, 5 }
  0x69   : > { %6334 = vmatmul.msk.bf16.gmra.mxu0 %vm660_vm2, %v6301_v45  ;;  %6466 = vmatmul.msk.bf16.vlgmr.msrb.gmra.mxu3 %vm660_vm2, %v6421_v2  ;;  %v1678_v45 = vrot.slane %v1676_v35, 4  ;;  %v1630_v2 = vld [vmem:[%s7994_s18 + $0x4] sm:$0x1]  ;;  %v1715_v35 = vrot.slane %v1713_v29, 5  ;;  %v7356_v29 = vld [vmem:[%s8087_s0 + $0x24] sm:$0xf0] }
  0x6a   : > { %v1671_v52 = vshll.u32 %v1630_v2, 16  ;;  %v7355_v2 = vld [vmem:[%s8087_s0 + $0x14] sm:$0xf0] }
  0x6b   : > { %6390 = vmatmul.msk.bf16.gmra.mxu1 %vm660_vm2, %v6357_v46  ;;  %v1681_v46 = vrot.slane %v1679_v36, 5  ;;  %v6577_v36 = vor.u32 %v7371_v31, %v6576_v30  ;;  %v1716_v13 = vsel %vm7885_vm3, %v1711_v34, %v1715_v35  ;;  %v1748_v30 = vrot.slane %v1746_v17, 4 }
  0x6c   : > { %v1673_v58 = vrot.slane %v1671_v52, 5  ;;  %v1896_v52 = vunpack.c.l.b16 %v1716_v13  ;;  %v1751_v31 = vrot.slane %v1749_v18, 5 }
  0x6d   : > { %v1682_v53 = vor.u32 %v1681_v46, %v1678_v45  ;;  %v7346_v45 = vld [vmem:[%s7994_s18 + $0x4c] sm:$0xf0] }
  0x6e   : > { %v1674_v63 = vsel %vm7885_vm3, %v1669_v57, %v1673_v58  ;;  %v6480_v46 = vld [vmem:[%s8087_s0 + $0x10] sm:$0xf]  ;;  %v6437_v55 = vor.u32 %v7346_v45, %v6436_v44  ;;  %v1766_v44 = vor.u32 %v1765_v27, %v1762_v32 }
  0x6f   : > { %6414 = vmatmul.msk.bf16.gmra.mxu2 %vm660_vm2, %v1158_v1  ;;  %v1683_v59 = vrot.slane %v1682_v53, 4  ;;  %v1690_v1 = vshrl.u32 %v1633_v61, 16  ;;  %v1893_v15 = vunpack.c.l.b16 %v1674_v63  ;;  %v1638_v53 = vld [vmem:[%s7994_s18 + $0x24] sm:$0x1]  ;;  %v6481_v56 = vor.u32 %v7355_v2, %v6480_v46 }
  0x70   : > { %v1727_v58 = vshll.u32 %v1638_v53, 16 }
  0x71   : > { %v1688_v0 = vsel %vm7885_vm3, %v1683_v59, %v1687_v60  ;;  %v1692_v8 = vrot.slane %v1690_v1, 4  ;;  %v1741_v60 = vshll.u32 %v1640_v54, 16 }
  0x72   : > { %v1894_v16 = vunpack.c.l.b16 %v1688_v0  ;;  %v1729_v1 = vrot.slane %v1727_v58, 5 }
  0x73   : > { %v1743_v6 = vrot.slane %v1741_v60, 5  ;;  %v7395_v60 = vld [vmem:[%s9564_s4 + $0x108] sm:$0xff] }
  0x74   : > { %2728 = vmatpush.bf16.msra.mxu0 %v7395_v60 }
  0x79   : > { %6335 = vmatmul.msk.bf16.gmra.mxu0 %vm660_vm2, %v6305_v23  ;;  %6467 = vmatmul.msk.bf16.gmra.mxu3 %vm660_vm2, %v6425_v24  ;;  %v7392_v23 = vld [vmem:[%s9564_s4 + $0xf0] sm:$0xff]  ;;  %v1909_v24 = vpack.c.b16 %v1894_v16, %v1893_v15  ;;  %v6581_v15 = vor.u32 %v7372_v10, %v6580_v9  ;;  %v6444_v10 = vld [vmem:[%s7994_s18 + $0x68] sm:$0xf] }
  0x7a   : > { %2326 = vmatpush.bf16.msra.mxu3 %v7392_v23  ;;  %v6440_v23 = vld [vmem:[%s7994_s18 + $0x58] sm:$0xf] }
  0x7b   : > { %6391 = vmatmul.msk.bf16.gmra.mxu1 %vm660_vm2, %v6361_v25  ;;  %v1696_v25 = vor.u32 %v1695_v4, %v1692_v8 }
  0x7f   : > { %6415 = vmatmul.msk.bf16.gmra.mxu2 %vm660_vm2, %v1159_v7  ;;  %v1697_v7 = vrot.slane %v1696_v25, 4  ;;  %v6484_v25 = vld [vmem:[%s8087_s0 + $0x20] sm:$0xf] }
  0x80   : > { %v6485_v38 = vor.u32 %v7356_v29, %v6484_v25  ;;  %v6445_v25 = vor.u32 %v7348_v11, %v6444_v10 }
  0x81   : > { %v1702_v43 = vsel %vm7885_vm3, %v1697_v7, %v1701_v33  ;;  %v1642_v7 = vld [vmem:[%s7994_s18 + $0x34] sm:$0x1]  ;;  %v1644_v33 = vld [vmem:[%s7994_s18 + $0x3c] sm:$0x1] }
  0x82   : > { %v1895_v51 = vunpack.c.l.b16 %v1702_v43  ;;  %v1752_v43 = vor.u32 %v1751_v31, %v1748_v30  ;;  %v1755_v13 = vshll.u32 %v1642_v7, 16  ;;  %v1769_v45 = vshll.u32 %v1644_v33, 16  ;;  %v7390_v33 = vld [vmem:[%s9564_s4 + $0xe0] sm:$0xff] }
  0x84   : > { %v1910_v5 = vpack.c.b16 %v1896_v52, %v1895_v51  ;;  %v1767_v51 = vrot.slane %v1766_v44, 4  ;;  %v1771_v52 = vrot.slane %v1769_v45, 5 }
  0x89   : > { %6336 = vmatmul.msk.bf16.gmra.mxu0 %vm660_vm2, %v6309_v48  ;;  %6468 = vmatmul.msk.bf16.gmra.mxu3 %vm660_vm2, %v6429_v50  ;;  %v1723_v48 = vrot.slane %v1721_v39, 5  ;;  %v1737_v50 = vrot.slane %v1735_v42, 5 }
  0x8b   : > { %6392 = vmatmul.msk.bf16.gmra.mxu1 %vm660_vm2, %v6365_v49  ;;  %v1734_v49 = vrot.slane %v1732_v41, 4  ;;  %v1724_v57 = vor.u32 %v1723_v48, %v1720_v47  ;;  %v7391_v41 = vld [vmem:[%s9564_s4 + $0xe8] sm:$0xff]  ;;  %v6584_v47 = vld [vmem:[%s7843_s24 + $0x38] sm:$0xf]  ;;  %v7373_v48 = vld [vmem:[%s7843_s24 + $0x3c] sm:$0xf0] }
  0x8c   : > { %2327 = vmatpush.bf16.msra.mxu3 %v7391_v41 }
  0x8d   : > { %v1738_v59 = vor.u32 %v1737_v50, %v1734_v49  ;;  %v1725_v0 = vrot.slane %v1724_v57, 4  ;;  %v1753_v49 = vrot.slane %v1752_v43, 4  ;;  %v1757_v50 = vrot.slane %v1755_v13, 5 }
  0x8f   : > { %6618 = vmatmul.msk.bf16.vlgmr.msrb.gmra.mxu2 %vm660_vm2, %v6573_v62  ;;  %v1739_v3 = vrot.slane %v1738_v59, 4  ;;  %v1730_v16 = vsel %vm7885_vm3, %v1725_v0, %v1729_v1  ;;  %v6585_v59 = vor.u32 %v7373_v48, %v6584_v47 }
  0x90   : > { %v1897_v26 = vunpack.c.l.b16 %v1730_v16  ;;  %2328 = vmatpush.bf16.msra.mxu3 %v7390_v33 }
  0x91   : > { %v1744_v8 = vsel %vm7885_vm3, %v1739_v3, %v1743_v6 }
  0x92   : > { %v1898_v28 = vunpack.c.l.b16 %v1744_v8 }
  0x94   : > { %v1911_v39 = vpack.c.b16 %v1898_v28, %v1897_v26 }
  0x99   : > { %6469 = vmatmul.msk.bf16.gmra.mxu3 %vm660_vm2, %v6433_v21  ;;  %6522 = vmatmul.msk.bf16.vlgmr.msrb.gmra.mxu0 %vm660_vm2, %v6477_v22 }
  0x9b   : > { %6546 = vmatmul.msk.bf16.vlgmr.msrb.gmra.mxu1 %vm660_vm2, %v1909_v24  ;;  %v7347_v24 = vld [vmem:[%s7994_s18 + $0x5c] sm:$0xf0] }
  0x9c   : > { %v6441_v37 = vor.u32 %v7347_v24, %v6440_v23 }
  0x9f   : > { %6619 = vmatmul.msk.bf16.gmra.mxu2 %vm660_vm2, %v6577_v36 }
  0xa6   : > { %v694_v61 = vpop.f32.mrf.mxu0 }
  0xa8   : > { %v831_v62 = vpop.f32.mrf.mxu1 }
  0xa9   : > { %v832_v63 = vadd.f32 %v831_v62, %v694_v61  ;;  %6470 = vmatmul.msk.bf16.gmra.mxu3 %vm660_vm2, %v6437_v55  ;;  %6523 = vmatmul.msk.bf16.gmra.mxu0 %vm660_vm2, %v6481_v56  ;;  %v1645_v55 = vld [vmem:[%s7994_s18 + $0x48] sm:$0xf]  ;;  %v1647_v56 = vld [vmem:[%s7994_s18 + $0x50] sm:$0xf]  ;;  %v1772_v62 = vsel %vm7885_vm3, %v1767_v51, %v1771_v52 }
  0xaa   : > { %v1774_v0 = vshrl.u32 %v1645_v55, 16  ;;  %v1777_v1 = vshll.u32 %v1645_v55, 16  ;;  %v1788_v3 = vshrl.u32 %v1647_v56, 16  ;;  %v1791_v6 = vshll.u32 %v1647_v56, 16  ;;  %v6448_v56 = vld [vmem:[%s7994_s18 + $0x78] sm:$0xf] }
  0xab   : > { %6547 = vmatmul.msk.bf16.gmra.mxu1 %vm660_vm2, %v1910_v5  ;;  %v1758_v5 = vsel %vm7885_vm3, %v1753_v49, %v1757_v50  ;;  %v1900_v16 = vunpack.c.l.b16 %v1772_v62  ;;  %v7358_v62 = vld [vmem:[%s8087_s0 + $0x4c] sm:$0xf0] }
  0xac   : > { %v729_v14 = vpop.f32.mrf.mxu3  ;;  %v1776_v8 = vrot.slane %v1774_v0, 4  ;;  %v1790_v17 = vrot.slane %v1788_v3, 4  ;;  %v1793_v18 = vrot.slane %v1791_v6, 5  ;;  %v1650_v6 = vld [vmem:[%s7994_s18 + $0x5c] sm:$0x1] }
  0xae   : > { %v696_v4 = vpop.f32.mrf.mxu0  ;;  %v1794_v27 = vor.u32 %v1793_v18, %v1790_v17 }
  0xaf   : > { %6620 = vmatmul.msk.bf16.gmra.mxu2 %vm660_vm2, %v6581_v15  ;;  %v1899_v15 = vunpack.c.l.b16 %v1758_v5  ;;  %v6492_v5 = vld [vmem:[%s8087_s0 + $0x48] sm:$0xf] }
  0xb0   : > { %v833_v21 = vpop.f32.mrf.mxu1  ;;  %v1795_v43 = vrot.slane %v1794_v27, 4 }
  0xb1   : > { %v834_v22 = vadd.f32 %v833_v21, %v696_v4  ;;  %v1779_v4 = vrot.slane %v1777_v1, 5  ;;  %v1646_v21 = vld [vmem:[%s7994_s18 + $0x4c] sm:$0x1]  ;;  %v1912_v29 = vpack.c.b16 %v1900_v16, %v1899_v15 }
  0xb2   : > { %v1219_v34 = vpop.f32.mrf.mxu2  ;;  %v1783_v32 = vshll.u32 %v1646_v21, 16 }
  0xb3   : > { %v8138_v36 = vadd.f32 %v1219_v34, %v832_v63  ;;  %v1780_v31 = vor.u32 %v1779_v4, %v1776_v8  ;;  %v1811_v8 = vshll.u32 %v1650_v6, 16 }
  0xb4   : > { %v731_v35 = vpop.f32.mrf.mxu3 }
  0xb5   : > { %v1781_v41 = vrot.slane %v1780_v31, 4  ;;  %v1653_v31 = vld [vmem:[%s7994_s18 + $0x68] sm:$0xf] }
  0xb6   : > { %v699_v42 = vpop.f32.mrf.mxu0 }
  0xb8   : > { %v836_v46 = vpop.f32.mrf.mxu1 }
  0xb9   : > { %v837_v2 = vadd.f32 %v836_v46, %v699_v42  ;;  %6471 = vmatmul.msk.bf16.gmra.mxu3 %vm660_vm2, %v6441_v37  ;;  %6524 = vmatmul.msk.bf16.gmra.mxu0 %vm660_vm2, %v6485_v38  ;;  %v6588_v37 = vld [vmem:[%s7843_s24 + $0x50] sm:$0xf]  ;;  %v7374_v38 = vld [vmem:[%s7843_s24 + $0x54] sm:$0xf0]  ;;  %v1785_v42 = vrot.slane %v1783_v32, 5 }
  0xba   : > { %v1221_v53 = vpop.f32.mrf.mxu2  ;;  %v6589_v48 = vor.u32 %v7374_v38, %v6588_v37  ;;  %v1655_v32 = vld [vmem:[%s7994_s18 + $0x70] sm:$0xf] }
  0xbb   : > { %6548 = vmatmul.msk.bf16.gmra.mxu1 %vm660_vm2, %v1911_v39  ;;  %v8150_v57 = vadd.f32 %v1221_v53, %v834_v22  ;;  %v1648_v22 = vld [vmem:[%s7994_s18 + $0x54] sm:$0x1]  ;;  %v1651_v39 = vld [vmem:[%s7994_s18 + $0x60] sm:$0xf]  ;;  %v1786_v53 = vsel %vm7885_vm3, %v1781_v41, %v1785_v42  ;;  %v1830_v42 = vshrl.u32 %v1653_v31, 16 }
  0xbc   : > { %v866_v54 = vpop.f32.mrf.mxu3  ;;  %v1797_v7 = vshll.u32 %v1648_v22, 16  ;;  %v1816_v49 = vshrl.u32 %v1651_v39, 16  ;;  %v1819_v50 = vshll.u32 %v1651_v39, 16  ;;  %v1901_v1 = vunpack.c.l.b16 %v1786_v53  ;;  %v6592_v22 = vld [vmem:[%s7843_s24 + $0x60] sm:$0xf] }
  0xbd   : > { %v8152_v58 = vadd.f32 %v866_v54, %v729_v14  ;;  %v7357_v14 = vld [vmem:[%s8087_s0 + $0x34] sm:$0xf0]  ;;  %v7394_v39 = vld [vmem:[%s9564_s4 + $0x100] sm:$0xff]  ;;  %v1832_v53 = vrot.slane %v1830_v42, 4  ;;  %v7360_v42 = vld [vmem:[%s8087_s0 + $0x6c] sm:$0xf0] }
  0xbe   : > { %v701_v61 = vpop.f32.mrf.mxu0  ;;  %v6489_v26 = vor.u32 %v7357_v14, %v6488_v12  ;;  %v1799_v13 = vrot.slane %v1797_v7, 5  ;;  %v1821_v0 = vrot.slane %v1819_v50, 5  ;;  %v6493_v14 = vor.u32 %v7358_v62, %v6492_v5  ;;  %2729 = vmatpush.bf16.msra.mxu0 %v7394_v39 }
  0xbf   : > { %6621 = vmatmul.msk.bf16.gmra.mxu2 %vm660_vm2, %v6585_v59  ;;  %v7349_v59 = vld [vmem:[%s7994_s18 + $0x7c] sm:$0xf0] }
  0xc0   : > { %v838_v63 = vpop.f32.mrf.mxu1  ;;  %v1800_v54 = vsel %vm7885_vm3, %v1795_v43, %v1799_v13  ;;  %v6449_v12 = vor.u32 %v7349_v59, %v6448_v56  ;;  %v1833_v43 = vshll.u32 %v1653_v31, 16  ;;  %v1844_v13 = vshrl.u32 %v1655_v32, 16  ;;  %v1654_v59 = vld [vmem:[%s7994_s18 + $0x6c] sm:$0x1] }
  0xc1   : > { %v839_v9 = vadd.f32 %v838_v63, %v701_v61  ;;  %v1818_v63 = vrot.slane %v1816_v49, 4  ;;  %v1902_v3 = vunpack.c.l.b16 %v1800_v54  ;;  %v6644_v49 = vld [vmem:[%s7849_s27 + $0x8] sm:$0xf] }
  0xc2   : > { %v1224_v19 = vpop.f32.mrf.mxu2  ;;  %v1835_v54 = vrot.slane %v1833_v43, 5  ;;  %v6648_v43 = vld [vmem:[%s7849_s27 + $0x18] sm:$0xf] }
  0xc3   : > { %v8168_v23 = vadd.f32 %v1224_v19, %v837_v2  ;;  %v1822_v4 = vor.u32 %v1821_v0, %v1818_v63  ;;  %v1913_v19 = vpack.c.b16 %v1902_v3, %v1901_v1 }
  0xc4   : > { %v868_v20 = vpop.f32.mrf.mxu3 }
  0xc5   : > { %v8170_v24 = vadd.f32 %v868_v20, %v731_v35  ;;  %v1649_v35 = vld [vmem:[%s7994_s18 + $0x58] sm:$0xf] }
  0xc6   : > { %v704_v28 = vpop.f32.mrf.mxu0  ;;  %v1802_v46 = vshrl.u32 %v1649_v35, 16  ;;  %v1805_v2 = vshll.u32 %v1649_v35, 16 }
  0xc8   : > { %v841_v30 = vpop.f32.mrf.mxu1  ;;  %v1804_v60 = vrot.slane %v1802_v46, 4  ;;  %v1807_v61 = vrot.slane %v1805_v2, 5  ;;  %v6496_v2 = vld [vmem:[%s8087_s0 + $0x58] sm:$0xf] }
  0xc9   : > { %v842_v34 = vadd.f32 %v841_v30, %v704_v28  ;;  %6472 = vmatmul.msk.bf16.gmra.mxu3 %vm660_vm2, %v6445_v25  ;;  %6525 = vmatmul.msk.bf16.gmra.mxu0 %vm660_vm2, %v6489_v26  ;;  %v7375_v25 = vld [vmem:[%s7843_s24 + $0x64] sm:$0xf0]  ;;  %v1813_v28 = vrot.slane %v1811_v8, 5 }
  0xca   : > { %v1226_v44 = vpop.f32.mrf.mxu2  ;;  %v1808_v15 = vor.u32 %v1807_v61, %v1804_v60  ;;  %v6593_v33 = vor.u32 %v7375_v25, %v6592_v22  ;;  %v1656_v60 = vld [vmem:[%s7994_s18 + $0x74] sm:$0x1]  ;;  %v1657_v25 = vld [vmem:[%s7994_s18 + $0x78] sm:$0xf] }
  0xcb   : > { %6549 = vmatmul.msk.bf16.gmra.mxu1 %vm660_vm2, %v1912_v29  ;;  %v8184_v47 = vadd.f32 %v1226_v44, %v839_v9  ;;  %v1652_v9 = vld [vmem:[%s7994_s18 + $0x64] sm:$0x1]  ;;  %v1823_v29 = vrot.slane %v1822_v4, 4  ;;  %v1847_v44 = vshll.u32 %v1655_v32, 16  ;;  %v6596_v4 = vld [vmem:[%s7843_s24 + $0x70] sm:$0xf] }
  0xcc   : > { %v8182_v45 = vpop.f32.mrf.mxu3  ;;  %v1825_v17 = vshll.u32 %v1652_v9, 16  ;;  %v1809_v26 = vrot.slane %v1808_v15, 4  ;;  %v1836_v9 = vor.u32 %v1835_v54, %v1832_v53  ;;  %v1660_v53 = vld [vmem:[%s7994_s18 + $0x84] sm:$0x1] }
  0xcd   : > { %v1849_v56 = vrot.slane %v1847_v44, 5 }
  0xce   : > { %v706_v51 = vpop.f32.mrf.mxu0  ;;  %v1827_v30 = vrot.slane %v1825_v17, 5  ;;  %v1814_v37 = vsel %vm7885_vm3, %v1809_v26, %v1813_v28  ;;  %v1837_v17 = vrot.slane %v1836_v9, 4  ;;  %v1659_v26 = vld [vmem:[%s7994_s18 + $0x80] sm:$0xf] }
  0xcf   : > { %6622 = vmatmul.msk.bf16.gmra.mxu2 %vm660_vm2, %v6589_v48  ;;  %v7359_v48 = vld [vmem:[%s8087_s0 + $0x5c] sm:$0xf0]  ;;  %v1903_v50 = vunpack.c.l.b16 %v1814_v37  ;;  %v1861_v37 = vshll.u32 %v1657_v25, 16  ;;  %v1875_v39 = vshll.u32 %v1659_v26, 16 }
  0xd0   : > { %v843_v52 = vpop.f32.mrf.mxu1  ;;  %v1828_v38 = vsel %vm7885_vm3, %v1823_v29, %v1827_v30  ;;  %v6497_v62 = vor.u32 %v7359_v48, %v6496_v2 }
  0xd1   : > { %v844_v55 = vadd.f32 %v843_v52, %v706_v51  ;;  %v1904_v51 = vunpack.c.l.b16 %v1828_v38  ;;  %v7382_v52 = vld [vmem:[%s7849_s27 + $0xc] sm:$0xf0]  ;;  %v1872_v38 = vshrl.u32 %v1659_v26, 16  ;;  %v1863_v2 = vrot.slane %v1861_v37, 5  ;;  %v7361_v37 = vld [vmem:[%s8087_s0 + $0x7c] sm:$0xf0] }
  0xd2   : > { %v1229_v10 = vpop.f32.mrf.mxu2  ;;  %v6645_v1 = vor.u32 %v7382_v52, %v6644_v49  ;;  %v1877_v49 = vrot.slane %v1875_v39, 5  ;;  %v1658_v52 = vld [vmem:[%s7994_s18 + $0x7c] sm:$0x1]  ;;  %s8533_s18 = scalar_lea.vmem [#allocation3], %s7800_s21 }
  0xd3   : > { %v8199_v16 = vadd.f32 %v1229_v10, %v842_v34  ;;  %v1914_v3 = vpack.c.b16 %v1904_v51, %v1903_v50  ;;  %v1839_v10 = vshll.u32 %v1654_v59, 16  ;;  %v1874_v48 = vrot.slane %v1872_v38, 4 }
  0xd4   : > { %v8197_v11 = vpop.f32.mrf.mxu3 }
  0xd6   : > { %v709_v18 = vpop.f32.mrf.mxu0 }
  0xd8   : > { %v846_v20 = vpop.f32.mrf.mxu1 }
  0xd9   : > { %v847_v21 = vadd.f32 %v846_v20, %v709_v18  ;;  %6473 = vmatmul.msk.bf16.gmra.mxu3 %vm660_vm2, %v6449_v12  ;;  %6526 = vmatmul.msk.bf16.gmra.mxu0 %vm660_vm2, %v6493_v14  ;;  %v1853_v14 = vshll.u32 %v1656_v60, 16  ;;  %v1841_v18 = vrot.slane %v1839_v10, 5  ;;  %v6600_v10 = vld [vmem:[%s7843_s24 + $0x80] sm:$0xf] }
  0xda   : > { %v1231_v27 = vpop.f32.mrf.mxu2 }
  0xdb   : > { %6550 = vmatmul.msk.bf16.gmra.mxu1 %vm660_vm2, %v1913_v19  ;;  %v8208_v34 = vadd.f32 %v1231_v27, %v844_v55  ;;  %v1846_v55 = vrot.slane %v1844_v13, 4  ;;  %v1855_v20 = vrot.slane %v1853_v14, 5  ;;  %v1842_v32 = vsel %vm7885_vm3, %v1837_v17, %v1841_v18  ;;  %v7383_v13 = vld [vmem:[%s7849_s27 + $0x1c] sm:$0xf0] }
  0xdc   : > { %v1254_v7 = vpop.f32.mrf.mxu3  ;;  %v1905_v44 = vunpack.c.l.b16 %v1842_v32  ;;  %v6649_v59 = vor.u32 %v7383_v13, %v6648_v43 }
  0xdd   : > { %v8211_v35 = vadd.f32 %v1254_v7, %v8152_v58  ;;  %v1850_v12 = vor.u32 %v1849_v56, %v1846_v55 }
  0xde   : > { %v711_v41 = vpop.f32.mrf.mxu0 }
  0xdf   : > { %6623 = vmatmul.msk.bf16.gmra.mxu2 %vm660_vm2, %v6593_v33  ;;  %v1851_v19 = vrot.slane %v1850_v12, 4  ;;  %v1858_v33 = vshrl.u32 %v1657_v25, 16  ;;  %v7377_v12 = vld [vmem:[%s7843_s24 + $0x84] sm:$0xf0] }
  0xe0   : > { %v848_v58 = vpop.f32.mrf.mxu1 }
  0xe1   : > { %v849_v46 = vadd.f32 %v848_v58, %v711_v41  ;;  %v1856_v27 = vsel %vm7885_vm3, %v1851_v19, %v1855_v20  ;;  %v6601_v19 = vor.u32 %v7377_v12, %v6600_v10  ;;  %v6702_v10 = vld [vmem:[%s7843_s24 + $0x18] sm:$0xf] }
  0xe2   : > { %v1234_v61 = vpop.f32.mrf.mxu2  ;;  %v1906_v58 = vunpack.c.l.b16 %v1856_v27 }
  0xe3   : > { %v8227_v63 = vadd.f32 %v1234_v61, %v847_v21 }
  0xe4   : > { %v1256_v5 = vpop.f32.mrf.mxu3  ;;  %v1915_v61 = vpack.c.b16 %v1906_v58, %v1905_v44  ;;  %v6699_v58 = vld [vmem:[%s7843_s24 + $0xc] sm:$0x1] }
  0xe5   : > { %v8230_v0 = vadd.f32 %v1256_v5, %v8170_v24  ;;  %v7376_v24 = vld [vmem:[%s7843_s24 + $0x74] sm:$0xf0] }
  0xe6   : > { %v714_v6 = vpop.f32.mrf.mxu0  ;;  %v6597_v30 = vor.u32 %v7376_v24, %v6596_v4  ;;  %v6700_v24 = vld [vmem:[%s7843_s24 + $0x10] sm:$0xf] }
  0xe8   : > { %v851_v15 = vpop.f32.mrf.mxu1 }
  0xe9   : > { %v852_v8 = vadd.f32 %v851_v15, %v714_v6  ;;  %6527 = vmatmul.msk.bf16.gmra.mxu0 %vm660_vm2, %v6497_v62  ;;  %6690 = vmatmul.msk.bf16.vlgmr.msra.gmra.mxu3 %vm660_vm2, %v6645_v1  ;;  %v1867_v1 = vshll.u32 %v1658_v52, 16  ;;  %v1881_v6 = vshll.u32 %v1660_v53, 16 }
  0xea   : > { %v1236_v21 = vpop.f32.mrf.mxu2 }
  0xeb   : > { %6551 = vmatmul.msk.bf16.gmra.mxu1 %vm660_vm2, %v1914_v3  ;;  %v8239_v28 = vadd.f32 %v1236_v21, %v849_v46  ;;  %v1860_v46 = vrot.slane %v1858_v33, 4  ;;  %v1878_v3 = vor.u32 %v1877_v49, %v1874_v48  ;;  %v1869_v15 = vrot.slane %v1867_v1, 5 }
  0xec   : > { %v1396_v22 = vpop.f32.mrf.mxu3  ;;  %v1883_v4 = vrot.slane %v1881_v6, 5 }
  0xed   : > { %v8242_v29 = vadd.f32 %v1396_v22, %v8138_v36  ;;  %v6500_v36 = vld [vmem:[%s8087_s0 + $0x68] sm:$0xf]  ;;  %v1864_v62 = vor.u32 %v1863_v2, %v1860_v46  ;;  %v6701_v46 = vld [vmem:[%s7843_s24 + $0x14] sm:$0x1] }
  0xee   : > { %v716_v31 = vpop.f32.mrf.mxu0  ;;  %v6501_v56 = vor.u32 %v7360_v42, %v6500_v36  ;;  %v7384_v36 = vld [vmem:[%s7849_s27 + $0x2c] sm:$0xf0] }
  0xef   : > { %6624 = vmatmul.msk.bf16.gmra.mxu2 %vm660_vm2, %v6597_v30  ;;  %v1865_v14 = vrot.slane %v1864_v62, 4  ;;  %v2433_v30 = vshrl.u32 %v6700_v24, 16 }
  0xf0   : > { %v853_v7 = vpop.f32.mrf.mxu1 }
  0xf1   : > { %v854_v41 = vadd.f32 %v853_v7, %v716_v31  ;;  %v2436_v31 = vshll.u32 %v6700_v24, 16  ;;  %v1870_v27 = vsel %vm7885_vm3, %v1865_v14, %v1869_v15  ;;  %v2435_v13 = vrot.slane %v2433_v30, 4 }
  0xf2   : > { %v1239_v50 = vpop.f32.mrf.mxu2  ;;  %v1907_v42 = vunpack.c.l.b16 %v1870_v27  ;;  %v2447_v24 = vshrl.u32 %v6702_v10, 16 }
  0xf3   : > { %v8255_v54 = vadd.f32 %v1239_v50, %v852_v8  ;;  %v1879_v8 = vrot.slane %v1878_v3, 4  ;;  %v2438_v44 = vrot.slane %v2436_v31, 5  ;;  %v6656_v31 = vld [vmem:[%s7849_s27 + $0x38] sm:$0xf] }
  0xf4   : > { %v1398_v51 = vpop.f32.mrf.mxu3 }
  0xf5   : > { %v8258_v55 = vadd.f32 %v1398_v51, %v8150_v57  ;;  %v6698_v57 = vld [vmem:[%s7843_s24 + $0x8] sm:$0xf]  ;;  %v1884_v7 = vsel %vm7885_vm3, %v1879_v8, %v1883_v4 }
  0xf6   : > { %v719_v60 = vpop.f32.mrf.mxu0  ;;  %v2419_v22 = vshrl.u32 %v6698_v57, 16  ;;  %v2422_v25 = vshll.u32 %v6698_v57, 16  ;;  %v1908_v43 = vunpack.c.l.b16 %v1884_v7  ;;  %v6704_v57 = vld [vmem:[%s7843_s24 + $0x20] sm:$0xf]  ;;  %v2449_v7 = vrot.slane %v2447_v24, 4 }
  0xf8   : > { %v856_v5 = vpop.f32.mrf.mxu1  ;;  %v2421_v38 = vrot.slane %v2419_v22, 4  ;;  %v2424_v39 = vrot.slane %v2422_v25, 5  ;;  %v2461_v22 = vshrl.u32 %v6704_v57, 16  ;;  %v2464_v25 = vshll.u32 %v6704_v57, 16 }
  0xf9   : > { %v857_v9 = vadd.f32 %v856_v5, %v719_v60  ;;  %6528 = vmatmul.msk.bf16.gmra.mxu0 %vm660_vm2, %v6501_v56  ;;  %6691 = vmatmul.msk.bf16.gmra.mxu3 %vm660_vm2, %v6649_v59  ;;  %v1916_v59 = vpack.c.b16 %v1908_v43, %v1907_v42  ;;  %v2428_v60 = vshll.u32 %v6699_v58, 16  ;;  %v2442_v5 = vshll.u32 %v6701_v46, 16 }
  0xfa   : > { %v1241_v17 = vpop.f32.mrf.mxu2  ;;  %v2425_v53 = vor.u32 %v2424_v39, %v2421_v38  ;;  %v2466_v38 = vrot.slane %v2464_v25, 5 }
  0xfb   : > { %6552 = vmatmul.msk.bf16.gmra.mxu1 %vm660_vm2, %v1915_v61  ;;  %v8267_v20 = vadd.f32 %v1241_v17, %v854_v41  ;;  %v6652_v41 = vld [vmem:[%s7849_s27 + $0x28] sm:$0xf]  ;;  %v2439_v61 = vor.u32 %v2438_v44, %v2435_v13  ;;  %v2450_v17 = vshll.u32 %v6702_v10, 16 }
  0xfc   : > { %v1401_v18 = vpop.f32.mrf.mxu3  ;;  %v6653_v52 = vor.u32 %v7384_v36, %v6652_v41  ;;  %v2426_v3 = vrot.slane %v2425_v53, 4  ;;  %v6705_v41 = vld [vmem:[%s7843_s24 + $0x24] sm:$0x1] }
  0xfd   : > { %v8270_v21 = vadd.f32 %v1401_v18, %v8168_v23  ;;  %v6504_v23 = vld [vmem:[%s8087_s0 + $0x78] sm:$0xf]  ;;  %v2440_v6 = vrot.slane %v2439_v61, 4  ;;  %v6706_v61 = vld [vmem:[%s7843_s24 + $0x28] sm:$0xf] }
  0xfe   : > { %v721_v26 = vpop.f32.mrf.mxu0  ;;  %v6505_v49 = vor.u32 %v7361_v37, %v6504_v23  ;;  %v6703_v23 = vld [vmem:[%s7843_s24 + $0x1c] sm:$0x1]  ;;  %v2463_v37 = vrot.slane %v2461_v22, 4 }
  0xff   : > { %6625 = vmatmul.msk.bf16.gmra.mxu2 %vm660_vm2, %v6601_v19  ;;  %v2456_v46 = vshll.u32 %v6703_v23, 16 }
 0x100   : > { %v858_v32 = vpop.f32.mrf.mxu1 }
 0x101   : > { %v859_v33 = vadd.f32 %v858_v32, %v721_v26  ;;  %v7385_v32 = vld [vmem:[%s7849_s27 + $0x3c] sm:$0xf0] }
 0x102   : > { %v1244_v2 = vpop.f32.mrf.mxu2  ;;  %v6657_v42 = vor.u32 %v7385_v32, %v6656_v31 }
 0x103   : > { %v8283_v50 = vadd.f32 %v1244_v2, %v857_v9  ;;  %v2444_v9 = vrot.slane %v2442_v5, 5 }
 0x104   : > { %v1403_v48 = vpop.f32.mrf.mxu3 }
 0x105   : > { %v8286_v51 = vadd.f32 %v1403_v48, %v8184_v47  ;;  %v2430_v47 = vrot.slane %v2428_v60, 5  ;;  %v2467_v48 = vor.u32 %v2466_v38, %v2463_v37 }
 0x106   : > { %v724_v56 = vpop.f32.mrf.mxu0 }
 0x107   : > { %v2431_v19 = vsel %vm7885_vm3, %v2426_v3, %v2430_v47 }
 0x108   : > { %v861_v62 = vpop.f32.mrf.mxu1  ;;  %v2650_v27 = vunpack.c.l.b16 %v2431_v19 }
 0x109   : > { %v862_v1 = vadd.f32 %v861_v62, %v724_v56  ;;  %6529 = vmatmul.msk.bf16.gmra.mxu0 %vm660_vm2, %v6505_v49  ;;  %6692 = vmatmul.msk.bf16.gmra.mxu3 %vm660_vm2, %v6653_v52  ;;  %v2470_v49 = vshll.u32 %v6705_v41, 16  ;;  %v6708_v62 = vld [vmem:[%s7843_s24 + $0x30] sm:$0xf] }
 0x10a   : > { %v1246_v14 = vpop.f32.mrf.mxu2 }
 0x10b   : > { %6553 = vmatmul.msk.bf16.gmra.mxu1 %vm660_vm2, %v1916_v59  ;;  %v8293_v12 = vadd.f32 %v8182_v45, %v862_v1  ;;  %v8296_v8 = vadd.f32 %v1246_v14, %v859_v33  ;;  %v2445_v45 = vsel %vm7885_vm3, %v2440_v6, %v2444_v9  ;;  %v2452_v33 = vrot.slane %v2450_v17, 5 }
 0x10c   : > { %v1406_v15 = vpop.f32.mrf.mxu3  ;;  %v2458_v59 = vrot.slane %v2456_v46, 5  ;;  %v2472_v60 = vrot.slane %v2470_v49, 5  ;;  %v2475_v6 = vshrl.u32 %v6706_v61, 16  ;;  %v2478_v9 = vshll.u32 %v6706_v61, 16 }
 0x10d   : > { %v8299_v4 = vadd.f32 %v1406_v15, %v8199_v16  ;;  %v2651_v16 = vunpack.c.l.b16 %v2445_v45  ;;  %v2453_v58 = vor.u32 %v2452_v33, %v2449_v7  ;;  %v2489_v14 = vshrl.u32 %v6708_v62, 16  ;;  %v7386_v45 = vld [vmem:[%s7849_s27 + $0x54] sm:$0xf0] }
 0x10e   : > { %v726_v18 = vpop.f32.mrf.mxu0  ;;  %v2492_v15 = vshll.u32 %v6708_v62, 16  ;;  %v2477_v25 = vrot.slane %v2475_v6, 4 }
 0x10f   : > { %v2666_v44 = vpack.c.b16 %v2651_v16, %v2650_v27  ;;  %v2454_v56 = vrot.slane %v2453_v58, 4  ;;  %v2491_v31 = vrot.slane %v2489_v14, 4  ;;  %v6709_v16 = vld [vmem:[%s7843_s24 + $0x34] sm:$0x1]  ;;  %v7387_v14 = vld [vmem:[%s7849_s27 + $0x64] sm:$0xf0] }
 0x110   : > { %v863_v26 = vpop.f32.mrf.mxu1  ;;  %v2494_v32 = vrot.slane %v2492_v15, 5 }
 0x111   : > { %v864_v30 = vadd.f32 %v863_v26, %v726_v18  ;;  %v2459_v47 = vsel %vm7885_vm3, %v2454_v56, %v2458_v59  ;;  %v2480_v26 = vrot.slane %v2478_v9, 5 }
 0x112   : > { %v2152_v43 = vpop.f32.mrf.mxu2  ;;  %v2652_v18 = vunpack.c.l.b16 %v2459_v47 }
 0x113   : > { %v8309_v39 = vadd.f32 %v8197_v11, %v864_v30  ;;  %v6707_v30 = vld [vmem:[%s7843_s24 + $0x2c] sm:$0x1]  ;;  %v2481_v38 = vor.u32 %v2480_v26, %v2477_v25 }
 0x114   : > { %v1408_v36 = vpop.f32.mrf.mxu3  ;;  %v2484_v41 = vshll.u32 %v6707_v30, 16 }
 0x115   : > { %v8313_v13 = vadd.f32 %v1408_v36, %v8208_v34  ;;  %v2468_v34 = vrot.slane %v2467_v48, 4 }
 0x116   : > { %v1573_v2 = vpop.f32.mrf.mxu0  ;;  %v2486_v48 = vrot.slane %v2484_v41, 5 }
 0x117   : > { %v1613_v52 = vadd.f32 %v1573_v2, %v8242_v29  ;;  %v2473_v57 = vsel %vm7885_vm3, %v2468_v34, %v2472_v60  ;;  %v2482_v2 = vrot.slane %v2481_v38, 4 }
 0x118   : > { %v1974_v53 = vpop.f32.mrf.mxu1  ;;  %v2653_v22 = vunpack.c.l.b16 %v2473_v57 }
 0x119   : > { %v2014_v11 = vadd.f32 %v1974_v53, %v1613_v52  ;;  %6693 = vmatmul.msk.bf16.gmra.mxu3 %vm660_vm2, %v6657_v42  ;;  %6746 = vmatmul.msk.bf16.vlgmr.msra.gmra.mxu0 %vm660_vm2, %v2666_v44  ;;  %v2495_v42 = vor.u32 %v2494_v32, %v2491_v31  ;;  %v6710_v52 = vld [vmem:[%s7843_s24 + $0x38] sm:$0xf]  ;;  %v2487_v34 = vsel %vm7885_vm3, %v2482_v2, %v2486_v48 }
 0x11a   : > { %v2154_v3 = vpop.f32.mrf.mxu2  ;;  %v2503_v60 = vshrl.u32 %v6710_v52, 16  ;;  %v2506_v61 = vshll.u32 %v6710_v52, 16 }
 0x11b   : > { %v8319_v5 = vadd.f32 %v2152_v43, %v2014_v11  ;;  %v2498_v43 = vshll.u32 %v6709_v16, 16  ;;  %v6712_v11 = vld [vmem:[%s7843_s24 + $0x40] sm:$0xf] }
 0x11c   : > { %v1411_v1 = vpop.f32.mrf.mxu3  ;;  %v2520_v47 = vshll.u32 %v6712_v11, 16 }
 0x11d   : > { %v8323_v29 = vadd.f32 %v1411_v1, %v8227_v63  ;;  %v6660_v63 = vld [vmem:[%s7849_s27 + $0x50] sm:$0xf]  ;;  %v2500_v49 = vrot.slane %v2498_v43, 5 }
 0x11e   : > { %v1575_v10 = vpop.f32.mrf.mxu0  ;;  %v6661_v33 = vor.u32 %v7386_v45, %v6660_v63  ;;  %v2522_v63 = vrot.slane %v2520_v47, 5 }
 0x11f   : > { %v1614_v24 = vadd.f32 %v1575_v10, %v8258_v55  ;;  %v2667_v55 = vpack.c.b16 %v2653_v22, %v2652_v18  ;;  %v2654_v10 = vunpack.c.l.b16 %v2487_v34  ;;  %v6711_v18 = vld [vmem:[%s7843_s24 + $0x3c] sm:$0x1]  ;;  %v6713_v22 = vld [vmem:[%s7843_s24 + $0x44] sm:$0x1] }
 0x120   : > { %v1976_v17 = vpop.f32.mrf.mxu1  ;;  %v2512_v16 = vshll.u32 %v6711_v18, 16 }
 0x121   : > { %v2015_v19 = vadd.f32 %v1976_v17, %v1614_v24  ;;  %v2505_v24 = vrot.slane %v2503_v60, 4  ;;  %v2508_v17 = vrot.slane %v2506_v61, 5 }
 0x122   : > { %v2157_v23 = vpop.f32.mrf.mxu2 }
 0x123   : > { %v8333_v27 = vadd.f32 %v2154_v3, %v2015_v19  ;;  %v2517_v3 = vshrl.u32 %v6712_v11, 16  ;;  %v2509_v32 = vor.u32 %v2508_v17, %v2505_v24 }
 0x124   : > { %v1413_v7 = vpop.f32.mrf.mxu3 }
 0x125   : > { %v8337_v37 = vadd.f32 %v1413_v7, %v8239_v28  ;;  %v2496_v28 = vrot.slane %v2495_v42, 4  ;;  %v2519_v19 = vrot.slane %v2517_v3, 4  ;;  %v2514_v42 = vrot.slane %v2512_v16, 5  ;;  %v7388_v3 = vld [vmem:[%s7849_s27 + $0x74] sm:$0xf0] }
 0x126   : > { %v1578_v36 = vpop.f32.mrf.mxu0 }
 0x127   : > { %v1615_v44 = vadd.f32 %v1578_v36, %v8270_v21  ;;  %v2501_v1 = vsel %vm7885_vm3, %v2496_v28, %v2500_v49  ;;  %v2510_v36 = vrot.slane %v2509_v32, 4 }
 0x128   : > { %v1979_v58 = vpop.f32.mrf.mxu1  ;;  %v2655_v15 = vunpack.c.l.b16 %v2501_v1 }
 0x129   : > { %v2016_v46 = vadd.f32 %v1979_v58, %v1615_v44  ;;  %6694 = vmatmul.msk.bf16.gmra.mxu3 %vm660_vm2, %v6661_v33  ;;  %6747 = vmatmul.msk.bf16.gmra.mxu0 %vm660_vm2, %v2667_v55  ;;  %v2523_v33 = vor.u32 %v2522_v63, %v2519_v19  ;;  %v6714_v44 = vld [vmem:[%s7843_s24 + $0x50] sm:$0xf]  ;;  %v2515_v28 = vsel %vm7885_vm3, %v2510_v36, %v2514_v42 }
 0x12a   : > { %v2159_v59 = vpop.f32.mrf.mxu2  ;;  %v2531_v49 = vshrl.u32 %v6714_v44, 16  ;;  %v2534_v52 = vshll.u32 %v6714_v44, 16 }
 0x12b   : > { %v8343_v53 = vadd.f32 %v2157_v23, %v2016_v46  ;;  %v2526_v23 = vshll.u32 %v6713_v22, 16  ;;  %v6716_v46 = vld [vmem:[%s7843_s24 + $0x58] sm:$0xf] }
 0x12c   : > { %v1416_v56 = vpop.f32.mrf.mxu3  ;;  %v2548_v34 = vshll.u32 %v6716_v46, 16 }
 0x12d   : > { %v8347_v21 = vadd.f32 %v1416_v56, %v8255_v54  ;;  %v6664_v54 = vld [vmem:[%s7849_s27 + $0x60] sm:$0xf]  ;;  %v2528_v43 = vrot.slane %v2526_v23, 5 }
 0x12e   : > { %v1580_v62 = vpop.f32.mrf.mxu0  ;;  %v6665_v26 = vor.u32 %v7387_v14, %v6664_v54  ;;  %v2550_v54 = vrot.slane %v2548_v34, 5 }
 0x12f   : > { %v1616_v6 = vadd.f32 %v1580_v62, %v8286_v51  ;;  %v2668_v51 = vpack.c.b16 %v2655_v15, %v2654_v10  ;;  %v2656_v62 = vunpack.c.l.b16 %v2515_v28  ;;  %v6715_v10 = vld [vmem:[%s7843_s24 + $0x54] sm:$0x1]  ;;  %v6717_v15 = vld [vmem:[%s7843_s24 + $0x5c] sm:$0x1] }
 0x130   : > { %v1981_v9 = vpop.f32.mrf.mxu1  ;;  %v2540_v63 = vshll.u32 %v6715_v10, 16 }
 0x131   : > { %v2017_v57 = vadd.f32 %v1981_v9, %v1616_v6  ;;  %v2533_v6 = vrot.slane %v2531_v49, 4  ;;  %v2536_v9 = vrot.slane %v2534_v52, 5 }
 0x132   : > { %v2162_v30 = vpop.f32.mrf.mxu2 }
 0x133   : > { %v8357_v45 = vadd.f32 %v2159_v59, %v2017_v57  ;;  %v2545_v59 = vshrl.u32 %v6716_v46, 16  ;;  %v2537_v19 = vor.u32 %v2536_v9, %v2533_v6 }
 0x134   : > { %v1418_v25 = vpop.f32.mrf.mxu3 }
 0x135   : > { %v8361_v31 = vadd.f32 %v1418_v25, %v8267_v20  ;;  %v2524_v20 = vrot.slane %v2523_v33, 4  ;;  %v2547_v57 = vrot.slane %v2545_v59, 4  ;;  %v2542_v33 = vrot.slane %v2540_v63, 5 }
 0x136   : > { %v1583_v7 = vpop.f32.mrf.mxu0 }
 0x137   : > { %v1617_v55 = vadd.f32 %v1583_v7, %v8299_v4  ;;  %v2529_v56 = vsel %vm7885_vm3, %v2524_v20, %v2528_v43  ;;  %v2538_v7 = vrot.slane %v2537_v19, 4 }
 0x138   : > { %v1984_v38 = vpop.f32.mrf.mxu1  ;;  %v2657_v47 = vunpack.c.l.b16 %v2529_v56 }
 0x139   : > { %v2018_v41 = vadd.f32 %v1984_v38, %v1617_v55  ;;  %6695 = vmatmul.msk.bf16.gmra.mxu3 %vm660_vm2, %v6665_v26  ;;  %6748 = vmatmul.msk.bf16.gmra.mxu0 %vm660_vm2, %v2668_v51  ;;  %v2551_v26 = vor.u32 %v2550_v54, %v2547_v57  ;;  %v6720_v38 = vld [vmem:[%s7843_s24 + $0x68] sm:$0xf]  ;;  %v2543_v43 = vsel %vm7885_vm3, %v2538_v7, %v2542_v33 }
 0x13a   : > { %v2164_v48 = vpop.f32.mrf.mxu2  ;;  %v2573_v44 = vshrl.u32 %v6720_v38, 16  ;;  %v2576_v46 = vshll.u32 %v6720_v38, 16  ;;  %v2658_v56 = vunpack.c.l.b16 %v2543_v43 }
 0x13b   : > { %v8367_v58 = vadd.f32 %v2162_v30, %v2018_v41  ;;  %v2554_v30 = vshll.u32 %v6717_v15, 16  ;;  %v2552_v23 = vrot.slane %v2551_v26, 4  ;;  %v6722_v26 = vld [vmem:[%s7843_s24 + $0x70] sm:$0xf] }
 0x13c   : > { %v1421_v2 = vpop.f32.mrf.mxu3 }
 0x13d   : > { %v8371_v4 = vadd.f32 %v1421_v2, %v8283_v50  ;;  %v6668_v50 = vld [vmem:[%s7849_s27 + $0x70] sm:$0xf]  ;;  %v2556_v55 = vrot.slane %v2554_v30, 5  ;;  %v6724_v30 = vld [vmem:[%s7843_s24 + $0x78] sm:$0xf] }
 0x13e   : > { %v1585_v11 = vpop.f32.mrf.mxu0  ;;  %v6669_v17 = vor.u32 %v7388_v3, %v6668_v50  ;;  %v2578_v50 = vrot.slane %v2576_v46, 5  ;;  %v6721_v3 = vld [vmem:[%s7843_s24 + $0x6c] sm:$0x1]  ;;  %v2601_v33 = vshrl.u32 %v6724_v30, 16  ;;  %v6723_v46 = vld [vmem:[%s7843_s24 + $0x74] sm:$0x1] }
 0x13f   : > { %v1618_v60 = vadd.f32 %v1585_v11, %v8313_v13  ;;  %v2669_v13 = vpack.c.b16 %v2657_v47, %v2656_v62  ;;  %v6672_v11 = vld [vmem:[%s7849_s27 + $0x80] sm:$0xf]  ;;  %v6719_v62 = vld [vmem:[%s7843_s24 + $0x64] sm:$0x1] }
 0x140   : > { %v1986_v61 = vpop.f32.mrf.mxu1  ;;  %v2568_v10 = vshll.u32 %v6719_v62, 16  ;;  %v2603_v43 = vrot.slane %v2601_v33, 4  ;;  %v6726_v62 = vld [vmem:[%s7843_s24 + $0x80] sm:$0xf] }
 0x141   : > { %v2019_v1 = vadd.f32 %v1986_v61, %v1618_v60  ;;  %v7389_v60 = vld [vmem:[%s7849_s27 + $0x84] sm:$0xf0] }
 0x142   : > { %v2167_v25 = vpop.f32.mrf.mxu2  ;;  %v6673_v9 = vor.u32 %v7389_v60, %v6672_v11  ;;  %v2570_v63 = vrot.slane %v2568_v10, 5 }
 0x143   : > { %v8381_v14 = vadd.f32 %v2164_v48, %v2019_v1  ;;  %v2557_v48 = vsel %vm7885_vm3, %v2552_v23, %v2556_v55  ;;  %v2575_v1 = vrot.slane %v2573_v44, 4 }
 0x144   : > { %v1423_v24 = vpop.f32.mrf.mxu3  ;;  %v2659_v61 = vunpack.c.l.b16 %v2557_v48 }
 0x145   : > { %v8385_v18 = vadd.f32 %v1423_v24, %v8296_v8  ;;  %v6718_v8 = vld [vmem:[%s7843_s24 + $0x60] sm:$0xf]  ;;  %v2579_v15 = vor.u32 %v2578_v50, %v2575_v1  ;;  %v2582_v24 = vshll.u32 %v6721_v3, 16  ;;  %v6728_v1 = vld [vmem:[%s7843_s24 + $0x88] sm:$0xf] }
 0x146   : > { %v1588_v22 = vpop.f32.mrf.mxu0  ;;  %v2559_v42 = vshrl.u32 %v6718_v8, 16  ;;  %v2562_v20 = vshll.u32 %v6718_v8, 16  ;;  %v2670_v54 = vpack.c.b16 %v2659_v61, %v2658_v56  ;;  %v2604_v8 = vshll.u32 %v6724_v30, 16 }
 0x147   : > { %v1619_v51 = vadd.f32 %v1588_v22, %v8323_v29  ;;  %v2580_v22 = vrot.slane %v2579_v15, 4  ;;  %v2629_v10 = vshrl.u32 %v6728_v1, 16 }
 0x148   : > { %v1989_v32 = vpop.f32.mrf.mxu1  ;;  %v2561_v59 = vrot.slane %v2559_v42, 4  ;;  %v2606_v44 = vrot.slane %v2604_v8, 5 }
 0x149   : > { %v2020_v16 = vadd.f32 %v1989_v32, %v1619_v51  ;;  %6696 = vmatmul.msk.bf16.gmra.mxu3 %vm660_vm2, %v6669_v17  ;;  %6749 = vmatmul.msk.bf16.gmra.mxu0 %vm660_vm2, %v2669_v13  ;;  %v2587_v32 = vshrl.u32 %v6722_v26, 16 }
 0x14a   : > { %v2169_v52 = vpop.f32.mrf.mxu2  ;;  %v2607_v11 = vor.u32 %v2606_v44, %v2603_v43 }
 0x14b   : > { %v8392_v41 = vadd.f32 %v2167_v25, %v2020_v16  ;;  %v2584_v25 = vrot.slane %v2582_v24, 5  ;;  %v2590_v16 = vshll.u32 %v6722_v26, 16  ;;  %v2589_v42 = vrot.slane %v2587_v32, 4  ;;  %v6729_v26 = vld [vmem:[%s7843_s24 + $0x8c] sm:$0x1] }
 0x14c   : > { %v1426_v36 = vpop.f32.mrf.mxu3  ;;  %v2608_v60 = vrot.slane %v2607_v11, 4  ;;  %v2638_v8 = vshll.u32 %v6729_v26, 16 }
 0x14d   : > { %v8395_v29 = vadd.f32 %v1426_v36, %v8293_v12  ;;  %v2564_v12 = vrot.slane %v2562_v20, 5  ;;  %v2585_v7 = vsel %vm7885_vm3, %v2580_v22, %v2584_v25  ;;  %v2592_v20 = vrot.slane %v2590_v16, 5  ;;  %v6727_v25 = vld [vmem:[%s7843_s24 + $0x84] sm:$0x1] }
 0x14e   : > { %v1590_v2 = vpop.f32.mrf.mxu0  ;;  %v2661_v36 = vunpack.c.l.b16 %v2585_v7  ;;  %v2624_v7 = vshll.u32 %v6727_v25, 16 }
 0x14f   : > { %v1620_v28 = vadd.f32 %v1590_v2, %v8337_v37  ;;  %v2565_v37 = vor.u32 %v2564_v12, %v2561_v59  ;;  %v6725_v2 = vld [vmem:[%s7843_s24 + $0x7c] sm:$0x1] }
 0x150   : > { %v1991_v49 = vpop.f32.mrf.mxu1  ;;  %v2610_v56 = vshll.u32 %v6725_v2, 16 }
 0x151   : > { %v2021_v34 = vadd.f32 %v1991_v49, %v1620_v28  ;;  %v2566_v19 = vrot.slane %v2565_v37, 4  ;;  %v2593_v28 = vor.u32 %v2592_v20, %v2589_v42  ;;  %v2618_v37 = vshll.u32 %v6726_v62, 16 }
 0x152   : > { %v2612_v61 = vrot.slane %v2610_v56, 5  ;;  %v2640_v42 = vrot.slane %v2638_v8, 5  ;;  %v2172_v8 = vpop.f32.mrf.mxu2 }
 0x153   : > { %v8406_v47 = vadd.f32 %v2169_v52, %v2021_v34  ;;  %v2596_v52 = vshll.u32 %v6723_v46, 16  ;;  %v2594_v12 = vrot.slane %v2593_v28, 4 }
 0x154   : > { %v1428_v6 = vpop.f32.mrf.mxu3 }
 0x155   : > { %v8409_v57 = vadd.f32 %v1428_v6, %v8309_v39  ;;  %v2571_v39 = vsel %vm7885_vm3, %v2566_v19, %v2570_v63  ;;  %v2598_v34 = vrot.slane %v2596_v52, 5  ;;  %v2620_v63 = vrot.slane %v2618_v37, 5 }
 0x156   : > { %v1593_v17 = vpop.f32.mrf.mxu0  ;;  %v2660_v38 = vunpack.c.l.b16 %v2571_v39 }
 0x157   : > { %v8412_v13 = vadd.f32 %v1593_v17, %v8347_v21 }
 0x158   : > { %v2671_v48 = vpack.c.b16 %v2661_v36, %v2660_v38  ;;  %v2626_v38 = vrot.slane %v2624_v7, 5 }
 0x159   : > { %6697 = vmatmul.msk.bf16.gmra.mxu3 %vm660_vm2, %v6673_v9  ;;  %6750 = vmatmul.msk.bf16.gmra.mxu0 %vm660_vm2, %v2670_v54  ;;  %v2615_v9 = vshrl.u32 %v6726_v62, 16  ;;  %v2632_v54 = vshll.u32 %v6728_v1, 16 }
 0x15b   : > { %v2617_v19 = vrot.slane %v2615_v9, 4  ;;  %v2634_v22 = vrot.slane %v2632_v54, 5 }
 0x15c   : > { %v1431_v51 = vpop.f32.mrf.mxu3 }
 0x15d   : > { %v8421_v21 = vadd.f32 %v1431_v51, %v8211_v35  ;;  %v2621_v16 = vor.u32 %v2620_v63, %v2617_v19 }
 0x15e   : > { %v1595_v23 = vpop.f32.mrf.mxu0 }
 0x15f   : > { %v8426_v55 = vadd.f32 %v1595_v23, %v8361_v31  ;;  %v2622_v23 = vrot.slane %v2621_v16, 4 }
 0x164   : > { %v1433_v35 = vpop.f32.mrf.mxu3 }
 0x165   : > { %v1451_v49 = vadd.f32 %v1433_v35, %v8230_v0  ;;  %v2599_v0 = vsel %vm7885_vm3, %v2594_v12, %v2598_v34 }
 0x166   : > { %v1598_v31 = vpop.f32.mrf.mxu0  ;;  %v2662_v24 = vunpack.c.l.b16 %v2599_v0 }
 0x167   : > { %v8432_v59 = vadd.f32 %v1598_v31, %v8371_v4  ;;  %v2613_v4 = vsel %vm7885_vm3, %v2608_v60, %v2612_v61 }
 0x168   : > { %v2663_v17 = vunpack.c.l.b16 %v2613_v4 }
 0x169   : > { %6751 = vmatmul.msk.bf16.gmra.mxu0 %vm660_vm2, %v2671_v48 }
 0x16a   : > { %v2672_v39 = vpack.c.b16 %v2663_v17, %v2662_v24 }
 0x16c   : > { %v2330_v50 = vpop.f32.mrf.mxu3 }
 0x16d   : > { %v2370_v3 = vadd.f32 %v2330_v50, %v8319_v5  ;;  %v2631_v5 = vrot.slane %v2629_v10, 4 }
 0x16e   : > { %v1600_v6 = vpop.f32.mrf.mxu0 }
 0x16f   : > { %v8443_v15 = vadd.f32 %v1600_v6, %v8385_v18  ;;  %v2635_v33 = vor.u32 %v2634_v22, %v2631_v5 }
 0x171   : > { %v2636_v36 = vrot.slane %v2635_v33, 4 }
 0x173   : > { %v2641_v46 = vsel %vm7885_vm3, %v2636_v36, %v2640_v42 }
 0x174   : > { %v2332_v30 = vpop.f32.mrf.mxu3  ;;  %v2665_v35 = vunpack.c.l.b16 %v2641_v46  ;;  %v2174_v46 = vpop.f32.mrf.mxu2 }
 0x175   : > { %v2371_v51 = vadd.f32 %v2332_v30, %v8333_v27  ;;  %v2627_v27 = vsel %vm7885_vm3, %v2622_v23, %v2626_v38 }
 0x176   : > { %v1603_v32 = vpop.f32.mrf.mxu0 }
 0x177   : > { %v8449_v18 = vadd.f32 %v1603_v32, %v8395_v29  ;;  %v2664_v29 = vunpack.c.l.b16 %v2627_v27  ;;  %v1994_v32 = vpop.f32.mrf.mxu1 }
 0x179   : > { %6752 = vmatmul.msk.bf16.gmra.mxu0 %vm660_vm2, %v2672_v39  ;;  %v2673_v52 = vpack.c.b16 %v2665_v35, %v2664_v29 }
 0x17c   : > { %v2335_v20 = vpop.f32.mrf.mxu3 }
 0x17d   : > { %v2372_v43 = vadd.f32 %v2335_v20, %v8343_v53 }
 0x17e   : > { %v1605_v44 = vpop.f32.mrf.mxu0 }
 0x17f   : > { %v8458_v2 = vadd.f32 %v1605_v44, %v8409_v57 }
 0x184   : > { %v2337_v48 = vpop.f32.mrf.mxu3 }
 0x185   : > { %v2373_v28 = vadd.f32 %v2337_v48, %v8357_v45  ;;  %v8472_v45 = vld [vmem:[%s9565_s5] ss:$0 sm:$0xff] }
 0x186   : > { %v1608_v11 = vpop.f32.mrf.mxu0 }
 0x187   : > { %v8462_v56 = vadd.f32 %v1608_v11, %v8421_v21 }
 0x189   : > { %6753 = vmatmul.msk.bf16.gmra.mxu0 %vm660_vm2, %v2673_v52 }
 0x18c   : > { %v2340_v53 = vpop.f32.mrf.mxu3 }
 0x18d   : > { %v2374_v31 = vadd.f32 %v2340_v53, %v8367_v58 }
 0x18e   : > { %v1610_v12 = vpop.f32.mrf.mxu0 }
 0x18f   : > { %v8466_v34 = vadd.f32 %v1610_v12, %v1451_v49 }
 0x194   : > { %v2342_v57 = vpop.f32.mrf.mxu3 }
 0x195   : > { %v2375_v60 = vadd.f32 %v2342_v57, %v8381_v14 }
 0x196   : > { %v2731_v61 = vpop.f32.mrf.mxu0 }
 0x197   : > { %v2771_v62 = vadd.f32 %v2731_v61, %v2370_v3  ;;  %v2177_v61 = vpop.f32.mrf.mxu2 }
 0x199   : > { %v2791_v21 = vadd.f32 %v8472_v45, %v2771_v62 }
 0x19b   : > { %v2807_v1 = vmax.f32 %v2791_v21, 0.0 }
 0x19c   : > { %v2345_v50 = vpop.f32.mrf.mxu3 }
 0x19d   : > { %v8475_v0 = vpack.c.bf16 %v2807_v1, %v2807_v1  ;;  %v2376_v58 = vadd.f32 %v2345_v50, %v8392_v41 }
 0x19e   : > { %v2733_v49 = vpop.f32.mrf.mxu0 }
 0x19f   : > { %v2772_v4 = vadd.f32 %v2733_v49, %v2371_v51 }
 0x1a1   : > { %v2792_v6 = vadd.f32 %v8472_v45, %v2772_v4 }
 0x1a3   : > { %v2808_v14 = vmax.f32 %v2792_v6, 0.0 }
 0x1a4   : > { %v2347_v9 = vpop.f32.mrf.mxu3 }
 0x1a5   : > { %v8479_v37 = vpack.c.bf16 %v2808_v14, %v2808_v14  ;;  %v2377_v10 = vadd.f32 %v2347_v9, %v8406_v47 }
 0x1a6   : > { %v2736_v54 = vpop.f32.mrf.mxu0 }
 0x1a7   : > { %v2773_v3 = vadd.f32 %v2736_v54, %v2372_v43  ;;  %v1996_v43 = vpop.f32.mrf.mxu1 }
 0x1a8   : > { %v2023_v21 = vadd.f32 %v1996_v43, %v8426_v55 }
 0x1a9   : > { %v2793_v24 = vadd.f32 %v8472_v45, %v2773_v3  ;;  %v2179_v3 = vpop.f32.mrf.mxu2 }
 0x1aa   : > { %v2201_v49 = vadd.f32 %v2174_v46, %v2023_v21 }
 0x1ab   : > { %v2809_v17 = vmax.f32 %v2793_v24, 0.0 }
 0x1ac   : > { %v2350_v38 = vpop.f32.mrf.mxu3 }
 0x1ad   : > { %v8483_v19 = vpack.c.bf16 %v2809_v17, %v2809_v17 }
 0x1ae   : > { %v2738_v63 = vpop.f32.mrf.mxu0 }
 0x1af   : > { %v2774_v5 = vadd.f32 %v2738_v63, %v2373_v28  ;;  %v2022_v28 = vadd.f32 %v1994_v32, %v8412_v13  ;;  %v1999_v53 = vpop.f32.mrf.mxu1 }
 0x1b1   : > { %v2794_v41 = vadd.f32 %v8472_v45, %v2774_v5  ;;  %v2182_v32 = vpop.f32.mrf.mxu2 }
 0x1b3   : > { %v2810_v22 = vmax.f32 %v2794_v41, 0.0 }
 0x1b4   : > { %v2352_v35 = vpop.f32.mrf.mxu3 }
 0x1b5   : > { %v8486_v25 = vpack.c.bf16 %v2810_v22, %v2810_v22  ;;  %v2379_v6 = vadd.f32 %v2352_v35, %v2201_v49 }
 0x1b6   : > { %v2741_v26 = vpop.f32.mrf.mxu0 }
 0x1b7   : > { %v2775_v30 = vadd.f32 %v2741_v26, %v2374_v31  ;;  %v2200_v31 = vadd.f32 %v2172_v8, %v2022_v28  ;;  %v2001_v13 = vpop.f32.mrf.mxu1 }
 0x1b9   : > { %v2795_v51 = vadd.f32 %v8472_v45, %v2775_v30  ;;  %v2378_v57 = vadd.f32 %v2350_v38, %v2200_v31  ;;  %v2025_v30 = vadd.f32 %v2001_v13, %v8443_v15  ;;  %v2184_v15 = vpop.f32.mrf.mxu2 }
 0x1bb   : > { %v2811_v39 = vmax.f32 %v2795_v51, 0.0 }
 0x1bc   : > { %v2355_v50 = vpop.f32.mrf.mxu3 }
 0x1bd   : > { %v8489_v47 = vpack.c.bf16 %v2811_v39, %v2811_v39 }
 0x1be   : > { %v2743_v16 = vpop.f32.mrf.mxu0 }
 0x1bf   : > { %v2776_v7 = vadd.f32 %v2743_v16, %v2375_v60  ;;  %v2004_v22 = vpop.f32.mrf.mxu1  ;;  %v2203_v16 = vadd.f32 %v2179_v3, %v2025_v30 }
 0x1c0   : > { %v2026_v38 = vadd.f32 %v2004_v22, %v8449_v18 }
 0x1c1   : > { %v2796_v33 = vadd.f32 %v8472_v45, %v2776_v7 }
 0x1c3   : > { %v2812_v23 = vmax.f32 %v2796_v33, 0.0 }
 0x1c4   : > { %v2357_v17 = vpop.f32.mrf.mxu3 }
 0x1c5   : > { %v8492_v36 = vpack.c.bf16 %v2812_v23, %v2812_v23  ;;  %v2381_v33 = vadd.f32 %v2357_v17, %v2203_v16 }
 0x1c6   : > { %v2746_v42 = vpop.f32.mrf.mxu0 }
 0x1c7   : > { %v2777_v20 = vadd.f32 %v2746_v42, %v2376_v58 }
 0x1c9   : > { %v2797_v44 = vadd.f32 %v8472_v45, %v2777_v20  ;;  %v2006_v20 = vpop.f32.mrf.mxu1 }
 0x1cb   : > { %v2813_v27 = vmax.f32 %v2797_v44, 0.0  ;;  %v2204_v44 = vadd.f32 %v2182_v32, %v2026_v38 }
 0x1cc   : > { %v2360_v7 = vpop.f32.mrf.mxu3 }
 0x1cd   : > { %v8495_v29 = vpack.c.bf16 %v2813_v27, %v2813_v27  ;;  %v2382_v46 = vadd.f32 %v2360_v7, %v2204_v44 }
 0x1ce   : > { %v2748_v48 = vpop.f32.mrf.mxu0 }
 0x1cf   : > { %v2778_v52 = vadd.f32 %v2748_v48, %v2377_v10  ;;  %v2024_v10 = vadd.f32 %v1999_v53, %v8432_v59 }
 0x1d1   : > { %v2798_v11 = vadd.f32 %v8472_v45, %v2778_v52  ;;  %v2202_v63 = vadd.f32 %v2177_v61, %v2024_v10  ;;  %v2027_v52 = vadd.f32 %v2006_v20, %v8458_v2  ;;  %v2009_v31 = vpop.f32.mrf.mxu1 }
 0x1d3   : > { %v2814_v12 = vmax.f32 %v2798_v11, 0.0  ;;  %v2380_v5 = vadd.f32 %v2355_v50, %v2202_v63 }
 0x1d4   : > { %v2362_v48 = vpop.f32.mrf.mxu3 }
 0x1d5   : > { %v8499_v60 = vpack.c.bf16 %v2814_v12, %v2814_v12  ;;  %v2205_v12 = vadd.f32 %v2184_v15, %v2027_v52 }
 0x1d6   : > { %v2751_v62 = vpop.f32.mrf.mxu0 }
 0x1d7   : > { %v2779_v1 = vadd.f32 %v2751_v62, %v2378_v57  ;;  %v2383_v57 = vadd.f32 %v2362_v48, %v2205_v12  ;;  %v2187_v62 = vpop.f32.mrf.mxu2 }
 0x1d9   : > { %v2799_v58 = vadd.f32 %v8472_v45, %v2779_v1  ;;  %v2028_v1 = vadd.f32 %v2009_v31, %v8462_v56  ;;  %v2011_v2 = vpop.f32.mrf.mxu1 }
 0x1db   : > { %v2815_v4 = vmax.f32 %v2799_v58, 0.0 }
 0x1dc   : > { %v2365_v58 = vpop.f32.mrf.mxu3 }
 0x1dd   : > { %v8503_v14 = vpack.c.bf16 %v2815_v4, %v2815_v4  ;;  %v2206_v4 = vadd.f32 %v2187_v62, %v2028_v1 }
 0x1de   : > { %v2753_v9 = vpop.f32.mrf.mxu0 }
 0x1df   : > { %v2780_v54 = vadd.f32 %v2753_v9, %v2379_v6  ;;  %v2384_v6 = vadd.f32 %v2365_v58, %v2206_v4 }
 0x1e1   : > { %v2800_v24 = vadd.f32 %v8472_v45, %v2780_v54  ;;  %v2029_v54 = vadd.f32 %v2011_v2, %v8466_v34 }
 0x1e3   : > { %v2816_v55 = vmax.f32 %v2800_v24, 0.0  ;;  %v2189_v24 = vpop.f32.mrf.mxu2 }
 0x1e4   : > { %v2367_v63 = vpop.f32.mrf.mxu3  ;;  %v2207_v56 = vadd.f32 %v2189_v24, %v2029_v54 }
 0x1e5   : > { %v8507_v41 = vpack.c.bf16 %v2816_v55, %v2816_v55 }
 0x1e6   : > { %v2756_v26 = vpop.f32.mrf.mxu0 }
 0x1e7   : > { %v2781_v51 = vadd.f32 %v2756_v26, %v2380_v5  ;;  %v2385_v5 = vadd.f32 %v2367_v63, %v2207_v56 }
 0x1e9   : > { %v2801_v39 = vadd.f32 %v8472_v45, %v2781_v51 }
 0x1eb   : > { %v2817_v59 = vmax.f32 %v2801_v39, 0.0 }
 0x1ed   : > { %v8511_v8 = vpack.c.bf16 %v2817_v59, %v2817_v59 }
 0x1ee   : > { %v2758_v23 = vpop.f32.mrf.mxu0 }
 0x1ef   : > { %v2782_v42 = vadd.f32 %v2758_v23, %v2381_v33 }
 0x1f1   : > { %v2802_v43 = vadd.f32 %v8472_v45, %v2782_v42 }
 0x1f3   : > { %v2818_v27 = vmax.f32 %v2802_v43, 0.0 }
 0x1f5   : > { %v8515_v35 = vpack.c.bf16 %v2818_v27, %v2818_v27 }
 0x1f6   : > { %v2761_v28 = vpop.f32.mrf.mxu0 }
 0x1f7   : > { %v2783_v11 = vadd.f32 %v2761_v28, %v2382_v46 }
 0x1f9   : > { %v2803_v53 = vadd.f32 %v8472_v45, %v2783_v11 }
 0x1fb   : > { %v2819_v18 = vmax.f32 %v2803_v53, 0.0 }
 0x1fd   : > { %v8519_v61 = vpack.c.bf16 %v2819_v18, %v2819_v18 }
 0x1fe   : > { %v2763_v21 = vpop.f32.mrf.mxu0 }
 0x1ff   : > { %v2784_v50 = vadd.f32 %v2763_v21, %v2383_v57 }
 0x201   : > { %v2804_v49 = vadd.f32 %v8472_v45, %v2784_v50 }
 0x203   : > { %v2820_v13 = vmax.f32 %v2804_v49, 0.0 }
 0x205   : > { %v8523_v9 = vpack.c.bf16 %v2820_v13, %v2820_v13 }
 0x206   : > { %v2766_v10 = vpop.f32.mrf.mxu0 }
 0x207   : > { %v2785_v3 = vadd.f32 %v2766_v10, %v2384_v6 }
 0x209   : > { %v2805_v17 = vadd.f32 %v8472_v45, %v2785_v3 }
 0x20b   : > { %v2821_v55 = vmax.f32 %v2805_v17, 0.0 }
 0x20d   : > { %v8527_v22 = vpack.c.bf16 %v2821_v55, %v2821_v55 }
 0x20e   : > { %v2768_v26 = vpop.f32.mrf.mxu0 }
 0x20f   : > { %v2786_v30 = vadd.f32 %v2768_v26, %v2385_v5 }
 0x211   : > { %v2806_v51 = vadd.f32 %v8472_v45, %v2786_v30  ;;  %2842 = sbr.rel (%p6754_p11) target bundleno = 575 (0x23f), region = 80 }
 0x213   : > { %v2822_v39 = vmax.f32 %v2806_v51, 0.0 }
 0x215   : > { %v8530_v32 = vpack.c.bf16 %v2822_v39, %v2822_v39 }
 0x216   : > { %v7661_v34 = vmov 0  }
 0x217   : > { %2843 = vst [vmem:[#allocation2] sm:$0xf] %v7661_v34 }
 0x218   : > { %2844 = vst [vmem:[#allocation2 + $0x4] sm:$0xf] %v7661_v34 }
 0x219   : > { %2845 = vst [vmem:[#allocation2 + $0x8] sm:$0xf] %v7661_v34 }
 0x21a   : > { %2846 = vst [vmem:[#allocation2 + $0xc] sm:$0xf] %v7661_v34 }
 0x21b   : > { %2847 = vst [vmem:[#allocation2 + $0x10] sm:$0xf] %v7661_v34 }
 0x21c   : > { %2848 = vst [vmem:[#allocation2 + $0x14] sm:$0xf] %v7661_v34 }
 0x21d   : > { %2849 = vst [vmem:[#allocation2 + $0x18] sm:$0xf] %v7661_v34 }
 0x21e   : > { %2850 = vst [vmem:[#allocation2 + $0x1c] sm:$0xf] %v7661_v34 }
 0x21f   : > { %2851 = vst [vmem:[#allocation2 + $0x20] sm:$0xf] %v7661_v34 }
 0x220   : > { %2852 = vst [vmem:[#allocation2 + $0x24] sm:$0xf] %v7661_v34 }
 0x221   : > { %2853 = vst [vmem:[#allocation2 + $0x28] sm:$0xf] %v7661_v34 }
 0x222   : > { %2854 = vst [vmem:[#allocation2 + $0x2c] sm:$0xf] %v7661_v34 }
 0x223   : > { %2855 = vst [vmem:[#allocation2 + $0x30] sm:$0xf] %v7661_v34 }
 0x224   : > { %2856 = vst [vmem:[#allocation2 + $0x34] sm:$0xf] %v7661_v34 }
 0x225   : > { %2857 = vst [vmem:[#allocation2 + $0x38] sm:$0xf] %v7661_v34 }
 0x226   : > { %2858 = vst [vmem:[#allocation2 + $0x3c] sm:$0xf] %v7661_v34 }
 0x227   : > { %2859 = vst [vmem:[#allocation2 + $0x40] sm:$0xf] %v7661_v34 }
 0x228   : > { %2860 = vst [vmem:[#allocation2 + $0x44] sm:$0xf] %v7661_v34 }
 0x229   : > { %2861 = vst [vmem:[#allocation2 + $0x48] sm:$0xf] %v7661_v34 }
 0x22a   : > { %2862 = vst [vmem:[#allocation2 + $0x4c] sm:$0xf] %v7661_v34 }
 0x22b   : > { %2863 = vst [vmem:[#allocation2 + $0x50] sm:$0xf] %v7661_v34 }
 0x22c   : > { %2864 = vst [vmem:[#allocation2 + $0x54] sm:$0xf] %v7661_v34 }
 0x22d   : > { %2865 = vst [vmem:[#allocation2 + $0x58] sm:$0xf] %v7661_v34 }
 0x22e   : > { %2866 = vst [vmem:[#allocation2 + $0x5c] sm:$0xf] %v7661_v34 }
 0x22f   : > { %2867 = vst [vmem:[#allocation2 + $0x60] sm:$0xf] %v7661_v34 }
 0x230   : > { %2868 = vst [vmem:[#allocation2 + $0x64] sm:$0xf] %v7661_v34 }
 0x231   : > { %2869 = vst [vmem:[#allocation2 + $0x68] sm:$0xf] %v7661_v34 }
 0x232   : > { %2870 = vst [vmem:[#allocation2 + $0x6c] sm:$0xf] %v7661_v34 }
 0x233   : > { %2871 = vst [vmem:[#allocation2 + $0x70] sm:$0xf] %v7661_v34 }
 0x234   : > { %2872 = vst [vmem:[#allocation2 + $0x74] sm:$0xf] %v7661_v34 }
 0x235   : > { %2873 = vst [vmem:[#allocation2 + $0x78] sm:$0xf] %v7661_v34 }
 0x236   : > { %2874 = vst [vmem:[#allocation2 + $0x7c] sm:$0xf] %v7661_v34 }
 0x237   : > { %2875 = vst [vmem:[#allocation2 + $0x80] sm:$0xf] %v7661_v34 }
 0x238   : > { %2876 = vst [vmem:[#allocation2 + $0x84] sm:$0xf] %v7661_v34 }
 0x239   : > { %2877 = vst [vmem:[#allocation2 + $0x88] sm:$0xf] %v7661_v34 }
 0x23a   : > { %2878 = vst [vmem:[#allocation2 + $0x8c] sm:$0xf] %v7661_v34 }
 0x23b   : > { %2879 = vst [vmem:[#allocation2 + $0x90] sm:$0xf] %v7661_v34 }
 0x23c   : > { %2880 = vst [vmem:[#allocation2 + $0x94] sm:$0xf] %v7661_v34 }
 0x23d   : > { %2881 = vst [vmem:[#allocation2 + $0x98] sm:$0xf] %v7661_v34 }
 0x23e   : > { %2882 = vst [vmem:[#allocation2 + $0x9c] sm:$0xf] %v7661_v34 }
 0x23f PF: > { %v7437_v45 = vld [vmem:[%s9566_s6 + $0xb8] sm:$0xff]  ;;  %v2884_v7 = vshrl.u32 %v8475_v0, 16  ;;  %v7436_v33 = vld [vmem:[%s9566_s6 + $0xb0] sm:$0xff]  ;;  %v2887_v43 = vshll.u32 %v8475_v0, 16  ;;  %v2892_v44 = vshrl.u32 %v8479_v37, 16  ;;  %v2900_v15 = vshrl.u32 %v8483_v19, 16 }
 0x240   : > { %v7445_v16 = vld [vmem:[%s9566_s6 + $0xf8] sm:$0xff]  ;;  %3853 = vmatpush.bf16.msra.mxu1 %v7437_v45  ;;  %v7444_v23 = vld [vmem:[%s9566_s6 + $0xf0] sm:$0xff]  ;;  %v2895_v48 = vshll.u32 %v8479_v37, 16  ;;  %v7435_v28 = vld [vmem:[%s9566_s6 + $0xa8] sm:$0xff]  ;;  %vm3044_vm4 = vcmask 1043456   ;;  %vm3050_vm6 = vcmask 1040384  }
 0x241   : > { %v7413_v59 = vld [vmem:[%s9566_s6 + $0x38] sm:$0xff]  ;;  %3902 = vmatpush.bf16.msra.mxu2 %v7445_v16  ;;  %v7412_v42 = vld [vmem:[%s9566_s6 + $0x30] sm:$0xff]  ;;  %v2886_v20 = vrot.slane %v2884_v7, 7  ;;  %v8564_v46 = vrot.slane %v2892_v44, 7  ;;  %v7443_v0 = vld [vmem:[%s9566_s6 + $0xe8] sm:$0xff]  ;;  %v2908_v37 = vshrl.u32 %v8486_v25, 16 }
 0x242   : > { %v7421_v38 = vld [vmem:[%s9566_s6 + $0x78] sm:$0xff]  ;;  %4047 = vmatpush.bf16.msrb.mxu3 %v7413_v59  ;;  %v7420_v27 = vld [vmem:[%s9566_s6 + $0x70] sm:$0xff]  ;;  %v7411_v52 = vld [vmem:[%s9566_s6 + $0x28] sm:$0xff]  ;;  %vm3045_vm5 = vsmask.f32 7938  ;;  %v8580_v12 = vrot.slane %v2900_v15, 7 }
 0x243   : > { %4096 = vmatpush.bf16.msrb.mxu0 %v7421_v38  ;;  %v2889_v11 = vor.u32 %v2887_v43, %v2886_v20  ;;  %v7419_v53 = vld [vmem:[%s9566_s6 + $0x68] sm:$0xff]  ;;  %v2890_v31 = vrot.slane %v2886_v20, 4  ;;  %vm3051_vm7 = vsmask.f32 256  ;;  %v2903_v18 = vshll.u32 %v8483_v19, 16  ;;  %v7434_v57 = vld [vmem:[%s9566_s6 + $0xa0] sm:$0xff]  ;;  %vm8591_vm8 = vmand %vm3044_vm4, %vm3045_vm5 }
 0x244   : > { %3854 = vmatpush.bf16.msra.mxu1 %v7436_v33  ;;  %v7442_v62 = vld [vmem:[%s9566_s6 + $0xe0] sm:$0xff]  ;;  %v2897_v21 = vor.u32 %v2895_v48, %v8564_v46  ;;  %v3047_v50 = vld [vmem:[#allocation2 + $0x8] sm:$0xf]  ;;  %v3053_v58 = vld [vmem:[#allocation2 + $0xc] sm:$0x1]  ;;  %vm3562_vm9 = vcmask 1042432  }
 0x245   : > { %3903 = vmatpush.bf16.msra.mxu2 %v7444_v23  ;;  %v7410_v19 = vld [vmem:[%s9566_s6 + $0x20] sm:$0xff]  ;;  %v3048_v4 = vsel %vm8591_vm8, %v2889_v11, %v3047_v50  ;;  %vm8605_vm10 = vmand %vm3050_vm6, %vm3051_vm7  ;;  %vm3563_vm11 = vcmask 1046532   ;;  %v8609_v2 = vrot.slane %v2908_v37, 7  ;;  %v2911_v6 = vshll.u32 %v8486_v25, 16  ;;  %v7433_v10 = vld [vmem:[%s9566_s6 + $0x98] sm:$0xff]  ;;  %s7523_s20 = sshll.u32 %s7761_s17, 7 }
 0x246   : > { %4048 = vmatpush.bf16.msrb.mxu3 %v7412_v42  ;;  %v7418_v49 = vld [vmem:[%s9566_s6 + $0x60] sm:$0xff]  ;;  %v7441_v54 = vld [vmem:[%s9566_s6 + $0xd8] sm:$0xff]  ;;  %3049 = vst [vmem:[#allocation2 + $0x8] sm:$0xf] %v3048_v4  ;;  %v3054_v3 = vsel %vm8605_vm10, %v2890_v31, %v3053_v58  ;;  %v2898_v24 = vrot.slane %v8564_v46, 4  ;;  %v2905_v63 = vor.u32 %v2903_v18, %v8580_v12  ;;  %v2906_v25 = vrot.slane %v8580_v12, 4  ;;  %vm8639_vm12 = vmor %vm3562_vm9, %vm3563_vm11  ;;  %s6167_s1 = scalar_lea.hbm %s9574_s14, %s7523_s20 }
 0x247   : > { %4097 = vmatpush.bf16.msrb.mxu0 %v7420_v27  ;;  %v3056_v17 = vld [vmem:[#allocation2 + $0x10] sm:$0xf]  ;;  %v7409_v56 = vld [vmem:[%s9566_s6 + $0x18] sm:$0xff]  ;;  %3055 = vst [vmem:[#allocation2 + $0xc] sm:$0x1] %v3054_v3  ;;  %v2916_v39 = vshrl.u32 %v8489_v47, 16  ;;  %v2913_v7 = vor.u32 %v2911_v6, %v8609_v2 }
 0x248   : > { %3855 = vmatpush.bf16.msra.mxu1 %v7435_v28  ;;  %v3162_v55 = vld [vmem:[#allocation2 + $0x4] sm:$0x1]  ;;  %v3514_v5 = vld [vmem:[#allocation2] sm:$0xe]  ;;  %v3057_v26 = vsel %vm8591_vm8, %v2897_v21, %v3056_v17  ;;  %v3059_v16 = vld [vmem:[#allocation2 + $0x14] sm:$0x1] }
 0x249   : > { %3904 = vmatpush.bf16.msra.mxu2 %v7443_v0  ;;  %3058 = vst [vmem:[#allocation2 + $0x10] sm:$0xf] %v3057_v26  ;;  %v3146_v30 = vld [vmem:[#allocation2] sm:$0xf]  ;;  %v3188_v51 = vshll.u32 %v3162_v55, 16  ;;  %v7417_v33 = vld [vmem:[%s9566_s6 + $0x58] sm:$0xff]  ;;  %v3060_v42 = vsel %vm8605_vm10, %v2898_v24, %v3059_v16 }
 0x24a   : > { %4049 = vmatpush.bf16.msrb.mxu3 %v7411_v52  ;;  %v3179_v34 = vshrl.u32 %v3146_v30, 16  ;;  %v3182_v45 = vshll.u32 %v3146_v30, 16  ;;  %v3062_v59 = vld [vmem:[#allocation2 + $0x18] sm:$0xf]  ;;  %v6787_v23 = vrot.slane %v3514_v5, 9  ;;  %v3567_v38 = vrot.slane %v3162_v55, 5 }
 0x24b   : > { %4098 = vmatpush.bf16.msrb.mxu0 %v7419_v53  ;;  %v3063_v20 = vsel %vm8591_vm8, %v2905_v63, %v3062_v59  ;;  %v3065_v43 = vld [vmem:[#allocation2 + $0x1c] sm:$0x1]  ;;  %3061 = vst [vmem:[#allocation2 + $0x14] sm:$0x1] %v3060_v42  ;;  %v3068_v46 = vld [vmem:[#allocation2 + $0x20] sm:$0xf] }
 0x24c   : > { %3856 = vmatpush.bf16.msra.mxu1 %v7434_v57  ;;  %v3181_v27 = vrot.slane %v3179_v34, 4  ;;  %v3184_v15 = vrot.slane %v3182_v45, 5  ;;  %v7432_v48 = vld [vmem:[%s9566_s6 + $0x90] sm:$0xff]  ;;  %v8649_v0 = vrot.slane %v3188_v51, 5  ;;  %3064 = vst [vmem:[#allocation2 + $0x18] sm:$0xf] %v3063_v20  ;;  %v3066_v31 = vsel %vm8605_vm10, %v2906_v25, %v3065_v43 }
 0x24d   : > { %3905 = vmatpush.bf16.msra.mxu2 %v7442_v62  ;;  %v7440_v28 = vld [vmem:[%s9566_s6 + $0xd0] sm:$0xff]  ;;  %v3515_v37 = vld [vmem:[#allocation2 + $0x8] sm:$0xe]  ;;  %v2914_v12 = vrot.slane %v8609_v2, 4  ;;  %v8660_v18 = vrot.slane %v2916_v39, 7  ;;  %v3568_v62 = vsel %vm8639_vm12, %v6787_v23, %v3567_v38  ;;  %v3069_v58 = vsel %vm8591_vm8, %v2913_v7, %v3068_v46  ;;  %v7430_v5 = vld [vmem:[%s9566_s6 + $0x80] sm:$0xff] }
 0x24e   : > { %4050 = vmatpush.bf16.msrb.mxu3 %v7410_v19  ;;  %v7408_v52 = vld [vmem:[%s9566_s6 + $0x10] sm:$0xff]  ;;  %v3185_v53 = vor.u32 %v3184_v15, %v3181_v27  ;;  %v3163_v57 = vld [vmem:[#allocation2 + $0xc] sm:$0x1]  ;;  %v6788_v21 = vrot.slane %v3515_v37, 9  ;;  %v3147_v50 = vld [vmem:[#allocation2 + $0x8] sm:$0xf]  ;;  %v3645_v63 = vunpack.c.l.b16 %v3568_v62 }
 0x24f   : > { %4099 = vmatpush.bf16.msrb.mxu0 %v7418_v49  ;;  %v7416_v11 = vld [vmem:[%s9566_s6 + $0x50] sm:$0xff]  ;;  %v2919_v19 = vshll.u32 %v8489_v47, 16  ;;  %v3571_v49 = vrot.slane %v3163_v57, 5  ;;  %v3193_v6 = vshrl.u32 %v3147_v50, 16  ;;  %v7431_v2 = vld [vmem:[%s9566_s6 + $0x88] sm:$0xff]  ;;  %v3202_v24 = vshll.u32 %v3163_v57, 16 }
 0x250   : > { %3857 = vmatpush.bf16.msra.mxu1 %v7433_v10  ;;  %v3186_v4 = vrot.slane %v3185_v53, 4  ;;  %v3196_v10 = vshll.u32 %v3147_v50, 16  ;;  %v7439_v3 = vld [vmem:[%s9566_s6 + $0xc8] sm:$0xff]  ;;  %3067 = vst [vmem:[#allocation2 + $0x1c] sm:$0x1] %v3066_v31  ;;  %v7438_v26 = vld [vmem:[%s9566_s6 + $0xc0] sm:$0xff] }
 0x251   : > { %3906 = vmatpush.bf16.msra.mxu2 %v7441_v54  ;;  %v3071_v54 = vld [vmem:[#allocation2 + $0x24] sm:$0x1]  ;;  %v7407_v47 = vld [vmem:[%s9566_s6 + $0x8] sm:$0xff]  ;;  %v3572_v17 = vsel %vm8639_vm12, %v6788_v21, %v3571_v49  ;;  %3070 = vst [vmem:[#allocation2 + $0x20] sm:$0xf] %v3069_v58  ;;  %v2921_v16 = vor.u32 %v2919_v19, %v8660_v18  ;;  %v3204_v20 = vrot.slane %v3202_v24, 5 }
 0x252   : > { %4051 = vmatpush.bf16.msrb.mxu3 %v7409_v56  ;;  %v7415_v25 = vld [vmem:[%s9566_s6 + $0x48] sm:$0xff]  ;;  %v3195_v56 = vrot.slane %v3193_v6, 4  ;;  %v3198_v55 = vrot.slane %v3196_v10, 5  ;;  %v3646_v30 = vunpack.c.l.b16 %v3572_v17  ;;  %v7422_v39 = vld [vmem:[#allocation2 + $0xc] sm:$0xf0]  ;;  %v3191_v34 = vsel %vm7885_vm3, %v3186_v4, %v8649_v0  ;;  %v7406_v7 = vld [vmem:[%s9566_s6] sm:$0xff] }
 0x253   : > { %4100 = vmatpush.bf16.msrb.mxu0 %v7417_v33  ;;  %v6805_v51 = vld [vmem:[#allocation2 + $0x8] sm:$0xf]  ;;  %v3148_v45 = vld [vmem:[#allocation2 + $0x10] sm:$0xf]  ;;  %v3072_v59 = vsel %vm8605_vm10, %v2914_v12, %v3071_v54  ;;  %v7453_v33 = vld [vmem:[%s9566_s6 + $0x138] sm:$0xff]  ;;  %v2922_v27 = vrot.slane %v8660_v18, 4 }
 0x254   : > { %3858 = vmatpush.bf16.msra.mxu1 %v7432_v48  ;;  %v6757_v23 = vld [vmem:[#allocation2] sm:$0xf]  ;;  %v7398_v38 = vld [vmem:[#allocation2 + $0x4] sm:$0xf0]  ;;  %v3199_v42 = vor.u32 %v3198_v55, %v3195_v56  ;;  %v3207_v43 = vshrl.u32 %v3148_v45, 16  ;;  %v3210_v48 = vshll.u32 %v3148_v45, 16  ;;  %v6806_v0 = vor.u32 %v7422_v39, %v6805_v51 }
 0x255   : > { %3907 = vmatpush.bf16.msra.mxu2 %v7440_v28  ;;  %v8700_v15 = vld [vmem:[#allocation2 + $0x14] sm:$0x1]  ;;  %v3149_v46 = vld [vmem:[#allocation2 + $0x18] sm:$0xf]  ;;  %v2924_v28 = vshrl.u32 %v8492_v36, 16  ;;  %v3661_v31 = vpack.c.b16 %v3646_v30, %v3645_v63  ;;  %v7414_v12 = vld [vmem:[%s9566_s6 + $0x40] sm:$0xff]  ;;  %v6758_v6 = vor.u32 %v7398_v38, %v6757_v23 }
 0x256   : > { %4052 = vmatpush.bf16.msrb.mxu3 %v7408_v52  ;;  %v3200_v52 = vrot.slane %v3199_v42, 4  ;;  %v3209_v37 = vrot.slane %v3207_v43, 4  ;;  %3073 = vst [vmem:[#allocation2 + $0x24] sm:$0x1] %v3072_v59  ;;  %v3074_v53 = vld [vmem:[#allocation2 + $0x28] sm:$0xf] }
 0x257   : > { %4101 = vmatpush.bf16.msrb.mxu0 %v7416_v11  ;;  %v3450_v11 = vunpack.c.l.b16 %v3191_v34  ;;  %v3212_v18 = vrot.slane %v3210_v48, 5  ;;  %v3216_v57 = vshll.u32 %v8700_v15, 16  ;;  %v3221_v62 = vshrl.u32 %v3149_v46, 16  ;;  %v3077_v21 = vld [vmem:[#allocation2 + $0x2c] sm:$0x1]  ;;  %v7452_v24 = vld [vmem:[%s9566_s6 + $0x130] sm:$0xff] }
 0x258   : > { %3859 = vmatpush.bf16.msra.mxu1 %v7431_v2  ;;  %v3205_v50 = vsel %vm7885_vm3, %v3200_v52, %v3204_v20  ;;  %v3516_v58 = vld [vmem:[#allocation2 + $0x10] sm:$0xe]  ;;  %v3224_v19 = vshll.u32 %v3149_v46, 16  ;;  %v3075_v49 = vsel %vm8591_vm8, %v2921_v16, %v3074_v53  ;;  %v3078_v4 = vsel %vm8605_vm10, %v2922_v27, %v3077_v21  ;;  %v3165_v54 = vld [vmem:[#allocation2 + $0x1c] sm:$0x1]  ;;  %v7451_v23 = vld [vmem:[%s9566_s6 + $0x128] sm:$0xff] }
 0x259   : > { %3908 = vmatpush.bf16.msra.mxu2 %v7439_v3  ;;  %v3451_v10 = vunpack.c.l.b16 %v3205_v50  ;;  %v3517_v2 = vld [vmem:[#allocation2 + $0x18] sm:$0xe]  ;;  %v3213_v3 = vor.u32 %v3212_v18, %v3209_v37  ;;  %3076 = vst [vmem:[#allocation2 + $0x28] sm:$0xf] %v3075_v49  ;;  %v3230_v63 = vshll.u32 %v3165_v54, 16  ;;  %v6789_v56 = vrot.slane %v3516_v58, 9 }
 0x25a   : > { %4053 = vmatpush.bf16.msrb.mxu3 %v7407_v47  ;;  %v3223_v47 = vrot.slane %v3221_v62, 4  ;;  %v3226_v17 = vrot.slane %v3224_v19, 5  ;;  %3079 = vst [vmem:[#allocation2 + $0x2c] sm:$0x1] %v3078_v4  ;;  %v3575_v55 = vrot.slane %v8700_v15, 5  ;;  %v3579_v30 = vrot.slane %v3165_v54, 5 }
 0x25b   : > { %4102 = vmatpush.bf16.msrb.mxu0 %v7415_v25  ;;  %v3466_v25 = vpack.c.b16 %v3451_v10, %v3450_v11  ;;  %v3218_v51 = vrot.slane %v3216_v57, 5  ;;  %v3214_v34 = vrot.slane %v3213_v3, 4  ;;  %v3232_v45 = vrot.slane %v3230_v63, 5  ;;  %v3150_v38 = vld [vmem:[#allocation2 + $0x20] sm:$0xf]  ;;  %v7457_v1 = vld [vmem:[%s9566_s6 + $0x158] sm:$0xff] }
 0x25c   : > { %3860 = vmatpush.bf16.msra.mxu1 %v7430_v5  ;;  %v2926_v5 = vrot.slane %v2924_v28, 7  ;;  %v3227_v39 = vor.u32 %v3226_v17, %v3223_v47  ;;  %v2927_v16 = vshll.u32 %v8492_v36, 16  ;;  %v3083_v42 = vld [vmem:[#allocation2 + $0x34] sm:$0x1]  ;;  %v3576_v43 = vsel %vm8639_vm12, %v6789_v56, %v3575_v55  ;;  %v6809_v11 = vld [vmem:[#allocation2 + $0x18] sm:$0xf] }
 0x25d   : > { %3909 = vmatpush.bf16.msra.mxu2 %v7438_v26  ;;  %v6790_v26 = vrot.slane %v3517_v2, 9  ;;  %v3235_v48 = vshrl.u32 %v3150_v38, 16  ;;  %v3238_v28 = vshll.u32 %v3150_v38, 16  ;;  %v7423_v18 = vld [vmem:[#allocation2 + $0x1c] sm:$0xf0]  ;;  %v2932_v21 = vshrl.u32 %v8495_v29, 16 }
 0x25e   : > { %4054 = vmatpush.bf16.msrb.mxu3 %v7406_v7  ;;  %v2930_v59 = vrot.slane %v2926_v5, 4  ;;  %v3080_v7 = vld [vmem:[#allocation2 + $0x30] sm:$0xf]  ;;  %v2929_v20 = vor.u32 %v2927_v16, %v2926_v5  ;;  %v7399_v62 = vld [vmem:[#allocation2 + $0x14] sm:$0xf0]  ;;  %v2935_v50 = vshll.u32 %v8495_v29, 16 }
 0x25f   : > { %4103 = vmatpush.bf16.msrb.mxu0 %v7414_v12  ;;  %3861 = vmatmul.bf16.vlgmr.msra.gmra.mxu1 %v3661_v31  ;;  %v3580_v36 = vsel %vm8639_vm12, %v6790_v26, %v3579_v30  ;;  %v3647_v31 = vunpack.c.l.b16 %v3576_v43  ;;  %v6761_v57 = vld [vmem:[#allocation2 + $0x10] sm:$0xf]  ;;  %v3237_v49 = vrot.slane %v3235_v48, 4  ;;  %v3240_v4 = vrot.slane %v3238_v28, 5  ;;  %v3089_v47 = vld [vmem:[#allocation2 + $0x3c] sm:$0x1] }
 0x260   : > { %4705 = vmatpush.bf16.msrb.mxu1 %v7453_v33  ;;  %3910 = vmatmul.bf16.vlgmr.msra.gmra.mxu2 %v6806_v0  ;;  %v3228_v33 = vrot.slane %v3227_v39, 4  ;;  %v3084_v27 = vsel %vm8605_vm10, %v2930_v59, %v3083_v42  ;;  %v3081_v15 = vsel %vm8591_vm8, %v2929_v20, %v3080_v7  ;;  %v3151_v46 = vld [vmem:[#allocation2 + $0x28] sm:$0xf]  ;;  %v3219_v0 = vsel %vm7885_vm3, %v3214_v34, %v3218_v51  ;;  %v3166_v56 = vld [vmem:[#allocation2 + $0x24] sm:$0x1]  ;;  %s6168_s15 = sshll.u32 %s8533_s18, 4  ;;  %s6169_s15 = int_to_ptr.vmem [resolvable:$true] %s6168_s15 }
 0x261   : > { %4055 = vmatmul.bf16.vlgmr.msrb.gmra.mxu3 %v6758_v6  ;;  %3082 = vst [vmem:[#allocation2 + $0x30] sm:$0xf] %v3081_v15  ;;  %v3249_v37 = vshrl.u32 %v3151_v46, 16  ;;  %v3252_v53 = vshll.u32 %v3151_v46, 16  ;;  %v3648_v12 = vunpack.c.l.b16 %v3580_v36  ;;  %v3452_v58 = vunpack.c.l.b16 %v3219_v0  ;;  %v3086_v6 = vld [vmem:[#allocation2 + $0x38] sm:$0xf] }
 0x262   : > { %4104 = vmatmul.bf16.vlgmr.msrb.gmra.mxu0 %v3466_v25  ;;  %v3233_v52 = vsel %vm7885_vm3, %v3228_v33, %v3232_v45  ;;  %3085 = vst [vmem:[#allocation2 + $0x34] sm:$0x1] %v3084_v27  ;;  %v2934_v2 = vrot.slane %v2932_v21, 7  ;;  %v2940_v3 = vshrl.u32 %v8499_v60, 16  ;;  %v2943_v17 = vshll.u32 %v8499_v60, 16  ;;  %v7450_v15 = vld [vmem:[%s9566_s6 + $0x120] sm:$0xff] }
 0x263   : > { %v3453_v19 = vunpack.c.l.b16 %v3233_v52  ;;  %v3251_v10 = vrot.slane %v3249_v37, 4  ;;  %v3254_v54 = vrot.slane %v3252_v53, 5  ;;  %v2948_v63 = vshrl.u32 %v8503_v14, 16  ;;  %v3518_v55 = vld [vmem:[#allocation2 + $0x20] sm:$0xe]  ;;  %s6170_s19 = sshll.u32 %s6167_s1, 4  ;;  %s6171_s19 = int_to_ptr.hbm [resolvable:$true] %s6170_s19 }
 0x264   : > { %4706 = vmatpush.bf16.msrb.mxu1 %v7452_v24  ;;  %v6810_v24 = vor.u32 %v7423_v18, %v6809_v11  ;;  %v3662_v25 = vpack.c.b16 %v3648_v12, %v3647_v31  ;;  %v2937_v29 = vor.u32 %v2935_v50, %v2934_v2  ;;  %v2938_v5 = vrot.slane %v2934_v2, 4  ;;  %v3167_v39 = vld [vmem:[#allocation2 + $0x2c] sm:$0x1]  ;;  %v3519_v34 = vld [vmem:[#allocation2 + $0x28] sm:$0xe]  ;;  %s9598_s24 = sand.u32 1, %s7651_s30  }
 0x265   : > { %v8738_v26 = vrot.slane %v2940_v3, 7  ;;  %v6762_v30 = vor.u32 %v7399_v62, %v6761_v57  ;;  %v3467_v51 = vpack.c.b16 %v3453_v19, %v3452_v58  ;;  %v3241_v45 = vor.u32 %v3240_v4, %v3237_v49  ;;  %v3098_v37 = vld [vmem:[#allocation2 + $0x58] sm:$0xf]  ;;  %v3101_v18 = vld [vmem:[#allocation2 + $0x5c] sm:$0x1]  ;;  %s6155_s27 = scalar_lea.sflag [#allocation4], %s9598_s24 }
 0x266   : > { %v3244_v16 = vshll.u32 %v3166_v56, 16  ;;  %v3255_v59 = vor.u32 %v3254_v54, %v3251_v10  ;;  %v3258_v7 = vshll.u32 %v3167_v39, 16  ;;  %v3087_v60 = vsel %vm8591_vm8, %v2937_v29, %v3086_v6  ;;  %s7611_s21 = sshra.s32 %s6171_s19, 4  ;;  %s7617_s25 = scalar_lea.hbm %s9574_s14, 256  ;;  %s7612_s21 = int_to_ptr.hbm [resolvable:$true] %s7611_s21 }
 0x267   : > { %v3090_v33 = vsel %vm8605_vm10, %v2938_v5, %v3089_v47  ;;  %v6791_v38 = vrot.slane %v3518_v55, 9  ;;  %3088 = vst [vmem:[#allocation2 + $0x38] sm:$0xf] %v3087_v60  ;;  %v2945_v42 = vor.u32 %v2943_v17, %v8738_v26  ;;  %v2950_v20 = vrot.slane %v2948_v63, 7  ;;  %v3104_v63 = vld [vmem:[#allocation2 + $0x60] sm:$0xf]  ;;  %p7618_p1 = scmp.lt.s32.totalorder %s7612_s21, %s9574_s14 }
 0x268   : > { %4707 = vmatpush.bf16.msrb.mxu1 %v7451_v23  ;;  %v3092_v23 = vld [vmem:[#allocation2 + $0x40] sm:$0xf]  ;;  %v3583_v43 = vrot.slane %v3166_v56, 5  ;;  %v6792_v27 = vrot.slane %v3519_v34, 9  ;;  %v3587_v36 = vrot.slane %v3167_v39, 5  ;;  %v3242_v46 = vrot.slane %v3241_v45, 4 }
 0x269   : > { %3091 = vst [vmem:[#allocation2 + $0x3c] sm:$0x1] %v3090_v33  ;;  %v3246_v48 = vrot.slane %v3244_v16, 5  ;;  %v3093_v28 = vsel %vm8591_vm8, %v2945_v42, %v3092_v23  ;;  %v2951_v0 = vshll.u32 %v8503_v14, 16  ;;  %v3256_v52 = vrot.slane %v3255_v59, 4 }
 0x26a   : > { %v3260_v11 = vrot.slane %v3258_v7, 5  ;;  %3094 = vst [vmem:[#allocation2 + $0x40] sm:$0xf] %v3093_v28  ;;  %v3152_v53 = vld [vmem:[#allocation2 + $0x30] sm:$0xf]  ;;  %v2954_v12 = vrot.slane %v2950_v20, 4  ;;  %v3584_v62 = vsel %vm8639_vm12, %v6791_v38, %v3583_v43  ;;  %v3588_v21 = vsel %vm8639_vm12, %v6792_v27, %v3587_v36 }
 0x26b   : > { %v2953_v31 = vor.u32 %v2951_v0, %v2950_v20  ;;  %v2956_v57 = vshrl.u32 %v8507_v41, 16  ;;  %v3247_v14 = vsel %vm7885_vm3, %v3242_v46, %v3246_v48  ;;  %v2959_v19 = vshll.u32 %v8507_v41, 16  ;;  %v7424_v56 = vld [vmem:[#allocation2 + $0x2c] sm:$0xf0]  ;;  %v7400_v5 = vld [vmem:[#allocation2 + $0x24] sm:$0xf0] }
 0x26c   : > { %4708 = vmatpush.bf16.msrb.mxu1 %v7450_v15  ;;  %v3261_v49 = vsel %vm7885_vm3, %v3256_v52, %v3260_v11  ;;  %v3263_v4 = vshrl.u32 %v3152_v53, 16  ;;  %v3266_v6 = vshll.u32 %v3152_v53, 16  ;;  %v3102_v10 = vsel %vm8605_vm10, %v2954_v12, %v3101_v18  ;;  %v3168_v7 = vld [vmem:[#allocation2 + $0x34] sm:$0x1]  ;;  %v3520_v60 = vld [vmem:[#allocation2 + $0x30] sm:$0xe] }
 0x26d   : > { %v3099_v50 = vsel %vm8591_vm8, %v2953_v31, %v3098_v37  ;;  %v8760_v58 = vrot.slane %v2956_v57, 7  ;;  %v3649_v2 = vunpack.c.l.b16 %v3584_v62  ;;  %v3650_v3 = vunpack.c.l.b16 %v3588_v21  ;;  %3103 = vst [vmem:[#allocation2 + $0x5c] sm:$0x1] %v3102_v10  ;;  %v7449_v52 = vld [vmem:[%s9566_s6 + $0x118] sm:$0xff]  ;;  %v3154_v57 = vld [vmem:[#allocation2 + $0x50] sm:$0xf] }
 0x26e   : > { %v3153_v54 = vld [vmem:[#allocation2 + $0x38] sm:$0xf]  ;;  %3100 = vst [vmem:[#allocation2 + $0x58] sm:$0xf] %v3099_v50  ;;  %v3454_v55 = vunpack.c.l.b16 %v3247_v14  ;;  %v3455_v41 = vunpack.c.l.b16 %v3261_v49  ;;  %v3272_v42 = vshll.u32 %v3168_v7, 16  ;;  %v2964_v15 = vshrl.u32 %v8511_v8, 16 }
 0x26f   : > { %3866 = vmatmul.bf16.gmra.mxu1 %v3662_v25  ;;  %v3277_v47 = vshrl.u32 %v3153_v54, 16  ;;  %v3280_v17 = vshll.u32 %v3153_v54, 16  ;;  %v6813_v25 = vld [vmem:[#allocation2 + $0x28] sm:$0xf]  ;;  %v2961_v29 = vor.u32 %v2959_v19, %v8760_v58  ;;  %v3663_v16 = vpack.c.b16 %v3650_v3, %v3649_v2  ;;  %v3521_v38 = vld [vmem:[#allocation2 + $0x38] sm:$0xe] }
 0x270   : > { %3915 = vmatmul.bf16.gmra.mxu2 %v6810_v24  ;;  %v6765_v24 = vld [vmem:[#allocation2 + $0x20] sm:$0xf]  ;;  %v6814_v59 = vor.u32 %v7424_v56, %v6813_v25  ;;  %v3169_v23 = vld [vmem:[#allocation2 + $0x3c] sm:$0x1]  ;;  %v3468_v20 = vpack.c.b16 %v3455_v41, %v3454_v55  ;;  %v6793_v46 = vrot.slane %v3520_v60, 9  ;;  %v3591_v48 = vrot.slane %v3168_v7, 5  ;;  %4709 = vmatpush.bf16.msrb.mxu1 %v7449_v52 }
 0x271   : > { %4060 = vmatmul.bf16.gmra.mxu3 %v6762_v30  ;;  %v3265_v30 = vrot.slane %v3263_v4, 4  ;;  %v3279_v39 = vrot.slane %v3277_v47, 4  ;;  %v3282_v34 = vrot.slane %v3280_v17, 5  ;;  %v3105_v45 = vsel %vm8591_vm8, %v2961_v29, %v3104_v63  ;;  %v3107_v14 = vld [vmem:[#allocation2 + $0x64] sm:$0x1] }
 0x272   : > { %4109 = vmatmul.bf16.gmra.mxu0 %v3467_v51  ;;  %v3268_v51 = vrot.slane %v3266_v6, 5  ;;  %3106 = vst [vmem:[#allocation2 + $0x60] sm:$0xf] %v3105_v45  ;;  %v6766_v33 = vor.u32 %v7400_v5, %v6765_v24  ;;  %v3286_v36 = vshll.u32 %v3169_v23, 16  ;;  %v6794_v28 = vrot.slane %v3521_v38, 9 }
 0x273   : > { %v3283_v27 = vor.u32 %v3282_v34, %v3279_v39  ;;  %v3595_v0 = vrot.slane %v3169_v23, 5  ;;  %v3274_v11 = vrot.slane %v3272_v42, 5  ;;  %v2967_v37 = vshll.u32 %v8511_v8, 16  ;;  %v3110_v49 = vld [vmem:[#allocation2 + $0x68] sm:$0xf] }
 0x274   : > { %v3269_v43 = vor.u32 %v3268_v51, %v3265_v30  ;;  %v3288_v12 = vrot.slane %v3286_v36, 5  ;;  %v2962_v18 = vrot.slane %v8760_v58, 4  ;;  %v2966_v21 = vrot.slane %v2964_v15, 7  ;;  %v3113_v4 = vld [vmem:[#allocation2 + $0x6c] sm:$0x1] }
 0x275   : > { %v3284_v31 = vrot.slane %v3283_v27, 4  ;;  %v3155_v62 = vld [vmem:[#allocation2 + $0x58] sm:$0xf]  ;;  %v3592_v50 = vsel %vm8639_vm12, %v6793_v46, %v3591_v48  ;;  %v3596_v19 = vsel %vm8639_vm12, %v6794_v28, %v3595_v0  ;;  %v3291_v8 = vshrl.u32 %v3154_v57, 16  ;;  %v7425_v29 = vld [vmem:[#allocation2 + $0x3c] sm:$0xf0] }
 0x276   : > { %v3270_v53 = vrot.slane %v3269_v43, 4  ;;  %v3294_v6 = vshll.u32 %v3154_v57, 16  ;;  %v2969_v10 = vor.u32 %v2967_v37, %v2966_v21  ;;  %v2970_v54 = vrot.slane %v2966_v21, 4  ;;  %v6817_v47 = vld [vmem:[#allocation2 + $0x38] sm:$0xf] }
 0x277   : > { %v3289_v2 = vsel %vm7885_vm3, %v3284_v31, %v3288_v12  ;;  %v3305_v3 = vshrl.u32 %v3155_v62, 16  ;;  %v3108_v24 = vsel %vm8605_vm10, %v2962_v18, %v3107_v14  ;;  %v3308_v17 = vshll.u32 %v3155_v62, 16  ;;  %v6769_v5 = vld [vmem:[#allocation2 + $0x30] sm:$0xf]  ;;  %v7401_v45 = vld [vmem:[#allocation2 + $0x34] sm:$0xf0] }
 0x278   : > { %v3275_v58 = vsel %vm7885_vm3, %v3270_v53, %v3274_v11  ;;  %3109 = vst [vmem:[#allocation2 + $0x64] sm:$0x1] %v3108_v24  ;;  %v3111_v63 = vsel %vm8591_vm8, %v2969_v10, %v3110_v49  ;;  %v3114_v25 = vsel %vm8605_vm10, %v2970_v54, %v3113_v4  ;;  %v2972_v56 = vshrl.u32 %v8515_v35, 16  ;;  %v3116_v7 = vld [vmem:[#allocation2 + $0x70] sm:$0xf] }
 0x279   : > { %v3651_v55 = vunpack.c.l.b16 %v3592_v50  ;;  %v3652_v41 = vunpack.c.l.b16 %v3596_v19  ;;  %3112 = vst [vmem:[#allocation2 + $0x68] sm:$0xf] %v3111_v63  ;;  %v2975_v30 = vshll.u32 %v8515_v35, 16  ;;  %v3293_v51 = vrot.slane %v3291_v8, 4  ;;  %v3170_v35 = vld [vmem:[#allocation2 + $0x54] sm:$0x1] }
 0x27a   : > { %v3296_v39 = vrot.slane %v3294_v6, 5  ;;  %3115 = vst [vmem:[#allocation2 + $0x6c] sm:$0x1] %v3114_v25  ;;  %v2974_v34 = vrot.slane %v2972_v56, 7  ;;  %v2980_v60 = vshrl.u32 %v8519_v61, 16  ;;  %v3310_v23 = vrot.slane %v3308_v17, 5 }
 0x27b   : > { %v3664_v42 = vpack.c.b16 %v3652_v41, %v3651_v55  ;;  %v2983_v27 = vshll.u32 %v8519_v61, 16  ;;  %v6770_v36 = vor.u32 %v7401_v45, %v6769_v5  ;;  %v3522_v15 = vld [vmem:[#allocation2 + $0x50] sm:$0xe]  ;;  %v3171_v0 = vld [vmem:[#allocation2 + $0x5c] sm:$0x1]  ;;  %v3300_v11 = vshll.u32 %v3170_v35, 16 }
 0x27c   : > { %v2977_v38 = vor.u32 %v2975_v30, %v2974_v34  ;;  %v2982_v43 = vrot.slane %v2980_v60, 7  ;;  %v3297_v46 = vor.u32 %v3296_v39, %v3293_v51  ;;  %v3523_v52 = vld [vmem:[#allocation2 + $0x58] sm:$0xe]  ;;  %v3314_v53 = vshll.u32 %v3171_v0, 16  ;;  %v7448_v61 = vld [vmem:[%s9566_s6 + $0x110] sm:$0xff] }
 0x27d   : > { %v2978_v31 = vrot.slane %v2974_v34, 4  ;;  %v6795_v12 = vrot.slane %v3522_v15, 9  ;;  %v3599_v18 = vrot.slane %v3170_v35, 5  ;;  %v6796_v62 = vrot.slane %v3523_v52, 9  ;;  %4710 = vmatpush.bf16.msrb.mxu1 %v7448_v61  ;;  %v3156_v19 = vld [vmem:[#allocation2 + $0x60] sm:$0xf] }
 0x27e   : > { %v3117_v48 = vsel %vm8591_vm8, %v2977_v38, %v3116_v7  ;;  %v2985_v57 = vor.u32 %v2983_v27, %v2982_v43  ;;  %v3603_v21 = vrot.slane %v3171_v0, 5  ;;  %v3298_v14 = vrot.slane %v3297_v46, 4  ;;  %v3119_v49 = vld [vmem:[#allocation2 + $0x74] sm:$0x1]  ;;  %v3122_v4 = vld [vmem:[#allocation2 + $0x78] sm:$0xf] }
 0x27f   : > { %3871 = vmatmul.bf16.gmra.mxu1 %v3663_v16  ;;  %v3456_v16 = vunpack.c.l.b16 %v3275_v58  ;;  %3118 = vst [vmem:[#allocation2 + $0x70] sm:$0xf] %v3117_v48  ;;  %v2986_v50 = vrot.slane %v2982_v43, 4  ;;  %v3302_v8 = vrot.slane %v3300_v11, 5  ;;  %v3316_v10 = vrot.slane %v3314_v53, 5  ;;  %v7461_v61 = vld [vmem:[%s9566_s6 + $0x178] sm:$0xff] }
 0x280   : > { %3920 = vmatmul.bf16.gmra.mxu2 %v6814_v59  ;;  %v3457_v59 = vunpack.c.l.b16 %v3289_v2  ;;  %v3120_v54 = vsel %vm8605_vm10, %v2978_v31, %v3119_v49  ;;  %v3125_v58 = vld [vmem:[#allocation2 + $0x7c] sm:$0x1]  ;;  %v3600_v2 = vsel %vm8639_vm12, %v6795_v12, %v3599_v18  ;;  %v3123_v24 = vsel %vm8591_vm8, %v2985_v57, %v3122_v4  ;;  %v6821_v34 = vld [vmem:[#allocation2 + $0x58] sm:$0xf]  ;;  %v3128_v60 = vld [vmem:[#allocation2 + $0x80] sm:$0xf] }
 0x281   : > { %4065 = vmatmul.bf16.gmra.mxu3 %v6766_v33  ;;  %v3307_v33 = vrot.slane %v3305_v3, 4  ;;  %v3157_v3 = vld [vmem:[#allocation2 + $0x68] sm:$0xf]  ;;  %3121 = vst [vmem:[#allocation2 + $0x74] sm:$0x1] %v3120_v54  ;;  %v3319_v17 = vshrl.u32 %v3156_v19, 16  ;;  %v3126_v25 = vsel %vm8605_vm10, %v2986_v50, %v3125_v58  ;;  %v3303_v41 = vsel %vm7885_vm3, %v3298_v14, %v3302_v8  ;;  %4754 = vmatpush.bf16.msrb.mxu2 %v7461_v61 }
 0x282   : > { %4114 = vmatmul.bf16.gmra.mxu0 %v3468_v20  ;;  %v6818_v20 = vor.u32 %v7425_v29, %v6817_v47  ;;  %v3469_v28 = vpack.c.b16 %v3457_v59, %v3456_v16  ;;  %v3604_v47 = vsel %vm8639_vm12, %v6796_v62, %v3603_v21  ;;  %v3322_v63 = vshll.u32 %v3156_v19, 16  ;;  %3124 = vst [vmem:[#allocation2 + $0x78] sm:$0xf] %v3123_v24  ;;  %v7426_v16 = vld [vmem:[#allocation2 + $0x5c] sm:$0xf0]  ;;  %v7447_v21 = vld [vmem:[%s9566_s6 + $0x108] sm:$0xff] }
 0x283   : > { %v3311_v37 = vor.u32 %v3310_v23, %v3307_v33  ;;  %3127 = vst [vmem:[#allocation2 + $0x7c] sm:$0x1] %v3126_v25  ;;  %v2988_v56 = vshrl.u32 %v8523_v9, 16  ;;  %v2991_v55 = vshll.u32 %v8523_v9, 16  ;;  %v3333_v5 = vshrl.u32 %v3157_v3, 16  ;;  %4711 = vmatpush.bf16.msrb.mxu1 %v7447_v21  ;;  %v7485_v58 = vld [vmem:[%s9566_s6 + $0x1f8] sm:$0xff] }
 0x284   : > { %v3336_v30 = vshll.u32 %v3157_v3, 16  ;;  %v3653_v51 = vunpack.c.l.b16 %v3600_v2  ;;  %v3654_v39 = vunpack.c.l.b16 %v3604_v47  ;;  %v3321_v59 = vrot.slane %v3319_v17, 4  ;;  %v6773_v33 = vld [vmem:[#allocation2 + $0x50] sm:$0xf]  ;;  %v7402_v23 = vld [vmem:[#allocation2 + $0x54] sm:$0xf0]  ;;  %5333 = vmatpush.bf16.msra.mxu0 %v7485_v58 }
 0x285   : > { %v3312_v6 = vrot.slane %v3311_v37, 4  ;;  %v2990_v45 = vrot.slane %v2988_v56, 7  ;;  %v3324_v7 = vrot.slane %v3322_v63, 5  ;;  %v3458_v38 = vunpack.c.l.b16 %v3303_v41  ;;  %v3172_v35 = vld [vmem:[#allocation2 + $0x64] sm:$0x1]  ;;  %v7476_v17 = vld [vmem:[%s9566_s6 + $0x1b0] sm:$0xff] }
 0x286   : > { %v3338_v43 = vrot.slane %v3336_v30, 5  ;;  %v3665_v27 = vpack.c.b16 %v3654_v39, %v3653_v51  ;;  %v2996_v46 = vshrl.u32 %v8527_v22, 16  ;;  %v6774_v48 = vor.u32 %v7402_v23, %v6773_v33  ;;  %v3173_v37 = vld [vmem:[#allocation2 + $0x6c] sm:$0x1]  ;;  %v3525_v53 = vld [vmem:[#allocation2 + $0x68] sm:$0xe] }
 0x287   : > { %v3317_v29 = vsel %vm7885_vm3, %v3312_v6, %v3316_v10  ;;  %v3325_v0 = vor.u32 %v3324_v7, %v3321_v59  ;;  %v3328_v52 = vshll.u32 %v3172_v35, 16  ;;  %v2994_v31 = vrot.slane %v2990_v45, 4  ;;  %v3131_v50 = vld [vmem:[#allocation2 + $0x84] sm:$0x1]  ;;  %v7477_v6 = vld [vmem:[%s9566_s6 + $0x1b8] sm:$0xff]  ;;  %v7460_v10 = vld [vmem:[%s9566_s6 + $0x170] sm:$0xff] }
 0x288   : > { %v3459_v9 = vunpack.c.l.b16 %v3317_v29  ;;  %v3342_v18 = vshll.u32 %v3173_v37, 16  ;;  %v3607_v62 = vrot.slane %v3172_v35, 5  ;;  %v2998_v14 = vrot.slane %v2996_v46, 7  ;;  %v3158_v54 = vld [vmem:[#allocation2 + $0x70] sm:$0xf]  ;;  %5284 = vmatpush.bf16.msra.mxu3 %v7477_v6  ;;  %4755 = vmatpush.bf16.msrb.mxu2 %v7460_v10  ;;  %v7459_v51 = vld [vmem:[%s9566_s6 + $0x168] sm:$0xff] }
 0x289   : > { %v6798_v19 = vrot.slane %v3525_v53, 9  ;;  %v3611_v49 = vrot.slane %v3173_v37, 5  ;;  %v3326_v4 = vrot.slane %v3325_v0, 4  ;;  %v3330_v8 = vrot.slane %v3328_v52, 5  ;;  %v3159_v63 = vld [vmem:[#allocation2 + $0x78] sm:$0xf] }
 0x28a   : > { %v3470_v11 = vpack.c.b16 %v3459_v9, %v3458_v38  ;;  %v2999_v2 = vshll.u32 %v8527_v22, 16  ;;  %v3132_v3 = vsel %vm8605_vm10, %v2994_v31, %v3131_v50  ;;  %v3344_v47 = vrot.slane %v3342_v18, 5  ;;  %v7484_v25 = vld [vmem:[%s9566_s6 + $0x1f0] sm:$0xff]  ;;  %v3134_v39 = vld [vmem:[#allocation2 + $0x88] sm:$0xf]  ;;  %v7458_v35 = vld [vmem:[%s9566_s6 + $0x160] sm:$0xff] }
 0x28b   : > { %3133 = vst [vmem:[#allocation2 + $0x84] sm:$0x1] %v3132_v3  ;;  %v3004_v22 = vshrl.u32 %v8530_v32, 16  ;;  %v3612_v29 = vsel %vm8639_vm12, %v6798_v19, %v3611_v49  ;;  %v3347_v30 = vshrl.u32 %v3158_v54, 16  ;;  %v3364_v33 = vshll.u32 %v3159_v63, 16  ;;  %v7475_v23 = vld [vmem:[%s9566_s6 + $0x1a8] sm:$0xff]  ;;  %5334 = vmatpush.bf16.msra.mxu0 %v7484_v25 }
 0x28c   : > { %v3001_v56 = vor.u32 %v2999_v2, %v2998_v14  ;;  %5285 = vmatpush.bf16.msra.mxu3 %v7476_v17  ;;  %v3007_v9 = vshll.u32 %v8530_v32, 16  ;;  %4756 = vmatpush.bf16.msrb.mxu2 %v7459_v51  ;;  %v6777_v46 = vld [vmem:[#allocation2 + $0x60] sm:$0xf]  ;;  %v3527_v50 = vld [vmem:[#allocation2 + $0x78] sm:$0xe]  ;;  %v7483_v6 = vld [vmem:[%s9566_s6 + $0x1e8] sm:$0xff] }
 0x28d   : > { %v8861_v38 = vrot.slane %v3004_v22, 7  ;;  %v3349_v52 = vrot.slane %v3347_v30, 4  ;;  %v3366_v37 = vrot.slane %v3364_v33, 5  ;;  %v7474_v53 = vld [vmem:[%s9566_s6 + $0x1a0] sm:$0xff]  ;;  %v6800_v2 = vrot.slane %v3527_v50, 9  ;;  %v7472_v22 = vld [vmem:[%s9566_s6 + $0x190] sm:$0xff] }
 0x28e   : > { %v3135_v59 = vsel %vm8591_vm8, %v3001_v56, %v3134_v39  ;;  %v7446_v10 = vld [vmem:[%s9566_s6 + $0x100] sm:$0xff]  ;;  %v7455_v51 = vld [vmem:[%s9566_s6 + $0x148] sm:$0xff]  ;;  %vm5752_vm14 = vcmask 1041409  }
 0x28f   : > { %3876 = vmatmul.bf16.gmra.mxu1 %v3664_v42  ;;  %v2993_v42 = vor.u32 %v2991_v55, %v2990_v45  ;;  %v3002_v55 = vrot.slane %v2998_v14, 4  ;;  %v3350_v45 = vshll.u32 %v3158_v54, 16  ;;  %3136 = vst [vmem:[#allocation2 + $0x88] sm:$0xf] %v3135_v59  ;;  %v3175_v14 = vld [vmem:[#allocation2 + $0x7c] sm:$0x1]  ;;  %5335 = vmatpush.bf16.msra.mxu0 %v7483_v6 }
 0x290   : > { %3925 = vmatmul.bf16.gmra.mxu2 %v6818_v20  ;;  %v3335_v20 = vrot.slane %v3333_v5, 4  ;;  %v3331_v5 = vsel %vm7885_vm3, %v3326_v4, %v3330_v8  ;;  %5286 = vmatpush.bf16.msra.mxu3 %v7475_v23  ;;  %v3370_v8 = vshll.u32 %v3175_v14, 16  ;;  %v3619_v3 = vrot.slane %v3175_v14, 5  ;;  %v7471_v33 = vld [vmem:[%s9566_s6 + $0x188] sm:$0xff] }
 0x291   : > { %4070 = vmatmul.bf16.gmra.mxu3 %v6770_v36  ;;  %v6822_v36 = vor.u32 %v7426_v16, %v6821_v34  ;;  %v3129_v15 = vsel %vm8591_vm8, %v2993_v42, %v3128_v60  ;;  %v3137_v34 = vld [vmem:[#allocation2 + $0x8c] sm:$0x1]  ;;  %v3361_v16 = vshrl.u32 %v3159_v63, 16  ;;  %v3352_v32 = vrot.slane %v3350_v45, 5  ;;  %4757 = vmatpush.bf16.msrb.mxu2 %v7458_v35 }
 0x292   : > { %4119 = vmatmul.bf16.gmra.mxu0 %v3469_v28  ;;  %v3524_v28 = vld [vmem:[#allocation2 + $0x60] sm:$0xe]  ;;  %3130 = vst [vmem:[#allocation2 + $0x80] sm:$0xf] %v3129_v15  ;;  %v3339_v12 = vor.u32 %v3338_v43, %v3335_v20  ;;  %v3138_v7 = vsel %vm8605_vm10, %v3002_v55, %v3137_v34  ;;  %v3656_v20 = vunpack.c.l.b16 %v3612_v29  ;;  %v3140_v43 = vld [vmem:[#allocation2 + $0x90] sm:$0xf]  ;;  %v3009_v15 = vor.u32 %v3007_v9, %v8861_v38 }
 0x293   : > { %v6797_v57 = vrot.slane %v3524_v28, 9  ;;  %3139 = vst [vmem:[#allocation2 + $0x8c] sm:$0x1] %v3138_v7  ;;  %v3460_v28 = vunpack.c.l.b16 %v3331_v5  ;;  %v3353_v19 = vor.u32 %v3352_v32, %v3349_v52  ;;  %4712 = vmatpush.bf16.msrb.mxu1 %v7446_v10  ;;  %v3372_v56 = vrot.slane %v3370_v8, 5  ;;  %v7482_v55 = vld [vmem:[%s9566_s6 + $0x1e0] sm:$0xff]  ;;  %v7480_v52 = vld [vmem:[%s9566_s6 + $0x1d0] sm:$0xff] }
 0x294   : > { %v3340_v24 = vrot.slane %v3339_v12, 4  ;;  %v3141_v31 = vsel %vm8591_vm8, %v3009_v15, %v3140_v43  ;;  %5287 = vmatpush.bf16.msra.mxu3 %v7474_v53  ;;  %v3620_v30 = vsel %vm8639_vm12, %v6800_v2, %v3619_v3  ;;  %5336 = vmatpush.bf16.msra.mxu0 %v7482_v55  ;;  %v6781_v43 = vld [vmem:[#allocation2 + $0x70] sm:$0xf]  ;;  %v3176_v53 = vld [vmem:[#allocation2 + $0x84] sm:$0x1] }
 0x295   : > { %v3608_v41 = vsel %vm8639_vm12, %v6797_v57, %v3607_v62  ;;  %3142 = vst [vmem:[#allocation2 + $0x90] sm:$0xf] %v3141_v31  ;;  %v3174_v57 = vld [vmem:[#allocation2 + $0x74] sm:$0x1]  ;;  %v3526_v62 = vld [vmem:[#allocation2 + $0x70] sm:$0xe]  ;;  %4758 = vmatpush.bf16.msrb.mxu2 %v7457_v1  ;;  %v3658_v9 = vunpack.c.l.b16 %v3620_v30 }
 0x296   : > { %v3345_v60 = vsel %vm7885_vm3, %v3340_v24, %v3344_v47  ;;  %v3655_v42 = vunpack.c.l.b16 %v3608_v41  ;;  %v3356_v49 = vshll.u32 %v3174_v57, 16  ;;  %v6799_v54 = vrot.slane %v3526_v62, 9  ;;  %v7473_v24 = vld [vmem:[%s9566_s6 + $0x198] sm:$0xff]  ;;  %v7456_v47 = vld [vmem:[%s9566_s6 + $0x150] sm:$0xff]  ;;  %v3161_v29 = vld [vmem:[#allocation2 + $0x88] sm:$0xf] }
 0x297   : > { %v3461_v0 = vunpack.c.l.b16 %v3345_v60  ;;  %v3615_v58 = vrot.slane %v3174_v57, 5  ;;  %v3354_v17 = vrot.slane %v3353_v19, 4  ;;  %v3389_v59 = vshrl.u32 %v3161_v29, 16  ;;  %v7481_v60 = vld [vmem:[%s9566_s6 + $0x1d8] sm:$0xff]  ;;  %v3529_v57 = vld [vmem:[#allocation2 + $0x88] sm:$0xe] }
 0x298   : > { %v3666_v12 = vpack.c.b16 %v3656_v20, %v3655_v42  ;;  %v3358_v63 = vrot.slane %v3356_v49, 5  ;;  %5288 = vmatpush.bf16.msra.mxu3 %v7473_v24  ;;  %v3392_v7 = vshll.u32 %v3161_v29, 16  ;;  %v6829_v42 = vld [vmem:[#allocation2 + $0x78] sm:$0xf]  ;;  %5337 = vmatpush.bf16.msra.mxu0 %v7481_v60  ;;  %v7479_v19 = vld [vmem:[%s9566_s6 + $0x1c8] sm:$0xff]  ;;  %v3623_v1 = vrot.slane %v3176_v53, 5 }
 0x299   : > { %v3471_v21 = vpack.c.b16 %v3461_v0, %v3460_v28  ;;  %v3160_v41 = vld [vmem:[#allocation2 + $0x80] sm:$0xf]  ;;  %v3616_v5 = vsel %vm8639_vm12, %v6799_v54, %v3615_v58  ;;  %4759 = vmatpush.bf16.msrb.mxu2 %v7456_v47  ;;  %v4145_v49 = vld [vmem:[#allocation2 + $0x8] sm:$0xf]  ;;  %v6802_v6 = vrot.slane %v3529_v57, 9 }
 0x29a   : > { %v3375_v39 = vshrl.u32 %v3160_v41, 16  ;;  %v3378_v34 = vshll.u32 %v3160_v41, 16  ;;  %v3359_v45 = vsel %vm7885_vm3, %v3354_v17, %v3358_v63  ;;  %v3657_v23 = vunpack.c.l.b16 %v3616_v5  ;;  %v7428_v20 = vld [vmem:[#allocation2 + $0x7c] sm:$0xf0]  ;;  %v3177_v31 = vld [vmem:[#allocation2 + $0x8c] sm:$0x1] }
 0x29b   : > { %v3394_v28 = vrot.slane %v3392_v7, 5  ;;  %v7454_v0 = vld [vmem:[%s9566_s6 + $0x140] sm:$0xff]  ;;  %v3398_v14 = vshll.u32 %v3177_v31, 16  ;;  %v3627_v10 = vrot.slane %v3177_v31, 5  ;;  %v4147_v54 = vld [vmem:[#allocation2 + $0x10] sm:$0xf] }
 0x29c   : > { %5289 = vmatpush.bf16.msra.mxu3 %v7472_v22  ;;  %v3377_v15 = vrot.slane %v3375_v39, 4  ;;  %v3667_v32 = vpack.c.b16 %v3658_v9, %v3657_v23  ;;  %5338 = vmatpush.bf16.msra.mxu0 %v7480_v52  ;;  %v4820_v24 = vld [vmem:[#allocation2 + $0x10] sm:$0xf]  ;;  %v4178_v17 = vshrl.u32 %v4145_v49, 16  ;;  %v4181_v63 = vshll.u32 %v4145_v49, 16 }
 0x29d   : > { %4760 = vmatpush.bf16.msrb.mxu2 %v7455_v51  ;;  %v3400_v3 = vrot.slane %v3398_v14, 5  ;;  %v4192_v55 = vshrl.u32 %v4147_v54, 16  ;;  %v4195_v22 = vshll.u32 %v4147_v54, 16  ;;  %v3628_v29 = vsel %vm8639_vm12, %v6802_v6, %v3627_v10  ;;  %v6833_v51 = vld [vmem:[#allocation2 + $0x88] sm:$0xf] }
 0x29e   : > { %v4853_v5 = vshrl.u32 %v4820_v24, 16  ;;  %v4856_v30 = vshll.u32 %v4820_v24, 16  ;;  %v4180_v60 = vrot.slane %v4178_v17, 4  ;;  %v3660_v9 = vunpack.c.l.b16 %v3628_v29  ;;  %v4836_v52 = vld [vmem:[#allocation2 + $0x14] sm:$0x1] }
 0x29f   : > { %3881 = vmatmul.bf16.gmra.mxu1 %v3665_v27  ;;  %v6825_v27 = vld [vmem:[#allocation2 + $0x68] sm:$0xf]  ;;  %v4149_v14 = vld [vmem:[#allocation2 + $0x18] sm:$0xf] }
 0x2a0   : > { %3930 = vmatmul.bf16.gmra.mxu2 %v6822_v36  ;;  %v7427_v36 = vld [vmem:[#allocation2 + $0x6c] sm:$0xf0]  ;;  %5290 = vmatpush.bf16.msra.mxu3 %v7471_v33  ;;  %v4183_v33 = vrot.slane %v4181_v63, 5  ;;  %v4209_v24 = vshll.u32 %v4149_v14, 16 }
 0x2a1   : > { %4075 = vmatmul.bf16.gmra.mxu3 %v6774_v48  ;;  %v7403_v48 = vld [vmem:[#allocation2 + $0x64] sm:$0xf0]  ;;  %v6826_v18 = vor.u32 %v7427_v36, %v6825_v27  ;;  %v7404_v27 = vld [vmem:[#allocation2 + $0x74] sm:$0xf0]  ;;  %v3462_v36 = vunpack.c.l.b16 %v3359_v45  ;;  %4761 = vmatpush.bf16.msrb.mxu2 %v7454_v0  ;;  %v6785_v45 = vld [vmem:[#allocation2 + $0x80] sm:$0xf] }
 0x2a2   : > { %4124 = vmatmul.bf16.gmra.mxu0 %v3470_v11  ;;  %v3363_v11 = vrot.slane %v3361_v16, 4  ;;  %v6778_v61 = vor.u32 %v7403_v48, %v6777_v46  ;;  %v3380_v46 = vrot.slane %v3378_v34, 5  ;;  %v3391_v48 = vrot.slane %v3389_v59, 4  ;;  %v4402_v0 = vld [vmem:[#allocation2 + $0x10] sm:$0xe] }
 0x2a3   : > { %5339 = vmatpush.bf16.msra.mxu0 %v7479_v19  ;;  %v4184_v31 = vor.u32 %v4183_v33, %v4180_v60  ;;  %v6964_v19 = vrot.slane %v4402_v0, 9  ;;  %v8950_v33 = vld [vmem:[#allocation2 + $0x24] sm:$0x1] }
 0x2a4   : > { %v3367_v4 = vor.u32 %v3366_v37, %v3363_v11  ;;  %v6830_v11 = vor.u32 %v7428_v20, %v6829_v42  ;;  %v6782_v37 = vor.u32 %v7404_v27, %v6781_v43  ;;  %v3381_v62 = vor.u32 %v3380_v46, %v3377_v15  ;;  %v7429_v42 = vld [vmem:[#allocation2 + $0x8c] sm:$0xf0]  ;;  %v4146_v20 = vld [vmem:[#allocation2 + $0xc] sm:$0x1] }
 0x2a5   : > { %v3395_v50 = vor.u32 %v3394_v28, %v3391_v48  ;;  %v4194_v43 = vrot.slane %v4192_v55, 4  ;;  %v4197_v27 = vrot.slane %v4195_v22, 5  ;;  %v4855_v15 = vrot.slane %v4853_v5, 4 }
 0x2a6   : > { %v3368_v25 = vrot.slane %v3367_v4, 4  ;;  %v7493_v4 = vld [vmem:[%s9566_s6 + $0x238] sm:$0xff]  ;;  %v3382_v58 = vrot.slane %v3381_v62, 4  ;;  %v4858_v46 = vrot.slane %v4856_v30, 5 }
 0x2a7   : > { %5606 = vmatpush.bf16.msra.mxu1 %v7493_v4  ;;  %v3396_v47 = vrot.slane %v3395_v50, 4  ;;  %v4198_v57 = vor.u32 %v4197_v27, %v4194_v43  ;;  %v4451_v50 = vrot.slane %v4146_v20, 5  ;;  %v4862_v4 = vshll.u32 %v4836_v52, 16 }
 0x2a8   : > { %v3373_v16 = vsel %vm7885_vm3, %v3368_v25, %v3372_v56  ;;  %v7478_v25 = vld [vmem:[%s9566_s6 + $0x1c0] sm:$0xff]  ;;  %v4821_v56 = vld [vmem:[#allocation2 + $0x18] sm:$0xf]  ;;  %v4859_v49 = vor.u32 %v4858_v46, %v4855_v15  ;;  %v4229_v52 = vshll.u32 %v8950_v33, 16 }
 0x2a9   : > { %v3463_v35 = vunpack.c.l.b16 %v3373_v16  ;;  %v4867_v39 = vshrl.u32 %v4821_v56, 16  ;;  %v4870_v34 = vshll.u32 %v4821_v56, 16  ;;  %v7405_v16 = vld [vmem:[#allocation2 + $0x84] sm:$0xf0]  ;;  %v3401_v7 = vsel %vm7885_vm3, %v3396_v47, %v3400_v3  ;;  %5340 = vmatpush.bf16.msra.mxu0 %v7478_v25  ;;  %v7492_v56 = vld [vmem:[%s9566_s6 + $0x230] sm:$0xff] }
 0x2aa   : > { %v3465_v28 = vunpack.c.l.b16 %v3401_v7  ;;  %v4206_v3 = vshrl.u32 %v4149_v14, 16  ;;  %v4199_v47 = vrot.slane %v4198_v57, 4  ;;  %v4860_v22 = vrot.slane %v4859_v49, 4 }
 0x2ab   : > { %5607 = vmatpush.bf16.msra.mxu1 %v7492_v56 }
 0x2af   : > { %3886 = vmatmul.bf16.gmra.mxu1 %v3666_v12  ;;  %v7470_v12 = vld [vmem:[%s9566_s6 + $0x180] sm:$0xff] }
 0x2b0   : > { %3935 = vmatmul.bf16.gmra.mxu2 %v6826_v18  ;;  %v3472_v18 = vpack.c.b16 %v3463_v35, %v3462_v36  ;;  %5291 = vmatpush.bf16.msra.mxu3 %v7470_v12  ;;  %v4148_v36 = vld [vmem:[#allocation2 + $0x14] sm:$0x1]  ;;  %v4401_v35 = vld [vmem:[#allocation2 + $0x8] sm:$0xe]  ;;  %v4187_v12 = vshll.u32 %v4146_v20, 16 }
 0x2b1   : > { %4080 = vmatmul.bf16.gmra.mxu3 %v6778_v61  ;;  %v3528_v61 = vld [vmem:[#allocation2 + $0x80] sm:$0xe]  ;;  %v4201_v62 = vshll.u32 %v4148_v36, 16  ;;  %v4455_v6 = vrot.slane %v4148_v36, 5 }
 0x2b2   : > { %4129 = vmatmul.bf16.gmra.mxu0 %v3471_v21  ;;  %v3384_v21 = vshll.u32 %v3176_v53, 16  ;;  %v6801_v8 = vrot.slane %v3528_v61, 9  ;;  %v6786_v53 = vor.u32 %v7405_v16, %v6785_v45  ;;  %v4208_v45 = vrot.slane %v4206_v3, 4 }
 0x2b3   : > { %v4203_v17 = vrot.slane %v4201_v62, 5  ;;  %v4456_v29 = vsel %vm8639_vm12, %v6964_v19, %v4455_v6  ;;  %v4211_v16 = vrot.slane %v4209_v24, 5  ;;  %v4231_v6 = vrot.slane %v4229_v52, 5  ;;  %v4155_v24 = vld [vmem:[#allocation2 + $0x30] sm:$0xf] }
 0x2b4   : > { %v3386_v2 = vrot.slane %v3384_v21, 5  ;;  %v3624_v41 = vsel %vm8639_vm12, %v6801_v8, %v3623_v1  ;;  %v6963_v21 = vrot.slane %v4401_v35, 9  ;;  %v4151_v8 = vld [vmem:[#allocation2 + $0x20] sm:$0xf] }
 0x2b5   : > { %v3659_v23 = vunpack.c.l.b16 %v3624_v41  ;;  %v4220_v63 = vshrl.u32 %v4151_v8, 16  ;;  %v4223_v25 = vshll.u32 %v4151_v8, 16  ;;  %v4864_v41 = vrot.slane %v4862_v4, 5 }
 0x2b6   : > { %v3387_v59 = vsel %vm7885_vm3, %v3382_v58, %v3386_v2  ;;  %v4185_v58 = vrot.slane %v4184_v31, 4  ;;  %v4189_v2 = vrot.slane %v4187_v12, 5  ;;  %v4452_v55 = vsel %vm8639_vm12, %v6963_v21, %v4451_v50  ;;  %v4838_v50 = vld [vmem:[#allocation2 + $0x24] sm:$0x1] }
 0x2b7   : > { %v3464_v48 = vunpack.c.l.b16 %v3387_v59  ;;  %v3668_v61 = vpack.c.b16 %v3660_v9, %v3659_v23  ;;  %v4823_v59 = vld [vmem:[#allocation2 + $0x28] sm:$0xf]  ;;  %v4204_v7 = vsel %vm7885_vm3, %v4199_v47, %v4203_v17  ;;  %v4545_v60 = vunpack.c.l.b16 %v4452_v55  ;;  %v3095_v55 = vld [vmem:[#allocation2 + $0x44] sm:$0x1] }
 0x2b8   : > { %v4222_v23 = vrot.slane %v4220_v63, 4  ;;  %v4225_v9 = vrot.slane %v4223_v25, 5  ;;  %v4865_v20 = vsel %vm7885_vm3, %v4860_v22, %v4864_v41  ;;  %v4895_v15 = vshrl.u32 %v4823_v59, 16 }
 0x2b9   : > { %v3473_v1 = vpack.c.b16 %v3465_v28, %v3464_v48  ;;  %v4898_v46 = vshll.u32 %v4823_v59, 16  ;;  %v4514_v28 = vunpack.c.l.b16 %v4204_v7  ;;  %v4212_v0 = vor.u32 %v4211_v16, %v4208_v45  ;;  %v7491_v59 = vld [vmem:[%s9566_s6 + $0x228] sm:$0xff] }
 0x2ba   : > { %v5124_v31 = vunpack.c.l.b16 %v4865_v20  ;;  %v4897_v19 = vrot.slane %v4895_v15, 4  ;;  %v4463_v63 = vrot.slane %v8950_v33, 5  ;;  %v4890_v56 = vshll.u32 %v4838_v50, 16  ;;  %5608 = vmatpush.bf16.msra.mxu1 %v7491_v59 }
 0x2bb   : > { %v4900_v49 = vrot.slane %v4898_v46, 5 }
 0x2bd   : > { %v4901_v22 = vor.u32 %v4900_v49, %v4897_v19 }
 0x2bf   : > { %3891 = vmatmul.bf16.gmra.mxu1 %v3667_v32  ;;  %v4869_v32 = vrot.slane %v4867_v39, 4  ;;  %v4190_v39 = vsel %vm7885_vm3, %v4185_v58, %v4189_v2 }
 0x2c0   : > { %3940 = vmatmul.bf16.gmra.mxu2 %v6830_v11  ;;  %v4872_v11 = vrot.slane %v4870_v34, 5  ;;  %v8946_v34 = vld [vmem:[#allocation2 + $0x1c] sm:$0x1]  ;;  %v4513_v48 = vunpack.c.l.b16 %v4190_v39  ;;  %v4251_v39 = vshll.u32 %v4155_v24, 16 }
 0x2c1   : > { %4085 = vmatmul.bf16.gmra.mxu3 %v6782_v37  ;;  %v6834_v37 = vor.u32 %v7429_v42, %v6833_v51  ;;  %v4822_v51 = vld [vmem:[#allocation2 + $0x20] sm:$0xf]  ;;  %v4546_v42 = vunpack.c.l.b16 %v4456_v29  ;;  %v4215_v35 = vshll.u32 %v8946_v34, 16  ;;  %v4459_v2 = vrot.slane %v8946_v34, 5 }
 0x2c2   : > { %4134 = vmatmul.bf16.gmra.mxu0 %v3472_v18  ;;  %v4837_v18 = vld [vmem:[#allocation2 + $0x1c] sm:$0x1]  ;;  %v4873_v10 = vor.u32 %v4872_v11, %v4869_v32  ;;  %v4881_v43 = vshrl.u32 %v4822_v51, 16  ;;  %v4884_v27 = vshll.u32 %v4822_v51, 16  ;;  %v2946_v32 = vrot.slane %v8738_v26, 4 }
 0x2c3   : > { %v4876_v54 = vshll.u32 %v4837_v18, 16  ;;  %v7045_v11 = vld [vmem:[#allocation2 + $0x10] sm:$0xf]  ;;  %v4403_v18 = vld [vmem:[#allocation2 + $0x18] sm:$0xe]  ;;  %v4561_v21 = vpack.c.b16 %v4546_v42, %v4545_v60  ;;  %v4217_v14 = vrot.slane %v4215_v35, 5  ;;  %v4529_v4 = vpack.c.b16 %v4514_v28, %v4513_v48 }
 0x2c4   : > { %v4874_v5 = vrot.slane %v4873_v10, 4  ;;  %v4883_v57 = vrot.slane %v4881_v43, 4  ;;  %v4886_v62 = vrot.slane %v4884_v27, 5  ;;  %v4839_v10 = vld [vmem:[#allocation2 + $0x2c] sm:$0x1]  ;;  %v6965_v58 = vrot.slane %v4403_v18, 9 }
 0x2c5   : > { %v4878_v30 = vrot.slane %v4876_v54, 5  ;;  %v4153_v26 = vld [vmem:[#allocation2 + $0x28] sm:$0xf]  ;;  %v4904_v41 = vshll.u32 %v4839_v10, 16  ;;  %v4248_v51 = vshrl.u32 %v4155_v24, 16  ;;  %v3096_v45 = vsel %vm8605_vm10, %v2946_v32, %v3095_v55 }
 0x2c6   : > { %v4887_v25 = vor.u32 %v4886_v62, %v4883_v57  ;;  %v4234_v29 = vshrl.u32 %v4153_v26, 16  ;;  %v4460_v16 = vsel %vm8639_vm12, %v6965_v58, %v4459_v2  ;;  %3097 = vst [vmem:[#allocation2 + $0x44] sm:$0x1] %v3096_v45  ;;  %v4902_v42 = vrot.slane %v4901_v22, 4  ;;  %v8976_v48 = vld [vmem:[#allocation2 + $0x2c] sm:$0x1] }
 0x2c7   : > { %v4879_v36 = vsel %vm7885_vm3, %v4874_v5, %v4878_v30  ;;  %v4237_v5 = vshll.u32 %v4153_v26, 16  ;;  %v4906_v20 = vrot.slane %v4904_v41, 5  ;;  %v4547_v46 = vunpack.c.l.b16 %v4460_v16  ;;  %v8978_v28 = vld [vmem:[#allocation2 + $0x34] sm:$0x1]  ;;  %v7049_v10 = vld [vmem:[#allocation2 + $0x20] sm:$0xf] }
 0x2c8   : > { %v5125_v12 = vunpack.c.l.b16 %v4879_v36  ;;  %v4888_v33 = vrot.slane %v4887_v25, 4  ;;  %v4236_v43 = vrot.slane %v4234_v29, 4  ;;  %v4825_v36 = vld [vmem:[#allocation2 + $0x38] sm:$0xf]  ;;  %v4253_v52 = vrot.slane %v4251_v39, 5 }
 0x2c9   : > { %v4239_v27 = vrot.slane %v4237_v5, 5  ;;  %v4923_v57 = vshrl.u32 %v4825_v36, 16  ;;  %v4926_v62 = vshll.u32 %v4825_v36, 16  ;;  %v4243_v50 = vshll.u32 %v8976_v48, 16  ;;  %v4405_v26 = vld [vmem:[#allocation2 + $0x28] sm:$0xe] }
 0x2ca   : > { %v5140_v17 = vpack.c.b16 %v5125_v12, %v5124_v31  ;;  %v4257_v19 = vshll.u32 %v8978_v28, 16  ;;  %v7463_v24 = vld [vmem:[#allocation2 + $0x24] sm:$0xf0]  ;;  %v4841_v29 = vld [vmem:[#allocation2 + $0x3c] sm:$0x1]  ;;  %v4467_v39 = vrot.slane %v8976_v48, 5 }
 0x2cb   : > { %v4928_v25 = vrot.slane %v4926_v62, 5  ;;  %v4245_v22 = vrot.slane %v4243_v50, 5  ;;  %v4159_v36 = vld [vmem:[#allocation2 + $0x40] sm:$0xf] }
 0x2cc   : > { %v4259_v41 = vrot.slane %v4257_v19, 5  ;;  %v4826_v50 = vld [vmem:[#allocation2 + $0x40] sm:$0xf] }
 0x2cf   : > { %3896 = vmatmul.bf16.gmra.mxu1 %v3668_v61  ;;  %v4404_v61 = vld [vmem:[#allocation2 + $0x20] sm:$0xe] }
 0x2d0   : > { %3945 = vmatmul.bf16.gmra.mxu2 %v6834_v37  ;;  %v7462_v37 = vld [vmem:[#allocation2 + $0x14] sm:$0xf0]  ;;  %v6966_v3 = vrot.slane %v4404_v61, 9 }
 0x2d1   : > { %4090 = vmatmul.bf16.gmra.mxu3 %v6786_v53  ;;  %v4226_v53 = vor.u32 %v4225_v9, %v4222_v23  ;;  %v7046_v8 = vor.u32 %v7462_v37, %v7045_v11  ;;  %v4892_v23 = vrot.slane %v4890_v56, 5  ;;  %v4824_v9 = vld [vmem:[#allocation2 + $0x30] sm:$0xf] }
 0x2d2   : > { %4139 = vmatmul.bf16.gmra.mxu0 %v3473_v1  ;;  %v4213_v1 = vrot.slane %v4212_v0, 4  ;;  %v4464_v60 = vsel %vm8639_vm12, %v6966_v3, %v4463_v63  ;;  %v4250_v0 = vrot.slane %v4248_v51, 4  ;;  %v4912_v31 = vshll.u32 %v4824_v9, 16 }
 0x2d3   : > { %v4227_v54 = vrot.slane %v4226_v53, 4  ;;  %v4909_v53 = vshrl.u32 %v4824_v9, 16  ;;  %v4548_v18 = vunpack.c.l.b16 %v4464_v60  ;;  %v4893_v61 = vsel %vm7885_vm3, %v4888_v33, %v4892_v23 }
 0x2d4   : > { %v4218_v34 = vsel %vm7885_vm3, %v4213_v1, %v4217_v14  ;;  %v4240_v14 = vor.u32 %v4239_v27, %v4236_v43  ;;  %v4914_v2 = vrot.slane %v4912_v31, 5  ;;  %v4925_v63 = vrot.slane %v4923_v57, 4 }
 0x2d5   : > { %v4232_v7 = vsel %vm7885_vm3, %v4227_v54, %v4231_v6  ;;  %v8974_v15 = vunpack.c.l.b16 %v4218_v34  ;;  %v4406_v54 = vld [vmem:[#allocation2 + $0x30] sm:$0xe]  ;;  %v4911_v58 = vrot.slane %v4909_v53, 4  ;;  %v4562_v3 = vpack.c.b16 %v4548_v18, %v4547_v46  ;;  %v4157_v34 = vld [vmem:[#allocation2 + $0x38] sm:$0xf]  ;;  %v7490_v53 = vld [vmem:[%s9566_s6 + $0x220] sm:$0xff] }
 0x2d6   : > { %v4516_v37 = vunpack.c.l.b16 %v4232_v7  ;;  %v4241_v55 = vrot.slane %v4240_v14, 4  ;;  %v6967_v51 = vrot.slane %v4405_v26, 9  ;;  %v6968_v45 = vrot.slane %v4406_v54, 9  ;;  %5609 = vmatpush.bf16.msra.mxu1 %v7490_v53  ;;  %v4827_v26 = vld [vmem:[#allocation2 + $0x48] sm:$0xf] }
 0x2d7   : > { %v4471_v7 = vrot.slane %v8978_v28, 5  ;;  %v4915_v60 = vor.u32 %v4914_v2, %v4911_v58  ;;  %v7050_v9 = vor.u32 %v7463_v24, %v7049_v10  ;;  %v4276_v18 = vshrl.u32 %v4159_v36, 16  ;;  %v9008_v10 = vld [vmem:[#allocation2 + $0x3c] sm:$0x1]  ;;  %v9022_v53 = vld [vmem:[#allocation2 + $0x4c] sm:$0x1] }
 0x2d8   : > { %v4530_v6 = vpack.c.b16 %v4516_v37, %v8974_v15  ;;  %v4265_v15 = vshll.u32 %v4157_v34, 16  ;;  %v4246_v48 = vsel %vm7885_vm3, %v4241_v55, %v4245_v22  ;;  %v4468_v28 = vsel %vm8639_vm12, %v6967_v51, %v4467_v39 }
 0x2d9   : > { %v9004_v14 = vunpack.c.l.b16 %v4246_v48  ;;  %v4940_v55 = vshll.u32 %v4826_v50, 16 }
 0x2da   : > { %v4267_v62 = vrot.slane %v4265_v15, 5  ;;  %v9019_v15 = vld [vmem:[#allocation2 + $0x44] sm:$0x1] }
 0x2dc   : > { %v3862_v47 = vpop.f32.mrf.mxu1 }
 0x2df   : > { %v4105_v30 = vpop.f32.mrf.mxu0  ;;  %4713 = vmatmul.bf16.vlgmr.msrb.gmra.mxu1 %v4529_v4  ;;  %v4907_v4 = vsel %vm7885_vm3, %v4902_v42, %v4906_v20  ;;  %v4929_v42 = vor.u32 %v4928_v25, %v4925_v63  ;;  %v4932_v20 = vshll.u32 %v4841_v29, 16  ;;  %v7464_v63 = vld [vmem:[#allocation2 + $0x34] sm:$0xf0]  ;;  %v4271_v29 = vshll.u32 %v9008_v10, 16 }
 0x2e0   : > { %4762 = vmatmul.bf16.vlgmr.msrb.gmra.mxu2 %v4561_v21  ;;  %v5127_v56 = vunpack.c.l.b16 %v4907_v4 }
 0x2e1   : > { %5292 = vmatmul.bf16.vlgmr.msra.gmra.mxu3 %v7046_v8  ;;  %v4254_v8 = vor.u32 %v4253_v52, %v4250_v0  ;;  %v4930_v31 = vrot.slane %v4929_v42, 4 }
 0x2e2   : > { %5341 = vmatmul.bf16.vlgmr.msra.gmra.mxu0 %v5140_v17  ;;  %v4840_v17 = vld [vmem:[#allocation2 + $0x34] sm:$0x1] }
 0x2e3   : > { %v3911_v35 = vpop.f32.mrf.mxu2  ;;  %v4918_v33 = vshll.u32 %v4840_v17, 16  ;;  %v7053_v17 = vld [vmem:[#allocation2 + $0x30] sm:$0xf] }
 0x2e4   : > { %v3912_v32 = vadd.f32 %v3911_v35, %v3862_v47  ;;  %v4056_v11 = vpop.f32.mrf.mxu3  ;;  %v3864_v12 = vpop.f32.mrf.mxu1  ;;  %v5126_v47 = vunpack.c.l.b16 %v4893_v61  ;;  %v4262_v35 = vshrl.u32 %v4157_v34, 16  ;;  %v4279_v61 = vshll.u32 %v4159_v36, 16  ;;  %v4407_v34 = vld [vmem:[#allocation2 + $0x38] sm:$0xe] }
 0x2e5   : > { %v4920_v37 = vrot.slane %v4918_v33, 5  ;;  %v4408_v33 = vld [vmem:[#allocation2 + $0x40] sm:$0xe]  ;;  %v4273_v36 = vrot.slane %v4271_v29, 5 }
 0x2e6   : > { %v4057_v21 = vadd.f32 %v4056_v11, %v3912_v32  ;;  %v5141_v27 = vpack.c.b16 %v5127_v56, %v5126_v47  ;;  %v4472_v32 = vsel %vm8639_vm12, %v6968_v45, %v4471_v7  ;;  %v4916_v11 = vrot.slane %v4915_v60, 4 }
 0x2e7   : > { %v4107_v49 = vpop.f32.mrf.mxu0  ;;  %v4264_v57 = vrot.slane %v4262_v35, 4  ;;  %v4281_v24 = vrot.slane %v4279_v61, 5  ;;  %v4937_v56 = vshrl.u32 %v4826_v50, 16  ;;  %v7054_v7 = vor.u32 %v7464_v63, %v7053_v17 }
 0x2e8   : > { %v8986_v1 = vadd.f32 %v4105_v30, %v4057_v21  ;;  %v4255_v30 = vrot.slane %v4254_v8, 4  ;;  %v4549_v8 = vunpack.c.l.b16 %v4468_v28  ;;  %v4921_v58 = vsel %vm7885_vm3, %v4916_v11, %v4920_v37 }
 0x2e9   : > { %v4268_v25 = vor.u32 %v4267_v62, %v4264_v57  ;;  %v5128_v39 = vunpack.c.l.b16 %v4921_v58  ;;  %v4939_v42 = vrot.slane %v4937_v56, 4  ;;  %v6969_v35 = vrot.slane %v4407_v34, 9  ;;  %v7489_v58 = vld [vmem:[%s9566_s6 + $0x218] sm:$0xff]  ;;  %v4828_v56 = vld [vmem:[#allocation2 + $0x60] sm:$0xf] }
 0x2ea   : > { %v4260_v0 = vsel %vm7885_vm3, %v4255_v30, %v4259_v41  ;;  %v4160_v41 = vld [vmem:[#allocation2 + $0x44] sm:$0x1]  ;;  %v4954_v30 = vshll.u32 %v4827_v26, 16  ;;  %v4475_v11 = vrot.slane %v9008_v10, 5  ;;  %v6970_v37 = vrot.slane %v4408_v33, 9  ;;  %5610 = vmatpush.bf16.msra.mxu1 %v7489_v58 }
 0x2eb   : > { %v3913_v5 = vpop.f32.mrf.mxu2  ;;  %v9006_v4 = vunpack.c.l.b16 %v4260_v0  ;;  %v4479_v61 = vrot.slane %v4160_v41, 5 }
 0x2ec   : > { %v3914_v16 = vadd.f32 %v3913_v5, %v3864_v12  ;;  %v4058_v59 = vpop.f32.mrf.mxu3  ;;  %v3867_v23 = vpop.f32.mrf.mxu1  ;;  %v4934_v12 = vrot.slane %v4932_v20, 5  ;;  %v4951_v5 = vshrl.u32 %v4827_v26, 16  ;;  %v4942_v20 = vrot.slane %v4940_v55, 5 }
 0x2ed   : > { %v4956_v48 = vrot.slane %v4954_v30, 5  ;;  %v4829_v30 = vld [vmem:[#allocation2 + $0x68] sm:$0xf] }
 0x2ee   : > { %v4059_v43 = vadd.f32 %v4058_v59, %v3914_v16  ;;  %v4935_v2 = vsel %vm7885_vm3, %v4930_v31, %v4934_v12  ;;  %v4531_v16 = vpack.c.b16 %v9006_v4, %v9004_v14  ;;  %v4163_v31 = vld [vmem:[#allocation2 + $0x60] sm:$0xf]  ;;  %v4943_v50 = vor.u32 %v4942_v20, %v4939_v42  ;;  %v7465_v42 = vld [vmem:[#allocation2 + $0x44] sm:$0xf0] }
 0x2ef   : > { %v4110_v46 = vpop.f32.mrf.mxu0  ;;  %4718 = vmatmul.bf16.gmra.mxu1 %v4530_v6  ;;  %v4550_v6 = vunpack.c.l.b16 %v4472_v32  ;;  %v5129_v45 = vunpack.c.l.b16 %v4935_v2  ;;  %v4307_v10 = vshll.u32 %v4163_v31, 16  ;;  %v4476_v2 = vsel %vm8639_vm12, %v6969_v35, %v4475_v11 }
 0x2f0   : > { %v8997_v52 = vadd.f32 %v4107_v49, %v4059_v43  ;;  %4767 = vmatmul.bf16.gmra.mxu2 %v4562_v3  ;;  %v4278_v3 = vrot.slane %v4276_v18, 4  ;;  %v4161_v43 = vld [vmem:[#allocation2 + $0x58] sm:$0xf]  ;;  %v4944_v63 = vrot.slane %v4943_v50, 4 }
 0x2f1   : > { %5297 = vmatmul.bf16.gmra.mxu3 %v7050_v9  ;;  %v4563_v59 = vpack.c.b16 %v4550_v6, %v4549_v8  ;;  %v4285_v9 = vshll.u32 %v4160_v41, 16  ;;  %v5142_v32 = vpack.c.b16 %v5129_v45, %v5128_v39  ;;  %v4290_v57 = vshrl.u32 %v4161_v43, 16 }
 0x2f2   : > { %5346 = vmatmul.bf16.gmra.mxu0 %v5141_v27  ;;  %v4282_v60 = vor.u32 %v4281_v24, %v4278_v3  ;;  %v4293_v62 = vshll.u32 %v4161_v43, 16  ;;  %v4960_v8 = vshll.u32 %v9022_v53, 16  ;;  %v4304_v6 = vshrl.u32 %v4163_v31, 16 }
 0x2f3   : > { %v3916_v21 = vpop.f32.mrf.mxu2  ;;  %v4287_v14 = vrot.slane %v4285_v9, 5  ;;  %v4480_v3 = vsel %vm8639_vm12, %v6970_v37, %v4479_v61  ;;  %v4292_v24 = vrot.slane %v4290_v57, 4  ;;  %v7057_v9 = vld [vmem:[#allocation2 + $0x40] sm:$0xf]  ;;  %v4965_v43 = vshrl.u32 %v4828_v56, 16 }
 0x2f4   : > { %v3917_v19 = vadd.f32 %v3916_v21, %v3867_v23  ;;  %v4061_v49 = vpop.f32.mrf.mxu3  ;;  %v3869_v54 = vpop.f32.mrf.mxu1  ;;  %v4269_v23 = vrot.slane %v4268_v25, 4  ;;  %v4283_v18 = vrot.slane %v4282_v60, 4  ;;  %v4962_v41 = vrot.slane %v4960_v8, 5  ;;  %v9041_v60 = vld [vmem:[#allocation2 + $0x64] sm:$0x1] }
 0x2f5   : > { %v4306_v29 = vrot.slane %v4304_v6, 4  ;;  %v4313_v37 = vshll.u32 %v9041_v60, 16  ;;  %v4409_v61 = vld [vmem:[#allocation2 + $0x58] sm:$0xe]  ;;  %v9051_v8 = vld [vmem:[#allocation2 + $0x64] sm:$0x1] }
 0x2f6   : > { %v4062_v47 = vadd.f32 %v4061_v49, %v3917_v19  ;;  %v4946_v19 = vshll.u32 %v9019_v15, 16  ;;  %v4288_v17 = vsel %vm7885_vm3, %v4283_v18, %v4287_v14  ;;  %v7058_v18 = vor.u32 %v7465_v42, %v7057_v9 }
 0x2f7   : > { %v4112_v22 = vpop.f32.mrf.mxu0  ;;  %v4967_v14 = vrot.slane %v4965_v43, 4  ;;  %v7488_v43 = vld [vmem:[%s9566_s6 + $0x210] sm:$0xff] }
 0x2f8   : > { %v9015_v51 = vadd.f32 %v4110_v46, %v4062_v47  ;;  %v4953_v46 = vrot.slane %v4951_v5, 4  ;;  %v4295_v47 = vrot.slane %v4293_v62, 5  ;;  %v4948_v25 = vrot.slane %v4946_v19, 5  ;;  %5611 = vmatpush.bf16.msra.mxu1 %v7488_v43 }
 0x2f9   : > { %v4309_v5 = vrot.slane %v4307_v10, 5 }
 0x2fa   : > { %v4957_v4 = vor.u32 %v4956_v48, %v4953_v46  ;;  %v4296_v20 = vor.u32 %v4295_v47, %v4292_v24  ;;  %v4949_v35 = vsel %vm7885_vm3, %v4944_v63, %v4948_v25  ;;  %v4979_v46 = vshrl.u32 %v4829_v30, 16  ;;  %v9053_v47 = vld [vmem:[#allocation2 + $0x6c] sm:$0x1] }
 0x2fb   : > { %v3918_v27 = vpop.f32.mrf.mxu2  ;;  %v4982_v48 = vshll.u32 %v4829_v30, 16  ;;  %v4310_v11 = vor.u32 %v4309_v5, %v4306_v29  ;;  %v5130_v19 = vunpack.c.l.b16 %v4949_v35  ;;  %v6971_v24 = vrot.slane %v4409_v61, 9  ;;  %v4830_v61 = vld [vmem:[#allocation2 + $0x70] sm:$0xf] }
 0x2fc   : > { %v3919_v0 = vadd.f32 %v3918_v27, %v3869_v54  ;;  %v4063_v28 = vpop.f32.mrf.mxu3  ;;  %v3872_v12 = vpop.f32.mrf.mxu1  ;;  %v4274_v54 = vsel %vm7885_vm3, %v4269_v23, %v4273_v36  ;;  %v4520_v23 = vunpack.c.l.b16 %v4288_v17  ;;  %v4968_v27 = vshll.u32 %v4828_v56, 16 }
 0x2fd   : > { %v4519_v34 = vunpack.c.l.b16 %v4274_v54  ;;  %v4297_v62 = vrot.slane %v4296_v20, 4  ;;  %v4981_v6 = vrot.slane %v4979_v46, 4  ;;  %v4984_v10 = vrot.slane %v4982_v48, 5  ;;  %v4165_v54 = vld [vmem:[#allocation2 + $0x68] sm:$0xf] }
 0x2fe   : > { %v4064_v21 = vadd.f32 %v4063_v28, %v3919_v0  ;;  %v4970_v50 = vrot.slane %v4968_v27, 5  ;;  %v4974_v5 = vshll.u32 %v9051_v8, 16  ;;  %v4318_v30 = vshrl.u32 %v4165_v54, 16 }
 0x2ff   : > { %v4115_v49 = vpop.f32.mrf.mxu0  ;;  %4723 = vmatmul.bf16.gmra.mxu1 %v4531_v16  ;;  %v4551_v16 = vunpack.c.l.b16 %v4476_v2  ;;  %v4532_v57 = vpack.c.b16 %v4520_v23, %v4519_v34 }
 0x300   : > { %v9026_v26 = vadd.f32 %v4112_v22, %v4064_v21  ;;  %4772 = vmatmul.bf16.gmra.mxu2 %v4563_v59  ;;  %v4958_v22 = vrot.slane %v4957_v4, 4  ;;  %v4552_v59 = vunpack.c.l.b16 %v4480_v3  ;;  %v4410_v21 = vld [vmem:[#allocation2 + $0x60] sm:$0xe]  ;;  %v4311_v3 = vrot.slane %v4310_v11, 4 }
 0x301   : > { %5302 = vmatmul.bf16.gmra.mxu3 %v7054_v7  ;;  %v9039_v7 = vld [vmem:[#allocation2 + $0x5c] sm:$0x1]  ;;  %v6972_v56 = vrot.slane %v4410_v21, 9  ;;  %v4971_v29 = vor.u32 %v4970_v50, %v4967_v14  ;;  %v4320_v35 = vrot.slane %v4318_v30, 4  ;;  %v9078_v50 = vld [vmem:[#allocation2 + $0x74] sm:$0x1] }
 0x302   : > { %5351 = vmatmul.bf16.gmra.mxu0 %v5142_v32  ;;  %v4963_v28 = vsel %vm7885_vm3, %v4958_v22, %v4962_v41  ;;  %v4299_v32 = vshll.u32 %v9039_v7, 16  ;;  %v4483_v25 = vrot.slane %v9039_v7, 5  ;;  %v4167_v22 = vld [vmem:[#allocation2 + $0x70] sm:$0xf] }
 0x303   : > { %v3921_v55 = vpop.f32.mrf.mxu2  ;;  %v5131_v4 = vunpack.c.l.b16 %v4963_v28  ;;  %v4332_v7 = vshrl.u32 %v4167_v22, 16  ;;  %v4335_v9 = vshll.u32 %v4167_v22, 16  ;;  %v4972_v27 = vrot.slane %v4971_v29, 4 }
 0x304   : > { %v3922_v39 = vadd.f32 %v3921_v55, %v3872_v12  ;;  %v4066_v45 = vpop.f32.mrf.mxu3  ;;  %v3874_v33 = vpop.f32.mrf.mxu1  ;;  %v4564_v12 = vpack.c.b16 %v4552_v59, %v4551_v16  ;;  %v4301_v2 = vrot.slane %v4299_v32, 5  ;;  %v4487_v55 = vrot.slane %v9041_v60, 5  ;;  %v9072_v32 = vld [vmem:[#allocation2 + $0x6c] sm:$0x1] }
 0x305   : > { %v5143_v34 = vpack.c.b16 %v5131_v4, %v5130_v19  ;;  %v4985_v16 = vor.u32 %v4984_v10, %v4981_v6  ;;  %v4988_v59 = vshll.u32 %v9053_v47, 16  ;;  %v4484_v20 = vsel %vm8639_vm12, %v6971_v24, %v4483_v25  ;;  %v4831_v19 = vld [vmem:[#allocation2 + $0x78] sm:$0xf]  ;;  %v4411_v24 = vld [vmem:[#allocation2 + $0x68] sm:$0xe] }
 0x306   : > { %v4067_v36 = vadd.f32 %v4066_v45, %v3922_v39  ;;  %v4321_v39 = vshll.u32 %v4165_v54, 16  ;;  %v4488_v48 = vsel %vm8639_vm12, %v6972_v56, %v4487_v55  ;;  %v4553_v14 = vunpack.c.l.b16 %v4484_v20  ;;  %v7466_v56 = vld [vmem:[#allocation2 + $0x64] sm:$0xf0]  ;;  %v9091_v20 = vld [vmem:[#allocation2 + $0x74] sm:$0x1] }
 0x307   : > { %v4117_v0 = vpop.f32.mrf.mxu0  ;;  %v4990_v28 = vrot.slane %v4988_v59, 5  ;;  %v4554_v6 = vunpack.c.l.b16 %v4488_v48  ;;  %v4341_v22 = vshll.u32 %v9078_v50, 16  ;;  %v5010_v29 = vshll.u32 %v4831_v19, 16 }
 0x308   : > { %v9049_v31 = vadd.f32 %v4115_v49, %v4067_v36  ;;  %v4315_v49 = vrot.slane %v4313_v37, 5  ;;  %v4976_v36 = vrot.slane %v4974_v5, 5  ;;  %v4323_v46 = vrot.slane %v4321_v39, 5 }
 0x309   : > { %v4334_v37 = vrot.slane %v4332_v7, 4  ;;  %v3010_v5 = vrot.slane %v8861_v38, 4  ;;  %v6973_v7 = vrot.slane %v4411_v24, 9  ;;  %v5012_v48 = vrot.slane %v5010_v29, 5 }
 0x30a   : > { %v4316_v60 = vsel %vm7885_vm3, %v4311_v3, %v4315_v49  ;;  %v4977_v10 = vsel %vm7885_vm3, %v4972_v27, %v4976_v36  ;;  %v4324_v54 = vor.u32 %v4323_v46, %v4320_v35  ;;  %v7061_v3 = vld [vmem:[#allocation2 + $0x60] sm:$0xf]  ;;  %v4169_v36 = vld [vmem:[#allocation2 + $0x78] sm:$0xf] }
 0x30b   : > { %v3923_v58 = vpop.f32.mrf.mxu2  ;;  %v9076_v21 = vunpack.c.l.b16 %v4316_v60  ;;  %v7062_v60 = vor.u32 %v7466_v56, %v7061_v3 }
 0x30c   : > { %v3924_v17 = vadd.f32 %v3923_v58, %v3874_v33  ;;  %v4068_v63 = vpop.f32.mrf.mxu3  ;;  %v3877_v41 = vpop.f32.mrf.mxu1  ;;  %v4302_v33 = vsel %vm7885_vm3, %v4297_v62, %v4301_v2  ;;  %v4327_v58 = vshll.u32 %v9072_v32, 16 }
 0x30e   : > { %v4069_v45 = vadd.f32 %v4068_v63, %v3924_v17  ;;  %v4993_v17 = vshrl.u32 %v4830_v61, 16  ;;  %v4996_v63 = vshll.u32 %v4830_v61, 16  ;;  %v4329_v59 = vrot.slane %v4327_v58, 5 }
 0x30f   : > { %v4120_v23 = vpop.f32.mrf.mxu0  ;;  %4728 = vmatmul.bf16.gmra.mxu1 %v4532_v57  ;;  %v4495_v61 = vrot.slane %v9078_v50, 5 }
 0x310   : > { %v9061_v42 = vadd.f32 %v4117_v0, %v4069_v45  ;;  %4777 = vmatmul.bf16.gmra.mxu2 %v4564_v12  ;;  %v4986_v0 = vrot.slane %v4985_v16, 4  ;;  %v4337_v12 = vrot.slane %v4335_v9, 5  ;;  %v5132_v45 = vunpack.c.l.b16 %v4977_v10 }
 0x311   : > { %5307 = vmatmul.bf16.gmra.mxu3 %v7058_v18  ;;  %v9074_v18 = vunpack.c.l.b16 %v4302_v33  ;;  %v4325_v16 = vrot.slane %v4324_v54, 4  ;;  %v4412_v33 = vld [vmem:[#allocation2 + $0x70] sm:$0xe]  ;;  %v4565_v9 = vpack.c.b16 %v4554_v6, %v4553_v14  ;;  %v4995_v43 = vrot.slane %v4993_v17, 4  ;;  %v3143_v6 = vld [vmem:[#allocation2 + $0x94] sm:$0x1] }
 0x312   : > { %5356 = vmatmul.bf16.gmra.mxu0 %v5143_v34  ;;  %v4991_v49 = vsel %vm7885_vm3, %v4986_v0, %v4990_v28  ;;  %v4338_v55 = vor.u32 %v4337_v12, %v4334_v37  ;;  %v4998_v27 = vrot.slane %v4996_v63, 5  ;;  %v4171_v0 = vld [vmem:[#allocation2 + $0x80] sm:$0xf]  ;;  %v4491_v37 = vrot.slane %v9072_v32, 5  ;;  %v7487_v63 = vld [vmem:[%s9566_s6 + $0x208] sm:$0xff] }
 0x313   : > { %v3926_v11 = vpop.f32.mrf.mxu2  ;;  %v4533_v39 = vpack.c.b16 %v9076_v21, %v9074_v18  ;;  %v5133_v34 = vunpack.c.l.b16 %v4991_v49  ;;  %v6974_v12 = vrot.slane %v4412_v33, 9  ;;  %v5002_v21 = vshll.u32 %v9091_v20, 16  ;;  %5612 = vmatpush.bf16.msra.mxu1 %v7487_v63  ;;  %v9116_v33 = vld [vmem:[#allocation2 + $0x7c] sm:$0x1] }
 0x314   : > { %v3927_v57 = vadd.f32 %v3926_v11, %v3877_v41  ;;  %v4071_v62 = vpop.f32.mrf.mxu3  ;;  %v3879_v4 = vpop.f32.mrf.mxu1  ;;  %v5007_v41 = vshrl.u32 %v4831_v19, 16  ;;  %v4339_v38 = vrot.slane %v4338_v55, 4  ;;  %v4346_v14 = vshrl.u32 %v4169_v36, 16 }
 0x315   : > { %v5144_v18 = vpack.c.b16 %v5133_v34, %v5132_v45  ;;  %v4349_v19 = vshll.u32 %v4169_v36, 16  ;;  %v4999_v54 = vor.u32 %v4998_v27, %v4995_v43  ;;  %v4360_v58 = vshrl.u32 %v4171_v0, 16  ;;  %v4172_v36 = vld [vmem:[#allocation2 + $0x84] sm:$0x1] }
 0x316   : > { %v4072_v2 = vadd.f32 %v4071_v62, %v3927_v57  ;;  %v5009_v46 = vrot.slane %v5007_v41, 4  ;;  %v9095_v57 = vld [vmem:[#allocation2 + $0x7c] sm:$0x1]  ;;  %v3144_v50 = vsel %vm8605_vm10, %v3010_v5, %v3143_v6  ;;  %v4330_v24 = vsel %vm7885_vm3, %v4325_v16, %v4329_v59 }
 0x317   : > { %v4122_v25 = vpop.f32.mrf.mxu0  ;;  %v5016_v32 = vshll.u32 %v9095_v57, 16  ;;  %v4492_v56 = vsel %vm8639_vm12, %v6973_v7, %v4491_v37  ;;  %v4496_v13 = vsel %vm8639_vm12, %v6974_v12, %v4495_v61  ;;  %v4351_v55 = vrot.slane %v4349_v19, 5  ;;  %3145 = vst [vmem:[#allocation2 + $0x94] sm:$0x1] %v3144_v50 }
 0x318   : > { %v9087_v30 = vadd.f32 %v4120_v23, %v4072_v2  ;;  %v4343_v23 = vrot.slane %v4341_v22, 5  ;;  %v4363_v2 = vshll.u32 %v4171_v0, 16  ;;  %v5013_v3 = vor.u32 %v5012_v48, %v5009_v46 }
 0x319   : > { %v5000_v22 = vrot.slane %v4999_v54, 4  ;;  %v5004_v41 = vrot.slane %v5002_v21, 5  ;;  %v4362_v29 = vrot.slane %v4360_v58, 4  ;;  %v9114_v34 = vunpack.c.l.b16 %v4330_v24  ;;  %v7065_v54 = vld [vmem:[#allocation2 + $0x70] sm:$0xf] }
 0x31a   : > { %v4344_v17 = vsel %vm7885_vm3, %v4339_v38, %v4343_v23  ;;  %v4365_v5 = vrot.slane %v4363_v2, 5  ;;  %v5014_v16 = vrot.slane %v5013_v3, 4  ;;  %v5018_v59 = vrot.slane %v5016_v32, 5  ;;  %v4414_v58 = vld [vmem:[#allocation2 + $0x80] sm:$0xe] }
 0x31b   : > { %v3928_v35 = vpop.f32.mrf.mxu2  ;;  %v4555_v43 = vunpack.c.l.b16 %v4492_v56  ;;  %v4556_v27 = vunpack.c.l.b16 %v4496_v13  ;;  %v9126_v32 = vld [vmem:[#allocation2 + $0x84] sm:$0x1] }
 0x31c   : > { %v3929_v28 = vadd.f32 %v3928_v35, %v3879_v4  ;;  %v4073_v11 = vpop.f32.mrf.mxu3  ;;  %v3882_v62 = vpop.f32.mrf.mxu1  ;;  %v4833_v35 = vld [vmem:[#allocation2 + $0x88] sm:$0xf]  ;;  %v4366_v37 = vor.u32 %v4365_v5, %v4362_v29  ;;  %v5019_v61 = vsel %vm7885_vm3, %v5014_v16, %v5018_v59  ;;  %v9129_v16 = vld [vmem:[#allocation2 + $0x8c] sm:$0x1]  ;;  %v5030_v59 = vshll.u32 %v9126_v32, 16 }
 0x31d   : > { %v5035_v21 = vshrl.u32 %v4833_v35, 16  ;;  %v5135_v63 = vunpack.c.l.b16 %v5019_v61  ;;  %v7486_v61 = vld [vmem:[%s9566_s6 + $0x200] sm:$0xff] }
 0x31e   : > { %v4074_v10 = vadd.f32 %v4073_v11, %v3929_v28  ;;  %v5005_v28 = vsel %vm7885_vm3, %v5000_v22, %v5004_v41  ;;  %v4355_v11 = vshll.u32 %v9116_v33, 16  ;;  %v4367_v13 = vrot.slane %v4366_v37, 4  ;;  %5613 = vmatpush.bf16.msra.mxu1 %v7486_v61 }
 0x31f   : > { %v4125_v4 = vpop.f32.mrf.mxu0  ;;  %4733 = vmatmul.bf16.gmra.mxu1 %v4533_v39  ;;  %v4832_v39 = vld [vmem:[#allocation2 + $0x80] sm:$0xf]  ;;  %v5134_v2 = vunpack.c.l.b16 %v5005_v28  ;;  %v5037_v41 = vrot.slane %v5035_v21, 4  ;;  %v5032_v37 = vrot.slane %v5030_v59, 5 }
 0x320   : > { %v9101_v49 = vadd.f32 %v4122_v25, %v4074_v10  ;;  %4782 = vmatmul.bf16.gmra.mxu2 %v4565_v9  ;;  %v4348_v25 = vrot.slane %v4346_v14, 4  ;;  %v5021_v46 = vshrl.u32 %v4832_v39, 16  ;;  %v5024_v48 = vshll.u32 %v4832_v39, 16 }
 0x321   : > { %5312 = vmatmul.bf16.gmra.mxu3 %v7062_v60  ;;  %v4524_v60 = vunpack.c.l.b16 %v4344_v17  ;;  %v5038_v14 = vshll.u32 %v4833_v35, 16  ;;  %v4566_v10 = vpack.c.b16 %v4556_v27, %v4555_v43  ;;  %v7467_v17 = vld [vmem:[#allocation2 + $0x74] sm:$0xf0]  ;;  %v4357_v56 = vrot.slane %v4355_v11, 5  ;;  %v4173_v35 = vld [vmem:[#allocation2 + $0x88] sm:$0xf] }
 0x322   : > { %5361 = vmatmul.bf16.gmra.mxu0 %v5144_v18  ;;  %v4352_v23 = vor.u32 %v4351_v55, %v4348_v25  ;;  %v4413_v18 = vld [vmem:[#allocation2 + $0x78] sm:$0xe]  ;;  %v5023_v50 = vrot.slane %v5021_v46, 4  ;;  %v5026_v24 = vrot.slane %v5024_v48, 5  ;;  %v5145_v27 = vpack.c.b16 %v5135_v63, %v5134_v2 }
 0x323   : > { %v3931_v45 = vpop.f32.mrf.mxu2  ;;  %v4534_v6 = vpack.c.b16 %v4524_v60, %v9114_v34  ;;  %v6975_v25 = vrot.slane %v4413_v18, 9  ;;  %v5040_v29 = vrot.slane %v5038_v14, 5  ;;  %v4503_v34 = vrot.slane %v4172_v36, 5 }
 0x324   : > { %v3932_v7 = vadd.f32 %v3931_v45, %v3882_v62  ;;  %v4076_v9 = vpop.f32.mrf.mxu3  ;;  %v3884_v38 = vpop.f32.mrf.mxu1  ;;  %v4369_v62 = vshll.u32 %v4172_v36, 16  ;;  %v4353_v3 = vrot.slane %v4352_v23, 4  ;;  %v6976_v45 = vrot.slane %v4414_v58, 9  ;;  %v4175_v23 = vld [vmem:[#allocation2 + $0x90] sm:$0xf] }
 0x325   : > { %v5027_v60 = vor.u32 %v5026_v24, %v5023_v50  ;;  %v5041_v48 = vor.u32 %v5040_v29, %v5037_v41  ;;  %v5044_v36 = vshll.u32 %v9129_v16, 16  ;;  %v4374_v18 = vshrl.u32 %v4173_v35, 16  ;;  %v4834_v50 = vld [vmem:[#allocation2 + $0x90] sm:$0xf] }
 0x326   : > { %v4077_v0 = vadd.f32 %v4076_v9, %v3932_v7  ;;  %v4371_v22 = vrot.slane %v4369_v62, 5  ;;  %v7066_v9 = vor.u32 %v7467_v17, %v7065_v54  ;;  %v4504_v11 = vsel %vm8639_vm12, %v6976_v45, %v4503_v34 }
 0x327   : > { %v4127_v12 = vpop.f32.mrf.mxu0  ;;  %v5028_v62 = vrot.slane %v5027_v60, 4  ;;  %v4377_v21 = vshll.u32 %v4173_v35, 16  ;;  %v4388_v14 = vshrl.u32 %v4175_v23, 16  ;;  %v5042_v2 = vrot.slane %v5041_v48, 4 }
 0x328   : > { %v9123_v19 = vadd.f32 %v4125_v4, %v4077_v0  ;;  %v4499_v4 = vrot.slane %v9116_v33, 5  ;;  %v4358_v33 = vsel %vm7885_vm3, %v4353_v3, %v4357_v56  ;;  %v5046_v3 = vrot.slane %v5044_v36, 5  ;;  %v5398_v36 = vld [vmem:[#allocation2 + $0x10] sm:$0xe] }
 0x329   : > { %v9146_v58 = vunpack.c.l.b16 %v4358_v33  ;;  %v4379_v41 = vrot.slane %v4377_v21, 5  ;;  %v4390_v29 = vrot.slane %v4388_v14, 4  ;;  %v5049_v34 = vshrl.u32 %v4834_v50, 16  ;;  %v7069_v21 = vld [vmem:[#allocation2 + $0x80] sm:$0xf] }
 0x32a   : > { %v4500_v28 = vsel %vm8639_vm12, %v6975_v25, %v4499_v4  ;;  %v4835_v25 = vld [vmem:[#allocation2 + $0x98] sm:$0xf]  ;;  %v4376_v4 = vrot.slane %v4374_v18, 4  ;;  %v5052_v59 = vshll.u32 %v4834_v50, 16  ;;  %v7468_v14 = vld [vmem:[#allocation2 + $0x84] sm:$0xf0] }
 0x32b   : > { %v3933_v55 = vpop.f32.mrf.mxu2  ;;  %v4557_v56 = vunpack.c.l.b16 %v4500_v28  ;;  %v5066_v35 = vshll.u32 %v4835_v25, 16  ;;  %v5399_v28 = vld [vmem:[#allocation2 + $0x18] sm:$0xe] }
 0x32c   : > { %v3934_v5 = vadd.f32 %v3933_v55, %v3884_v38  ;;  %v4078_v39 = vpop.f32.mrf.mxu3  ;;  %v3887_v7 = vpop.f32.mrf.mxu1  ;;  %v4372_v38 = vsel %vm7885_vm3, %v4367_v13, %v4371_v22  ;;  %v4558_v13 = vunpack.c.l.b16 %v4504_v11  ;;  %v5033_v22 = vsel %vm7885_vm3, %v5028_v62, %v5032_v37  ;;  %v4176_v11 = vld [vmem:[#allocation2 + $0x94] sm:$0x1] }
 0x32d   : > { %v9148_v63 = vunpack.c.l.b16 %v4372_v38  ;;  %v5136_v48 = vunpack.c.l.b16 %v5033_v22  ;;  %v4380_v37 = vor.u32 %v4379_v41, %v4376_v4  ;;  %v7139_v62 = vrot.slane %v5398_v36, 9 }
 0x32e   : > { %v4079_v43 = vadd.f32 %v4078_v39, %v3934_v5  ;;  %v9152_v39 = vld [vmem:[#allocation2 + $0x8c] sm:$0x1]  ;;  %v4567_v38 = vpack.c.b16 %v4558_v13, %v4557_v56  ;;  %v7140_v18 = vrot.slane %v5399_v28, 9  ;;  %v5068_v50 = vrot.slane %v5066_v35, 5  ;;  %v9165_v13 = vld [vmem:[#allocation2 + $0x94] sm:$0x1] }
 0x32f   : > { %v4130_v46 = vpop.f32.mrf.mxu0  ;;  %4738 = vmatmul.bf16.gmra.mxu1 %v4534_v6  ;;  %v7591_v6 = vld [vmem:[#allocation2 + $0x14] sm:$0x1]  ;;  %v4535_v33 = vpack.c.b16 %v9148_v63, %v9146_v58  ;;  %v4383_v61 = vshll.u32 %v9152_v39, 16  ;;  %v4397_v56 = vshll.u32 %v4176_v11, 16 }
 0x330   : > { %v9137_v0 = vadd.f32 %v4127_v12, %v4079_v43  ;;  %4787 = vmatmul.bf16.gmra.mxu2 %v4566_v10  ;;  %v4391_v12 = vshll.u32 %v4175_v23, 16  ;;  %v5448_v10 = vrot.slane %v7591_v6, 5  ;;  %v5047_v43 = vsel %vm7885_vm3, %v5042_v2, %v5046_v3 }
 0x331   : > { %5317 = vmatmul.bf16.gmra.mxu3 %v7066_v9  ;;  %v4385_v28 = vrot.slane %v4383_v61, 5 }
 0x332   : > { %5366 = vmatmul.bf16.gmra.mxu0 %v5145_v27  ;;  %v4393_v45 = vrot.slane %v4391_v12, 5  ;;  %v5063_v27 = vshrl.u32 %v4835_v25, 16  ;;  %v5137_v12 = vunpack.c.l.b16 %v5047_v43  ;;  %v5449_v58 = vsel %vm8639_vm12, %v7139_v62, %v5448_v10  ;;  %v9167_v25 = vld [vmem:[#allocation2 + $0x9c] sm:$0x1] }
 0x333   : > { %v3936_v54 = vpop.f32.mrf.mxu2  ;;  %v5526_v22 = vunpack.c.l.b16 %v5449_v58  ;;  %v5072_v35 = vshll.u32 %v9167_v25, 16 }
 0x334   : > { %v3937_v24 = vadd.f32 %v3936_v54, %v3887_v7  ;;  %v4081_v17 = vpop.f32.mrf.mxu3  ;;  %v3889_v55 = vpop.f32.mrf.mxu1  ;;  %v7592_v7 = vld [vmem:[#allocation2 + $0x1c] sm:$0x1]  ;;  %v4394_v6 = vor.u32 %v4393_v45, %v4390_v29  ;;  %v5051_v54 = vrot.slane %v5049_v34, 4  ;;  %v5065_v3 = vrot.slane %v5063_v27, 4 }
 0x335   : > { %v5452_v9 = vrot.slane %v7592_v7, 5  ;;  %v7070_v29 = vor.u32 %v7468_v14, %v7069_v21  ;;  %v5146_v45 = vpack.c.b16 %v5137_v12, %v5136_v48  ;;  %v4381_v34 = vrot.slane %v4380_v37, 4  ;;  %v4416_v7 = vld [vmem:[#allocation2 + $0x90] sm:$0xe] }
 0x336   : > { %v4082_v5 = vadd.f32 %v4081_v17, %v3937_v24  ;;  %v5069_v27 = vor.u32 %v5068_v50, %v5065_v3  ;;  %v4395_v62 = vrot.slane %v4394_v6, 4  ;;  %v4507_v37 = vrot.slane %v9152_v39, 5  ;;  %v7593_v6 = vld [vmem:[#allocation2 + $0x24] sm:$0x1] }
 0x337   : > { %v4132_v60 = vpop.f32.mrf.mxu0  ;;  %v5453_v24 = vsel %vm8639_vm12, %v7140_v18, %v5452_v9  ;;  %v4399_v18 = vrot.slane %v4397_v56, 5  ;;  %v6978_v21 = vrot.slane %v4416_v7, 9  ;;  %v4511_v14 = vrot.slane %v4176_v11, 5  ;;  %v5401_v7 = vld [vmem:[#allocation2 + $0x28] sm:$0xe] }
 0x338   : > { %v9156_v23 = vadd.f32 %v4130_v46, %v4082_v5  ;;  %v5054_v46 = vrot.slane %v5052_v59, 5  ;;  %v5527_v4 = vunpack.c.l.b16 %v5453_v24  ;;  %v4415_v59 = vld [vmem:[#allocation2 + $0x88] sm:$0xe]  ;;  %v5074_v3 = vrot.slane %v5072_v35, 5  ;;  %v7594_v24 = vld [vmem:[#allocation2 + $0x2c] sm:$0x1] }
 0x339   : > { %v6977_v48 = vrot.slane %v4415_v59, 9  ;;  %v4512_v11 = vsel %vm8639_vm12, %v6978_v21, %v4511_v14  ;;  %v5456_v58 = vrot.slane %v7593_v6, 5  ;;  %v5400_v59 = vld [vmem:[#allocation2 + $0x20] sm:$0xe]  ;;  %v7469_v35 = vld [vmem:[#allocation2 + $0x94] sm:$0xf0] }
 0x33a   : > { %v9169_v10 = vpack.c.b16 %v5527_v4, %v5526_v22  ;;  %v5055_v9 = vor.u32 %v5054_v46, %v5051_v54 }
 0x33b   : > { %v3938_v2 = vpop.f32.mrf.mxu2  ;;  %v4508_v39 = vsel %vm8639_vm12, %v6977_v48, %v4507_v37 }
 0x33c   : > { %v3939_v17 = vadd.f32 %v3938_v2, %v3889_v55  ;;  %v4083_v63 = vpop.f32.mrf.mxu3  ;;  %v3892_v41 = vpop.f32.mrf.mxu1  ;;  %v5058_v55 = vshll.u32 %v9165_v13, 16  ;;  %v5056_v54 = vrot.slane %v5055_v9, 4  ;;  %v5070_v2 = vrot.slane %v5069_v27, 4  ;;  %v7073_v27 = vld [vmem:[#allocation2 + $0x90] sm:$0xf] }
 0x33d   : > { %v7141_v9 = vrot.slane %v5400_v59, 9 }
 0x33e   : > { %v4084_v5 = vadd.f32 %v4083_v63, %v3939_v17  ;;  %v5060_v46 = vrot.slane %v5058_v55, 5  ;;  %v5460_v17 = vrot.slane %v7594_v24, 5  ;;  %v7142_v55 = vrot.slane %v5401_v7, 9  ;;  %v7595_v24 = vld [vmem:[#allocation2 + $0x34] sm:$0x1] }
 0x33f   : > { %v4135_v43 = vpop.f32.mrf.mxu0  ;;  %4743 = vmatmul.bf16.gmra.mxu1 %v4535_v33  ;;  %v4386_v33 = vsel %vm7885_vm3, %v4381_v34, %v4385_v28  ;;  %v4560_v34 = vunpack.c.l.b16 %v4512_v11  ;;  %v5457_v37 = vsel %vm8639_vm12, %v7141_v9, %v5456_v58 }
 0x340   : > { %v9173_v36 = vadd.f32 %v4132_v60, %v4084_v5  ;;  %4792 = vmatmul.bf16.gmra.mxu2 %v4567_v38  ;;  %v4400_v38 = vsel %vm7885_vm3, %v4395_v62, %v4399_v18  ;;  %v4527_v22 = vunpack.c.l.b16 %v4386_v33  ;;  %v5461_v40 = vsel %vm8639_vm12, %v7142_v55, %v5460_v17 }
 0x341   : > { %5322 = vmatmul.bf16.gmra.mxu3 %v7070_v29  ;;  %v4528_v4 = vunpack.c.l.b16 %v4400_v38  ;;  %v5075_v29 = vsel %vm7885_vm3, %v5070_v2, %v5074_v3  ;;  %v7074_v2 = vor.u32 %v7469_v35, %v7073_v27  ;;  %v5464_v17 = vrot.slane %v7595_v24, 5 }
 0x342   : > { %5371 = vmatmul.bf16.gmra.mxu0 %v5146_v45  ;;  %v4559_v45 = vunpack.c.l.b16 %v4508_v39  ;;  %v5139_v62 = vunpack.c.l.b16 %v5075_v29  ;;  %v5402_v29 = vld [vmem:[#allocation2 + $0x30] sm:$0xe] }
 0x343   : > { %v3941_v12 = vpop.f32.mrf.mxu2  ;;  %v4536_v48 = vpack.c.b16 %v4528_v4, %v4527_v22 }
 0x344   : > { %v3942_v50 = vadd.f32 %v3941_v12, %v3892_v41  ;;  %v4086_v60 = vpop.f32.mrf.mxu3  ;;  %v3894_v61 = vpop.f32.mrf.mxu1  ;;  %v5061_v41 = vsel %vm7885_vm3, %v5056_v54, %v5060_v46  ;;  %v4568_v14 = vpack.c.b16 %v4560_v34, %v4559_v45  ;;  %v5528_v12 = vunpack.c.l.b16 %v5457_v37  ;;  %v5403_v45 = vld [vmem:[#allocation2 + $0x38] sm:$0xe] }
 0x345   : > { %v5138_v28 = vunpack.c.l.b16 %v5061_v41  ;;  %v5529_v54 = vunpack.c.l.b16 %v5461_v40  ;;  %v7144_v34 = vrot.slane %v5403_v45, 9 }
 0x346   : > { %v4087_v63 = vadd.f32 %v4086_v60, %v3942_v50 }
 0x347   : > { %v4137_v56 = vpop.f32.mrf.mxu0  ;;  %v5147_v50 = vpack.c.b16 %v5139_v62, %v5138_v28  ;;  %v5543_v60 = vpack.c.b16 %v5529_v54, %v5528_v12 }
 0x348   : > { %v9188_v5 = vadd.f32 %v4135_v43, %v4087_v63  ;;  %v7596_v63 = vld [vmem:[#allocation2 + $0x3c] sm:$0x1] }
 0x349   : > { %v5468_v22 = vrot.slane %v7596_v63, 5 }
 0x34b   : > { %v3943_v18 = vpop.f32.mrf.mxu2  ;;  %v5469_v9 = vsel %vm8639_vm12, %v7144_v34, %v5468_v22 }
 0x34c   : > { %v3944_v43 = vadd.f32 %v3943_v18, %v3894_v61  ;;  %v4088_v21 = vpop.f32.mrf.mxu3  ;;  %v3897_v46 = vpop.f32.mrf.mxu1  ;;  %v5531_v28 = vunpack.c.l.b16 %v5469_v9 }
 0x34e   : > { %v4089_v3 = vadd.f32 %v4088_v21, %v3944_v43 }
 0x34f   : > { %v4140_v33 = vpop.f32.mrf.mxu0  ;;  %4748 = vmatmul.bf16.gmra.mxu1 %v4536_v48 }
 0x350   : > { %v9194_v38 = vadd.f32 %v4137_v56, %v4089_v3  ;;  %4797 = vmatmul.bf16.gmra.mxu2 %v4568_v14  ;;  %v7143_v56 = vrot.slane %v5402_v29, 9  ;;  %v5476_v3 = vrot.slane %v9022_v53, 5 }
 0x351   : > { %5327 = vmatmul.bf16.gmra.mxu3 %v7074_v2  ;;  %v5472_v2 = vrot.slane %v9019_v15, 5 }
 0x352   : > { %5376 = vmatmul.bf16.gmra.mxu0 %v5147_v50  ;;  %v5465_v7 = vsel %vm8639_vm12, %v7143_v56, %v5464_v17 }
 0x353   : > { %v3946_v39 = vpop.f32.mrf.mxu2  ;;  %v5530_v35 = vunpack.c.l.b16 %v5465_v7 }
 0x354   : > { %v3947_v11 = vadd.f32 %v3946_v39, %v3897_v46  ;;  %v4091_v6 = vpop.f32.mrf.mxu3  ;;  %v3899_v61 = vpop.f32.mrf.mxu1  ;;  %v5405_v39 = vld [vmem:[#allocation2 + $0x48] sm:$0xe] }
 0x355   : > { %v5544_v48 = vpack.c.b16 %v5531_v28, %v5530_v35 }
 0x356   : > { %v4092_v58 = vadd.f32 %v4091_v6, %v3947_v11 }
 0x357   : > { %v4142_v4 = vpop.f32.mrf.mxu0 }
 0x358   : > { %v9196_v41 = vadd.f32 %v4140_v33, %v4092_v58  ;;  %v5404_v33 = vld [vmem:[#allocation2 + $0x40] sm:$0xe] }
 0x359   : > { %v7145_v6 = vrot.slane %v5404_v33, 9 }
 0x35b   : > { %v3948_v59 = vpop.f32.mrf.mxu2 }
 0x35c   : > { %v3949_v55 = vadd.f32 %v3948_v59, %v3899_v61  ;;  %v4093_v27 = vpop.f32.mrf.mxu3  ;;  %v4714_v62 = vpop.f32.mrf.mxu1  ;;  %v7146_v61 = vrot.slane %v5405_v39, 9 }
 0x35e   : > { %v4094_v18 = vadd.f32 %v4093_v27, %v3949_v55  ;;  %v5477_v24 = vsel %vm8639_vm12, %v7146_v61, %v5476_v3 }
 0x35f   : > { %v5342_v37 = vpop.f32.mrf.mxu0  ;;  %5614 = vmatmul.bf16.vlgmr.msra.gmra.mxu1 %v9169_v10  ;;  %v5473_v10 = vsel %vm8639_vm12, %v7145_v6, %v5472_v2  ;;  %v5533_v15 = vunpack.c.l.b16 %v5477_v24  ;;  %v5407_v24 = vld [vmem:[#allocation2 + $0x68] sm:$0xe] }
 0x360   : > { %v9202_v40 = vadd.f32 %v4142_v4, %v4094_v18  ;;  %v5532_v63 = vunpack.c.l.b16 %v5473_v10 }
 0x362   : > { %v5545_v29 = vpack.c.b16 %v5533_v15, %v5532_v63  ;;  %v5480_v15 = vrot.slane %v9051_v8, 5 }
 0x363   : > { %v4763_v43 = vpop.f32.mrf.mxu2 }
 0x364   : > { %v4764_v21 = vadd.f32 %v4763_v43, %v4714_v62  ;;  %v5293_v14 = vpop.f32.mrf.mxu3  ;;  %v4716_v12 = vpop.f32.mrf.mxu1 }
 0x365   : > { %v5343_v54 = vadd.f32 %v5342_v37, %v5293_v14 }
 0x366   : > { %v4803_v46 = vadd.f32 %v4764_v21, %v8986_v1 }
 0x367   : > { %v5344_v50 = vpop.f32.mrf.mxu0 }
 0x368   : > { %v9208_v11 = vadd.f32 %v5343_v54, %v4803_v46 }
 0x36b   : > { %v4765_v58 = vpop.f32.mrf.mxu2 }
 0x36c   : > { %v4766_v17 = vadd.f32 %v4765_v58, %v4716_v12  ;;  %v5295_v1 = vpop.f32.mrf.mxu3  ;;  %v4719_v22 = vpop.f32.mrf.mxu1 }
 0x36d   : > { %v5345_v53 = vadd.f32 %v5344_v50, %v5295_v1 }
 0x36e   : > { %v4804_v4 = vadd.f32 %v4766_v17, %v8997_v52 }
 0x36f   : > { %v5347_v45 = vpop.f32.mrf.mxu0  ;;  %5619 = vmatmul.bf16.gmra.mxu1 %v5543_v60 }
 0x370   : > { %v9215_v56 = vadd.f32 %v5345_v53, %v4804_v4 }
 0x373   : > { %v4768_v34 = vpop.f32.mrf.mxu2 }
 0x374   : > { %v4769_v59 = vadd.f32 %v4768_v34, %v4719_v22  ;;  %v5298_v7 = vpop.f32.mrf.mxu3  ;;  %v4721_v9 = vpop.f32.mrf.mxu1  ;;  %v5484_v22 = vrot.slane %v9053_v47, 5 }
 0x375   : > { %v5348_v55 = vadd.f32 %v5347_v45, %v5298_v7 }
 0x376   : > { %v4805_v27 = vadd.f32 %v4769_v59, %v9015_v51 }
 0x377   : > { %v5349_v35 = vpop.f32.mrf.mxu0 }
 0x378   : > { %v9218_v28 = vadd.f32 %v5348_v55, %v4805_v27 }
 0x37b   : > { %v4770_v62 = vpop.f32.mrf.mxu2 }
 0x37c   : > { %v4771_v18 = vadd.f32 %v4770_v62, %v4721_v9  ;;  %v5300_v37 = vpop.f32.mrf.mxu3  ;;  %v4724_v43 = vpop.f32.mrf.mxu1 }
 0x37d   : > { %v5350_v52 = vadd.f32 %v5349_v35, %v5300_v37 }
 0x37e   : > { %v4806_v21 = vadd.f32 %v4771_v18, %v9026_v26 }
 0x37f   : > { %v5352_v60 = vpop.f32.mrf.mxu0  ;;  %5624 = vmatmul.bf16.gmra.mxu1 %v5544_v48  ;;  %v5406_v48 = vld [vmem:[#allocation2 + $0x60] sm:$0xe] }
 0x380   : > { %v9221_v14 = vadd.f32 %v5350_v52, %v4806_v21  ;;  %v7147_v63 = vrot.slane %v5406_v48, 9  ;;  %v5408_v21 = vld [vmem:[#allocation2 + $0x70] sm:$0xe] }
 0x383   : > { %v4773_v12 = vpop.f32.mrf.mxu2 }
 0x384   : > { %v4774_v54 = vadd.f32 %v4773_v12, %v4724_v43  ;;  %v5303_v46 = vpop.f32.mrf.mxu3  ;;  %v4726_v2 = vpop.f32.mrf.mxu1 }
 0x385   : > { %v5353_v3 = vadd.f32 %v5352_v60, %v5303_v46  ;;  %v5409_v60 = vld [vmem:[#allocation2 + $0x78] sm:$0xe] }
 0x386   : > { %v4807_v51 = vadd.f32 %v4774_v54, %v9049_v31  ;;  %v7148_v31 = vrot.slane %v5407_v24, 9  ;;  %v7149_v54 = vrot.slane %v5408_v21, 9  ;;  %v7150_v46 = vrot.slane %v5409_v60, 9  ;;  %v5410_v24 = vld [vmem:[#allocation2 + $0x80] sm:$0xe] }
 0x387   : > { %v5354_v50 = vpop.f32.mrf.mxu0 }
 0x388   : > { %v9224_v33 = vadd.f32 %v5353_v3, %v4807_v51 }
 0x38b   : > { %v4775_v39 = vpop.f32.mrf.mxu2 }
 0x38c   : > { %v4776_v6 = vadd.f32 %v4775_v39, %v4726_v2  ;;  %v5305_v61 = vpop.f32.mrf.mxu3  ;;  %v4729_v58 = vpop.f32.mrf.mxu1  ;;  %v5492_v2 = vrot.slane %v9095_v57, 5 }
 0x38d   : > { %v5355_v10 = vadd.f32 %v5354_v50, %v5305_v61 }
 0x38e   : > { %v4808_v26 = vadd.f32 %v4776_v6, %v9061_v42  ;;  %v5481_v42 = vsel %vm8639_vm12, %v7147_v63, %v5480_v15  ;;  %v7151_v63 = vrot.slane %v5410_v24, 9  ;;  %v5496_v15 = vrot.slane %v9126_v32, 5  ;;  %v7499_v24 = vld [vmem:[%s9568_s8 + $0x28] sm:$0xff] }
 0x38f   : > { %5629 = vmatmul.bf16.gmra.mxu1 %v5545_v29  ;;  %v5357_v17 = vpop.f32.mrf.mxu0  ;;  %v5485_v29 = vsel %vm8639_vm12, %v7148_v31, %v5484_v22  ;;  %v5534_v9 = vunpack.c.l.b16 %v5481_v42  ;;  %v5500_v22 = vrot.slane %v9129_v16, 5 }
 0x390   : > { %v9227_v1 = vadd.f32 %v5355_v10, %v4808_v26  ;;  %v5535_v55 = vunpack.c.l.b16 %v5485_v29 }
 0x392   : > { %v5546_v18 = vpack.c.b16 %v5535_v55, %v5534_v9  ;;  %v5412_v55 = vld [vmem:[#allocation2 + $0x90] sm:$0xe] }
 0x393   : > { %v4778_v53 = vpop.f32.mrf.mxu2 }
 0x394   : > { %v4779_v4 = vadd.f32 %v4778_v53, %v4729_v58  ;;  %v5308_v45 = vpop.f32.mrf.mxu3  ;;  %v4731_v34 = vpop.f32.mrf.mxu1 }
 0x395   : > { %v5358_v59 = vadd.f32 %v5357_v17, %v5308_v45  ;;  %v5411_v17 = vld [vmem:[#allocation2 + $0x88] sm:$0xe]  ;;  %v5497_v45 = vsel %vm8639_vm12, %v7151_v63, %v5496_v15 }
 0x396   : > { %v4809_v7 = vadd.f32 %v4779_v4, %v9087_v30  ;;  %v5488_v30 = vrot.slane %v9091_v20, 5  ;;  %v7152_v31 = vrot.slane %v5411_v17, 9 }
 0x397   : > { %v5359_v8 = vpop.f32.mrf.mxu0 }
 0x398   : > { %v9236_v27 = vadd.f32 %v5358_v59, %v4809_v7  ;;  %v5489_v39 = vsel %vm8639_vm12, %v7149_v54, %v5488_v30  ;;  %v5538_v59 = vunpack.c.l.b16 %v5497_v45 }
 0x399   : > { %v5536_v61 = vunpack.c.l.b16 %v5489_v39 }
 0x39b   : > { %v4780_v35 = vpop.f32.mrf.mxu2 }
 0x39c   : > { %v4781_v47 = vadd.f32 %v4780_v35, %v4731_v34  ;;  %v5310_v62 = vpop.f32.mrf.mxu3  ;;  %v4734_v37 = vpop.f32.mrf.mxu1  ;;  %v5501_v34 = vsel %vm8639_vm12, %v7152_v31, %v5500_v22  ;;  %v7153_v35 = vrot.slane %v5412_v55, 9 }
 0x39d   : > { %v5360_v43 = vadd.f32 %v5359_v8, %v5310_v62  ;;  %v5539_v42 = vunpack.c.l.b16 %v5501_v34  ;;  %v5413_v8 = vld [vmem:[#allocation2 + $0x98] sm:$0xe] }
 0x39e   : > { %v4810_v52 = vadd.f32 %v4781_v47, %v9101_v49  ;;  %v5493_v49 = vsel %vm8639_vm12, %v7150_v46, %v5492_v2  ;;  %v5504_v47 = vrot.slane %v9165_v13, 5  ;;  %v7154_v62 = vrot.slane %v5413_v8, 9 }
 0x39f   : > { %5634 = vmatmul.bf16.gmra.mxu1 %v5546_v18  ;;  %v5537_v58 = vunpack.c.l.b16 %v5493_v49  ;;  %v5548_v32 = vpack.c.b16 %v5539_v42, %v5538_v59  ;;  %v5508_v18 = vrot.slane %v9167_v25, 5  ;;  %v5362_v22 = vpop.f32.mrf.mxu0 }
 0x3a0   : > { %v9239_v12 = vadd.f32 %v5360_v43, %v4810_v52  ;;  %v5505_v52 = vsel %vm8639_vm12, %v7153_v35, %v5504_v47  ;;  %v7495_v35 = vld [vmem:[%s9568_s8 + $0x8] sm:$0xff]  ;;  %v9315_v47 = vld [vmem:[%s9567_s7] ss:$0 sm:$0xff] }
 0x3a1   : > { %v5547_v20 = vpack.c.b16 %v5537_v58, %v5536_v61  ;;  %v5509_v21 = vsel %vm8639_vm12, %v7154_v62, %v5508_v18  ;;  %v5540_v60 = vunpack.c.l.b16 %v5505_v52 }
 0x3a2   : > { %v5541_v54 = vunpack.c.l.b16 %v5509_v21 }
 0x3a3   : > { %v4783_v3 = vpop.f32.mrf.mxu2 }
 0x3a4   : > { %v4784_v51 = vadd.f32 %v4783_v3, %v4734_v37  ;;  %v4736_v50 = vpop.f32.mrf.mxu1  ;;  %v5549_v13 = vpack.c.b16 %v5541_v54, %v5540_v60  ;;  %v7501_v3 = vld [vmem:[%s9568_s8 + $0x38] sm:$0xff]  ;;  %v5313_v31 = vpop.f32.mrf.mxu3 }
 0x3a5   : > { %5804 = vmatpush.bf16.msra.mxu2 %v7501_v3  ;;  %v5363_v3 = vadd.f32 %v5362_v22, %v5313_v31  ;;  %v7662_v31 = vmov 64.0  }
 0x3a6   : > { %v9248_v6 = vadd.f32 %v4784_v51, %v9123_v19  ;;  %7585 = vrcp.f32 %v7662_v31 }
 0x3a7   : > { %v5364_v45 = vpop.f32.mrf.mxu0 }
 0x3ab   : > { %v4785_v10 = vpop.f32.mrf.mxu2 }
 0x3ac   : > { %v4786_v26 = vadd.f32 %v4785_v10, %v4736_v50  ;;  %v4739_v48 = vpop.f32.mrf.mxu1  ;;  %v7500_v10 = vld [vmem:[%s9568_s8 + $0x30] sm:$0xff] }
 0x3ad   : > { %5805 = vmatpush.bf16.msra.mxu2 %v7500_v10 }
 0x3ae   : > { %v9251_v57 = vadd.f32 %v4786_v26, %v9137_v0 }
 0x3af   : > { %5639 = vmatmul.bf16.gmra.mxu1 %v5547_v20 }
 0x3b1   : > { %5806 = vmatpush.bf16.msra.mxu2 %v7499_v24 }
 0x3b3   : > { %v4788_v19 = vpop.f32.mrf.mxu2 }
 0x3b4   : > { %v4789_v53 = vadd.f32 %v4788_v19, %v4739_v48  ;;  %v4741_v4 = vpop.f32.mrf.mxu1 }
 0x3b6   : > { %v9260_v0 = vadd.f32 %v4789_v53, %v9156_v23 }
 0x3bb   : > { %v4790_v29 = vpop.f32.mrf.mxu2 }
 0x3bc   : > { %v4791_v7 = vadd.f32 %v4790_v29, %v4741_v4  ;;  %v4744_v9 = vpop.f32.mrf.mxu1  ;;  %v5315_v4 = vpop.f32.mrf.mxu3  ;;  %v7496_v29 = vld [vmem:[%s9568_s8 + $0x10] sm:$0xff] }
 0x3be   : > { %v9263_v16 = vadd.f32 %v4791_v7, %v9173_v36 }
 0x3bf   : > { %5644 = vmatmul.bf16.gmra.mxu1 %v5548_v32 }
 0x3c3   : > { %v4793_v23 = vpop.f32.mrf.mxu2 }
 0x3c4   : > { %v4794_v37 = vadd.f32 %v4793_v23, %v4744_v9  ;;  %v4746_v43 = vpop.f32.mrf.mxu1  ;;  %v5318_v59 = vpop.f32.mrf.mxu3 }
 0x3c6   : > { %v9272_v36 = vadd.f32 %v4794_v37, %v9188_v5 }
 0x3cb   : > { %v4795_v30 = vpop.f32.mrf.mxu2 }
 0x3cc   : > { %v4796_v46 = vadd.f32 %v4795_v30, %v4746_v43  ;;  %v4749_v2 = vpop.f32.mrf.mxu1  ;;  %v5320_v7 = vpop.f32.mrf.mxu3 }
 0x3ce   : > { %v9275_v25 = vadd.f32 %v4796_v46, %v9194_v38  ;;  %v5365_v46 = vadd.f32 %v5364_v45, %v5315_v4 }
 0x3cf   : > { %5649 = vmatmul.bf16.gmra.mxu1 %v5549_v13 }
 0x3d3   : > { %v4798_v51 = vpop.f32.mrf.mxu2 }
 0x3d4   : > { %v4799_v44 = vadd.f32 %v4798_v51, %v4749_v2  ;;  %v4751_v50 = vpop.f32.mrf.mxu1  ;;  %v5323_v55 = vpop.f32.mrf.mxu3 }
 0x3d6   : > { %v9281_v5 = vadd.f32 %v4799_v44, %v9196_v41 }
 0x3db   : > { %v4800_v39 = vpop.f32.mrf.mxu2 }
 0x3dc   : > { %v4801_v49 = vadd.f32 %v4800_v39, %v4751_v50  ;;  %v5615_v61 = vpop.f32.mrf.mxu1  ;;  %v5325_v62 = vpop.f32.mrf.mxu3 }
 0x3dd   : > { %v5655_v38 = vadd.f32 %v5615_v61, %v9208_v11 }
 0x3de   : > { %v9284_v58 = vadd.f32 %v4801_v49, %v9202_v40 }
 0x3df   : > { %v9321_v37 = vadd.f32 %v9315_v47, %v5655_v38 }
 0x3e4   : > { %v5617_v26 = vpop.f32.mrf.mxu1  ;;  %v5328_v44 = vpop.f32.mrf.mxu3 }
 0x3e5   : > { %v5656_v20 = vadd.f32 %v5617_v26, %v9215_v56  ;;  %v7498_v56 = vld [vmem:[%s9568_s8 + $0x20] sm:$0xff]  ;;  %v5391_v26 = vadd.f32 %v5365_v46, %v9251_v57 }
 0x3e6   : > { %5807 = vmatpush.bf16.msra.mxu2 %v7498_v56 }
 0x3e7   : > { %v9318_v23 = vadd.f32 %v9315_v47, %v5656_v20  ;;  %v5390_v20 = vadd.f32 %v5363_v3, %v9248_v6 }
 0x3e9   : > { %v5691_v52 = vadd.f32 %v9318_v23, %v9321_v37 }
 0x3ec   : > { %v5620_v48 = vpop.f32.mrf.mxu1  ;;  %v5330_v4 = vpop.f32.mrf.mxu3 }
 0x3ed   : > { %v5657_v41 = vadd.f32 %v5620_v48, %v9218_v28 }
 0x3ef   : > { %v9324_v43 = vadd.f32 %v9315_v47, %v5657_v41 }
 0x3f1   : > { %v5692_v54 = vadd.f32 %v5691_v52, %v9324_v43  ;;  %v7520_v52 = vld [vmem:[%s9572_s12 + $0x10] sm:$0xff] }
 0x3f4   : > { %v5622_v40 = vpop.f32.mrf.mxu1 }
 0x3f5   : > { %v5658_v17 = vadd.f32 %v5622_v40, %v9221_v14  ;;  %v7497_v14 = vld [vmem:[%s9568_s8 + $0x18] sm:$0xff] }
 0x3f6   : > { %5808 = vmatpush.bf16.msra.mxu2 %v7497_v14 }
 0x3f7   : > { %v9329_v21 = vadd.f32 %v9315_v47, %v5658_v17 }
 0x3f9   : > { %v5693_v13 = vadd.f32 %v5692_v54, %v9329_v21 }
 0x3fa   : > { %5809 = vmatpush.bf16.msra.mxu2 %v7496_v29 }
 0x3fc   : > { %v5625_v11 = vpop.f32.mrf.mxu1 }
 0x3fd   : > { %v5659_v63 = vadd.f32 %v5625_v11, %v9224_v33 }
 0x3fe   : > { %5810 = vmatpush.bf16.msra.mxu2 %v7495_v35  ;;  %v7509_v35 = vld [vmem:[%s9570_s10 + $0x38] sm:$0xff] }
 0x3ff   : > { %v9333_v30 = vadd.f32 %v9315_v47, %v5659_v63  ;;  %5887 = vmatpush.bf16.msrb.mxu3 %v7509_v35  ;;  %v7512_v35 = vld [vmem:[%s8087_s0 + $0x24] sm:$0xf0] }
 0x401   : > { %v5694_v39 = vadd.f32 %v5693_v13, %v9333_v30 }
 0x404   : > { %v5627_v15 = vpop.f32.mrf.mxu1 }
 0x405   : > { %v5660_v19 = vadd.f32 %v5627_v15, %v9227_v1  ;;  %v5367_v1 = vpop.f32.mrf.mxu0 }
 0x406   : > { %v5368_v51 = vadd.f32 %v5367_v1, %v5318_v59  ;;  %v7586_v1 = vpop.eup %7585 }
 0x407   : > { %v9337_v2 = vadd.f32 %v9315_v47, %v5660_v19  ;;  %vm5722_vm13 = vweird.f32 %v7586_v1 }
 0x408   : > { %v5392_v17 = vadd.f32 %v5368_v51, %v9260_v0 }
 0x409   : > { %v5695_v38 = vadd.f32 %v5694_v39, %v9337_v2  ;;  %v7519_v39 = vld [vmem:[%s9572_s12 + $0x8] sm:$0xff] }
 0x40c   : > { %v5630_v28 = vpop.f32.mrf.mxu1 }
 0x40d   : > { %v5661_v53 = vadd.f32 %v5630_v28, %v9236_v27  ;;  %v5369_v27 = vpop.f32.mrf.mxu0 }
 0x40e   : > { %v5370_v61 = vadd.f32 %v5369_v27, %v5320_v7 }
 0x40f   : > { %v9341_v49 = vadd.f32 %v9315_v47, %v5661_v53 }
 0x410   : > { %v5393_v63 = vadd.f32 %v5370_v61, %v9263_v16  ;;  %v7507_v61 = vld [vmem:[%s9570_s10 + $0x28] sm:$0xff] }
 0x411   : > { %v5696_v24 = vadd.f32 %v5695_v38, %v9341_v49 }
 0x414   : > { %v5632_v33 = vpop.f32.mrf.mxu1 }
 0x415   : > { %v5662_v34 = vadd.f32 %v5632_v33, %v9239_v12  ;;  %v5372_v8 = vpop.f32.mrf.mxu0 }
 0x416   : > { %v5373_v41 = vadd.f32 %v5372_v8, %v5323_v55  ;;  %v5718_v8 = vmul.f32 64.0, %v7586_v1 }
 0x417   : > { %v9345_v10 = vadd.f32 %v9315_v47, %v5662_v34  ;;  %v7494_v34 = vld [vmem:[%s9568_s8] sm:$0xff] }
 0x418   : > { %v5394_v28 = vadd.f32 %v5373_v41, %v9272_v36  ;;  %5811 = vmatpush.bf16.msra.mxu2 %v7494_v34  ;;  %v5719_v3 = vsub.f32 1.0, %v5718_v8  ;;  %v7518_v41 = vld [vmem:[%s9572_s12] sm:$0xff] }
 0x419   : > { %v5697_v15 = vadd.f32 %v5696_v24, %v9345_v10  ;;  %v7262_v8 = vld [vmem:[%s8087_s0 + $0x20] sm:$0xf] }
 0x41b   : > { %v5698_v45 = vrot.slane %v5697_v15, 4 }
 0x41c   : > { %v5635_v42 = vpop.f32.mrf.mxu1 }
 0x41d   : > { %v5374_v18 = vpop.f32.mrf.mxu0  ;;  %v5663_v22 = vadd.f32 %v5635_v42, %v5390_v20  ;;  %v5699_v27 = vadd.f32 %v5698_v45, %v5697_v15  ;;  %v5720_v20 = vmul.f32 %v7586_v1, %v5719_v3 }
 0x41e   : > { %v5375_v11 = vadd.f32 %v5374_v18, %v5325_v62  ;;  %v7508_v18 = vld [vmem:[%s9570_s10 + $0x30] sm:$0xff] }
 0x41f   : > { %v9359_v16 = vadd.f32 %v9315_v47, %v5663_v22  ;;  %5888 = vmatpush.bf16.msrb.mxu3 %v7508_v18  ;;  %v7266_v18 = vld [vmem:[%s8087_s0 + $0x30] sm:$0xf] }
 0x420   : > { %v5395_v53 = vadd.f32 %v5375_v11, %v9275_v25 }
 0x423   : > { %5889 = vmatpush.bf16.msrb.mxu3 %v7507_v61  ;;  %v7516_v61 = vld [vmem:[%s8087_s0 + $0x6c] sm:$0xf0] }
 0x424   : > { %v5637_v32 = vpop.f32.mrf.mxu1 }
 0x425   : > { %v5377_v50 = vpop.f32.mrf.mxu0  ;;  %v5664_v40 = vadd.f32 %v5637_v32, %v5391_v26 }
 0x426   : > { %v5378_v56 = vadd.f32 %v5377_v50, %v5328_v44 }
 0x427   : > { %v9354_v57 = vadd.f32 %v9315_v47, %v5664_v40 }
 0x428   : > { %v5396_v29 = vadd.f32 %v5378_v56, %v9281_v5 }
 0x429   : > { %v5704_v36 = vadd.f32 %v9354_v57, %v9359_v16 }
 0x42c   : > { %v5640_v9 = vpop.f32.mrf.mxu1 }
 0x42d   : > { %v5665_v19 = vadd.f32 %v5640_v9, %v5392_v17  ;;  %v5379_v0 = vpop.f32.mrf.mxu0  ;;  %v5721_v17 = vadd.f32 %v7586_v1, %v5720_v20  ;;  %v7517_v20 = vld [vmem:[%s8087_s0 + $0x7c] sm:$0xf0] }
 0x42e   : > { %v5380_v7 = vadd.f32 %v5379_v0, %v5330_v4 }
 0x42f   : > { %v9362_v14 = vadd.f32 %v9315_v47, %v5665_v19  ;;  %v5723_v31 = vsel %vm5722_vm13, %v7586_v1, %v5721_v17  ;;  %v7254_v1 = vld [vmem:[%s8087_s0] sm:$0xf] }
 0x430   : > { %v5397_v13 = vadd.f32 %v5380_v7, %v9284_v58  ;;  %v7258_v7 = vld [vmem:[%s8087_s0 + $0x10] sm:$0xf] }
 0x431   : > { %v5705_v32 = vadd.f32 %v5704_v36, %v9362_v14  ;;  %v7510_v36 = vld [vmem:[%s8087_s0 + $0x4] sm:$0xf0] }
 0x434   : > { %v5642_v12 = vpop.f32.mrf.mxu1 }
 0x435   : > { %v5666_v6 = vadd.f32 %v5642_v12, %v5393_v63  ;;  %v7521_v12 = vld [vmem:[%s9572_s12 + $0x18] sm:$0xff] }
 0x436   : > { %6039 = vmatpush.bf16.msrb.mxu2 %v7521_v12  ;;  %v7263_v12 = vor.u32 %v7512_v35, %v7262_v8 }
 0x437   : > { %v9370_v25 = vadd.f32 %v9315_v47, %v5666_v6 }
 0x439   : > { %v5706_v5 = vadd.f32 %v5705_v32, %v9370_v25 }
 0x43a   : > { %6040 = vmatpush.bf16.msrb.mxu2 %v7520_v52  ;;  %v7513_v52 = vld [vmem:[%s8087_s0 + $0x34] sm:$0xf0] }
 0x43c   : > { %v5645_v60 = vpop.f32.mrf.mxu1 }
 0x43d   : > { %v5667_v33 = vadd.f32 %v5645_v60, %v5394_v28  ;;  %v5700_v60 = vrot.slane %v5699_v27, 2 }
 0x43e   : > { %6041 = vmatpush.bf16.msrb.mxu2 %v7519_v39  ;;  %v7278_v39 = vld [vmem:[%s8087_s0 + $0x68] sm:$0xf] }
 0x43f   : > { %v9375_v9 = vadd.f32 %v9315_v47, %v5667_v33  ;;  %v5701_v38 = vadd.f32 %v5700_v60, %v5699_v27  ;;  %v7511_v27 = vld [vmem:[%s8087_s0 + $0x14] sm:$0xf0]  ;;  %v7267_v60 = vor.u32 %v7513_v52, %v7266_v18  ;;  %v9471_v52 = vld [vmem:[%s9573_s13] ss:$0 sm:$0xff] }
 0x440   : > { %v7259_v32 = vor.u32 %v7511_v27, %v7258_v7 }
 0x441   : > { %v5707_v54 = vadd.f32 %v5706_v5, %v9375_v9  ;;  %v5702_v24 = vrot.slane %v5701_v38, 1  ;;  %v7502_v5 = vld [vmem:[%s9570_s10] sm:$0xff] }
 0x442   : > { %6042 = vmatpush.bf16.msrb.mxu2 %v7518_v41  ;;  %v7582_v41 = vld [vmem:[%s9569_s9] ss:$0 sm:$0xff] }
 0x443   : > { %v5703_v63 = vadd.f32 %v5702_v24, %v5701_v38  ;;  %v7279_v38 = vor.u32 %v7516_v61, %v7278_v39 }
 0x444   : > { %v5647_v48 = vpop.f32.mrf.mxu1 }
 0x445   : > { %v5668_v42 = vadd.f32 %v5647_v48, %v5395_v53  ;;  %v5724_v19 = vmul.f32 %v5723_v31, %v5703_v63 }
 0x447   : > { %v9385_v62 = vadd.f32 %v9315_v47, %v5668_v42  ;;  %v5726_v28 = vpack.c.bf16 %v5724_v19, %v5724_v19  ;;  %v7255_v42 = vor.u32 %v7510_v36, %v7254_v1 }
 0x449   : > { %v5708_v44 = vadd.f32 %v5707_v54, %v9385_v62  ;;  %v5750_v0 = vunpack.c.l.b16 %v5726_v28  ;;  %v7270_v54 = vld [vmem:[%s8087_s0 + $0x48] sm:$0xf] }
 0x44c   : > { %v5650_v59 = vpop.f32.mrf.mxu1 }
 0x44d   : > { %v5669_v55 = vadd.f32 %v5650_v59, %v5396_v29  ;;  %v7505_v59 = vld [vmem:[%s9570_s10 + $0x18] sm:$0xff]  ;;  %v7504_v29 = vld [vmem:[%s9570_s10 + $0x10] sm:$0xff] }
 0x44f   : > { %v9395_v46 = vadd.f32 %v9315_v47, %v5669_v55  ;;  %v7503_v55 = vld [vmem:[%s9570_s10 + $0x8] sm:$0xff] }
 0x451   : > { %v5709_v26 = vadd.f32 %v5708_v44, %v9395_v46  ;;  %v7515_v44 = vld [vmem:[%s8087_s0 + $0x5c] sm:$0xf0] }
 0x454   : > { %v5652_v51 = vpop.f32.mrf.mxu1 }
 0x455   : > { %v5670_v50 = vadd.f32 %v5652_v51, %v5397_v13  ;;  %v7514_v13 = vld [vmem:[%s8087_s0 + $0x4c] sm:$0xf0]  ;;  %v7274_v51 = vld [vmem:[%s8087_s0 + $0x58] sm:$0xf] }
 0x456   : > { %v7271_v3 = vor.u32 %v7514_v13, %v7270_v54 }
 0x457   : > { %v9407_v58 = vadd.f32 %v9315_v47, %v5670_v50  ;;  %v7506_v47 = vld [vmem:[%s9570_s10 + $0x20] sm:$0xff]  ;;  %v7275_v50 = vor.u32 %v7515_v44, %v7274_v51 }
 0x458   : > { %5890 = vmatpush.bf16.msrb.mxu3 %v7506_v47 }
 0x459   : > { %v5710_v48 = vadd.f32 %v5709_v26, %v9407_v58  ;;  %v7282_v26 = vld [vmem:[%s8087_s0 + $0x78] sm:$0xf]  ;;  %s7613_s0 = scalar_lea.hbm %s7612_s21, 128 }
 0x45a   : > { %p7614_p12 = scmp.ne.s32.totalorder %s7612_s21, %s7613_s0  ;;  %p7619_p2 = scmp.lt.s32.totalorder %s7617_s25, %s7613_s0 }
 0x45b   : > { %v5711_v40 = vrot.slane %v5710_v48, 4 }
 0x45c   : > { %5891 = vmatpush.bf16.msrb.mxu3 %v7505_v59  ;;  %p7615_p13 = pnand %p7614_p12, %p7778_p5  ;;  %p7620_p3 = por %p7619_p2, %p7618_p1 }
 0x45d   : > { %v5712_v11 = vadd.f32 %v5711_v40, %v5710_v48  ;;  %v7283_v48 = vor.u32 %v7517_v20, %v7282_v26 }
 0x45e   : > { %p7616_p0 = pneg %p7615_p13 }
 0x45f   : > { %v5713_v15 = vrot.slane %v5712_v11, 2 }
 0x460   : > { %5892 = vmatpush.bf16.msrb.mxu3 %v7504_v29  ;;  %p7621_p4 = pnand %p7620_p3, %p7616_p0 }
 0x461   : > { %v5714_v22 = vadd.f32 %v5713_v15, %v5712_v11 }
 0x463   : > { %v5715_v56 = vrot.slane %v5714_v22, 1 }
 0x464   : > { %5893 = vmatpush.bf16.msrb.mxu3 %v7503_v55 }
 0x465   : > { %v5716_v6 = vadd.f32 %v5715_v56, %v5714_v22 }
 0x467   : > { %v5725_v53 = vmul.f32 %v5723_v31, %v5716_v6 }
 0x468   : > { %5894 = vmatpush.bf16.msrb.mxu3 %v7502_v5 }
 0x469   : > { %v5727_v4 = vpack.c.bf16 %v5725_v53, %v5725_v53 }
 0x46b   : > { %v5751_v45 = vunpack.c.l.b16 %v5727_v4 }
 0x46d   : > { %v5753_v33 = vsel %vm5752_vm14, %v5751_v45, %v5750_v0  ;;  %v7584_v45 = vld [vmem:[%s9571_s11] ss:$0 sm:$0xff] }
 0x46e   : > { %v5754_v34 = vpack.c.b16 %v5753_v33, %v5753_v33 }
 0x470   : > { %5812 = vmatmul.bf16.vlgmr.msra.gmra.mxu2 %v5754_v34 }
 0x480   : > { %7300 = vmatmul.msk.bf16.vlgmr.msrb.gmra.mxu2 %vm660_vm2, %v7255_v42 }
 0x490   : > { %7301 = vmatmul.msk.bf16.gmra.mxu2 %vm660_vm2, %v7259_v32 }
 0x4a0   : > { %7302 = vmatmul.msk.bf16.gmra.mxu2 %vm660_vm2, %v7263_v12 }
 0x4b0   : > { %7303 = vmatmul.msk.bf16.gmra.mxu2 %vm660_vm2, %v7267_v60 }
 0x4c0   : > { %7304 = vmatmul.msk.bf16.gmra.mxu2 %vm660_vm2, %v7271_v3 }
 0x4d0   : > { %7305 = vmatmul.msk.bf16.gmra.mxu2 %vm660_vm2, %v7275_v50 }
 0x4e0   : > { %7306 = vmatmul.msk.bf16.gmra.mxu2 %vm660_vm2, %v7279_v38 }
 0x4f0   : > { %7307 = vmatmul.msk.bf16.gmra.mxu2 %vm660_vm2, %v7283_v48 }
 0x4f3   : > { %v5813_v24 = vpop.f32.mrf.mxu2 }
 0x4f4   : > { %v5814_v40 = vadd.f32 %v7582_v41, %v5813_v24 }
 0x4f6   : > { %v5817_v17 = vmax.f32 %v5814_v40, 0.0 }
 0x4f8   : > { %v5818_v11 = vpack.c.bf16 %v5817_v17, %v5817_v17 }
 0x4fa   : > { %5895 = vmatmul.bf16.vlgmr.msrb.gmra.mxu3 %v5818_v11 }
 0x4fb   : > { %v5815_v63 = vpop.f32.mrf.mxu2 }
 0x503   : > { %v6044_v15 = vpop.f32.mrf.mxu2 }
 0x504   : > { %v6045_v44 = vadd.f32 %v9471_v52, %v6044_v15 }
 0x50b   : > { %v6046_v31 = vpop.f32.mrf.mxu2 }
 0x50c   : > { %v6047_v50 = vadd.f32 %v9471_v52, %v6046_v31 }
 0x513   : > { %v6049_v47 = vpop.f32.mrf.mxu2 }
 0x514   : > { %v6050_v39 = vadd.f32 %v9471_v52, %v6049_v47 }
 0x51b   : > { %v6051_v22 = vpop.f32.mrf.mxu2 }
 0x51c   : > { %v6052_v41 = vadd.f32 %v9471_v52, %v6051_v22 }
 0x523   : > { %v6054_v19 = vpop.f32.mrf.mxu2 }
 0x524   : > { %v6055_v11 = vadd.f32 %v9471_v52, %v6054_v19 }
 0x52b   : > { %v6056_v56 = vpop.f32.mrf.mxu2 }
 0x52c   : > { %v6057_v63 = vadd.f32 %v9471_v52, %v6056_v56 }
 0x533   : > { %v6059_v6 = vpop.f32.mrf.mxu2 }
 0x534   : > { %v6060_v15 = vadd.f32 %v9471_v52, %v6059_v6 }
 0x53b   : > { %v6061_v28 = vpop.f32.mrf.mxu2 }
 0x53c   : > { %v6062_v22 = vadd.f32 %v9471_v52, %v6061_v28 }
 0x543   : > { %v6064_v53 = vpop.f32.mrf.mxu2 }
 0x54b   : > { %v9455_v4 = vpop.f32.mrf.mxu2 }
 0x54c   : > { %v6067_v28 = vadd.f32 %v9471_v52, %v9455_v4 }
 0x553   : > { %v9457_v0 = vpop.f32.mrf.mxu2 }
 0x55b   : > { %v9462_v59 = vpop.f32.mrf.mxu2 }
 0x563   : > { %v9464_v7 = vpop.f32.mrf.mxu2 }
 0x56b   : > { %v9466_v8 = vpop.f32.mrf.mxu2 }
 0x573   : > { %v6079_v48 = vpop.f32.mrf.mxu2 }
 0x57d   : > { %v5896_v33 = vpop.f32.mrf.mxu3 }
 0x57e   : > { %v5897_v34 = vadd.f32 %v7584_v45, %v5896_v33 }
 0x580   : > { %v7251_v1 = vmul.f32 -1.442695, %v5897_v34 }
 0x582   : > { %7587 = vpow2.f32 %v7251_v1 }
 0x585   : > { %v5898_v36 = vpop.f32.mrf.mxu3 }
 0x588   : > { %v7588_v42 = vpop.eup %7587 }
 0x589   : > { %v5903_v29 = vadd.f32 1.0, %v7588_v42 }
 0x58b   : > { %7589 = vrcp.f32 %v5903_v29  ;;  %v5915_v35 = vand.u32 2147483648, %v5903_v29  ;;  %v5913_v5 = vand.u32 2147483647, %v5903_v29  ;;  %vm5909_vm0 = vweird.f32 %v5903_v29 }
 0x58d   : > { %v5916_v60 = vor.u32 1.1754944e-38, %v5915_v35  ;;  %vm5914_vm2 = vcmp.eq.f32.partialorder %v5913_v5, 8.507059e+37  ;;  %v6081_v35 = vpop.f32.mrf.mxu2 }
 0x591   : > { %v7590_v27 = vpop.eup %7589 }
 0x592   : > { %v5905_v32 = vmul.f32 %v7590_v27, %v5903_v29  ;;  %vm5910_vm15 = vweird.f32 %v7590_v27 }
 0x593   : > { %vm5911_vm1 = vmor %vm5909_vm0, %vm5910_vm15 }
 0x594   : > { %v5906_v55 = vsub.f32 1.0, %v5905_v32 }
 0x596   : > { %v5907_v12 = vmul.f32 %v7590_v27, %v5906_v55 }
 0x598   : > { %v5908_v18 = vadd.f32 %v7590_v27, %v5907_v12 }
 0x59a   : > { %v5912_v54 = vsel %vm5911_vm1, %v7590_v27, %v5908_v18  ;;  %v6077_v18 = vadd.f32 %v9471_v52, %v9466_v8 }
 0x59b   : > { %v5917_v13 = vsel %vm5914_vm2, %v5916_v60, %v5912_v54 }
 0x59c   : > { %v6085_v3 = vrot.slane %v5917_v13, 1  ;;  %v6086_v51 = vperm.slane %v5917_v13, 0  ;;  %v6082_v13 = vadd.f32 %v9471_v52, %v6081_v35 }
 0x59e   : > { %v6087_v61 = vperm.slane %v6085_v3, 0  ;;  %v6090_v38 = vmul.f32 %v6086_v51, %v9321_v37  ;;  %v6091_v26 = vmul.f32 %v6086_v51, %v9318_v23  ;;  %v6092_v20 = vmul.f32 %v6086_v51, %v9324_v43 }
 0x59f   : > { %v6093_v24 = vmul.f32 %v6086_v51, %v9329_v21  ;;  %v6094_v40 = vmul.f32 %v6086_v51, %v9333_v30  ;;  %v6095_v17 = vmul.f32 %v6086_v51, %v9337_v2  ;;  %v6096_v37 = vmul.f32 %v6086_v51, %v9341_v49 }
 0x5a0   : > { %v6097_v23 = vmul.f32 %v6086_v51, %v9345_v10  ;;  %v6106_v43 = vadd.f32 %v6090_v38, %v6045_v44  ;;  %v6107_v31 = vadd.f32 %v6091_v26, %v6047_v50  ;;  %v6108_v47 = vadd.f32 %v6092_v20, %v6050_v39 }
 0x5a1   : > { %v6098_v21 = vmul.f32 %v6087_v61, %v9359_v16  ;;  %v6109_v30 = vadd.f32 %v6093_v24, %v6052_v41  ;;  %v6110_v45 = vadd.f32 %v6094_v40, %v6055_v11  ;;  %v6065_v2 = vadd.f32 %v9471_v52, %v6064_v53 }
 0x5a2   : > { %v6099_v19 = vmul.f32 %v6087_v61, %v9354_v57  ;;  %v6100_v56 = vmul.f32 %v6087_v61, %v9362_v14  ;;  %v6111_v6 = vadd.f32 %v6095_v17, %v6057_v63  ;;  %v6112_v49 = vadd.f32 %v6096_v37, %v6060_v15 }
 0x5a3   : > { %v6122_v10 = vmax.f32 %v6106_v43, 0.0  ;;  %v6123_v33 = vmax.f32 %v6107_v31, 0.0  ;;  %v6124_v34 = vmax.f32 %v6108_v47, 0.0  ;;  %v6101_v16 = vmul.f32 %v6087_v61, %v9370_v25 }
 0x5a4   : > { %v6113_v1 = vadd.f32 %v6097_v23, %v6062_v22  ;;  %v6125_v36 = vmax.f32 %v6109_v30, 0.0  ;;  %v6070_v53 = vadd.f32 %v9471_v52, %v9457_v0  ;;  %v6072_v57 = vadd.f32 %v9471_v52, %v9462_v59 }
 0x5a5   : > { %v6114_v14 = vadd.f32 %v6098_v21, %v6065_v2  ;;  %v6126_v42 = vmax.f32 %v6110_v45, 0.0  ;;  %6138 = vst [vmem:[%s8533_s18] sm:$0xff] %v6122_v10  ;;  %v6115_v29 = vadd.f32 %v6099_v19, %v6067_v28  ;;  %v6127_v27 = vmax.f32 %v6111_v6, 0.0 }
 0x5a6   : > { %6139 = vst [vmem:[%s8533_s18 + $0x8] sm:$0xff] %v6123_v33  ;;  %v6102_v4 = vmul.f32 %v6087_v61, %v9375_v9  ;;  %v6103_v25 = vmul.f32 %v6087_v61, %v9385_v62  ;;  %v6116_v32 = vadd.f32 %v6100_v56, %v6070_v53  ;;  %v6128_v55 = vmax.f32 %v6112_v49, 0.0 }
 0x5a7   : > { %6140 = vst [vmem:[%s8533_s18 + $0x10] sm:$0xff] %v6124_v34  ;;  %v6075_v0 = vadd.f32 %v9471_v52, %v9464_v7  ;;  %v6104_v59 = vmul.f32 %v6087_v61, %v9395_v46  ;;  %v6117_v12 = vadd.f32 %v6101_v16, %v6072_v57  ;;  %v6129_v5 = vmax.f32 %v6113_v1, 0.0 }
 0x5a8   : > { %6141 = vst [vmem:[%s8533_s18 + $0x18] sm:$0xff] %v6125_v36  ;;  %v6105_v9 = vmul.f32 %v6087_v61, %v9407_v58  ;;  %v6130_v62 = vmax.f32 %v6114_v14, 0.0  ;;  %v6080_v7 = vadd.f32 %v9471_v52, %v6079_v48  ;;  %v6131_v46 = vmax.f32 %v6115_v29, 0.0 }
 0x5a9   : > { %6142 = vst [vmem:[%s8533_s18 + $0x20] sm:$0xff] %v6126_v42  ;;  %v6118_v60 = vadd.f32 %v6102_v4, %v6075_v0  ;;  %v6119_v54 = vadd.f32 %v6103_v25, %v6077_v18  ;;  %v6132_v8 = vmax.f32 %v6116_v32, 0.0  ;;  %v6133_v3 = vmax.f32 %v6117_v12, 0.0 }
 0x5aa   : > { %6143 = vst [vmem:[%s8533_s18 + $0x28] sm:$0xff] %v6127_v27  ;;  %v6120_v58 = vadd.f32 %v6104_v59, %v6080_v7  ;;  %v6121_v51 = vadd.f32 %v6105_v9, %v6082_v13 }
 0x5ab   : > { %6144 = vst [vmem:[%s8533_s18 + $0x30] sm:$0xff] %v6128_v55  ;;  %v6134_v44 = vmax.f32 %v6118_v60, 0.0  ;;  %v6135_v52 = vmax.f32 %v6119_v54, 0.0 }
 0x5ac   : > { %6145 = vst [vmem:[%s8533_s18 + $0x38] sm:$0xff] %v6129_v5  ;;  %v6136_v50 = vmax.f32 %v6120_v58, 0.0  ;;  %v6137_v39 = vmax.f32 %v6121_v51, 0.0 }
 0x5ad   : > { %6146 = vst [vmem:[%s8533_s18 + $0x40] sm:$0xff] %v6130_v62 }
 0x5ae   : > { %6147 = vst [vmem:[%s8533_s18 + $0x48] sm:$0xff] %v6131_v46 }
 0x5af   : > { %6148 = vst [vmem:[%s8533_s18 + $0x50] sm:$0xff] %v6132_v8 }
 0x5b0   : > { %6149 = vst [vmem:[%s8533_s18 + $0x58] sm:$0xff] %v6133_v3 }
 0x5b1   : > { %6150 = vst [vmem:[%s8533_s18 + $0x60] sm:$0xff] %v6134_v44 }
 0x5b2   : > { %6151 = vst [vmem:[%s8533_s18 + $0x68] sm:$0xff] %v6135_v52 }
 0x5b3   : > { %6152 = vst [vmem:[%s8533_s18 + $0x70] sm:$0xff] %v6136_v50 }
 0x5b4   : > { %6153 = vst [vmem:[%s8533_s18 + $0x78] sm:$0xff] %v6137_v39 }
 0x5b5   : > { %7624 = shalt.err (!%p7621_p4)
}
 0x5b6   : > { %s7663_s18 = smov 128   ;;  %s7664_s22 = smov 8  }
 0x5b7   : > { %7537 = dma.vmem_to_hbm [thread:$0]  (%p7778_p5), %s6169_s15, 2048, %s6171_s19, %s6155_s27, %s7663_s18, %s7663_s18, %s7664_s22  }
 0x5b8 PF: > { %p7543_p7 = scmp.ge.s32.totalorder %s7659_s16, 2  ;;  %s6185_s24 = sand.u32 1, %s7647_s29  }
 0x5b9   : > { %s6186_s26 = scalar_lea.sflag [#allocation4], %s6185_s24 }
 0x5ba   : > { %p7540_p8 = pnand %p7543_p7, %p7782_p6 }
 0x5bc   : > { %p7541_p9 = pneg %p7540_p8 }
 0x5be   : > { %7642 = dma.done.wait (%p7541_p9), %s6186_s26, 2048  }
 0x5bf   : > { %7644 = vsyncadd (%p7541_p9), %s6186_s26, 4294965248  ;;  %s9600_s16 = sld [smem:[#allocation7_spill]]  ;;  %s9603_s29 = smov %s7651_s30 }
 0x5c0   : > { %s9601_s21 = sld [smem:[#allocation6_spill]] }
 0x5c1   : > { %s9602_s15 = sld [smem:[#allocation8_spill]] }
 0x5c5   : > { %p24_p10 = scmp.ge.s32.totalorder %s9600_s16, 4  }
 0x5c6   : > { %s9604_s30 = smov %s9601_s21 }
 0x5c7   :  { %26 = sbr.rel (!%p24_p10) target bundleno = 6 (0x6), region = 128 }
 0x5cc   :  { %6192 = vsyncpa [#allocation4], 1 }
 0x5cd   :  { %6194 = vsyncpa [#allocation4 + $0x1], 1 }

</bundles_post_ra>
